<compile_context>
chip_gen: v5e
topology: v5e:2x2
jax: 0.10.0
libtpu: 0.0.40
codegen_flags: <defaults>
</compile_context>

<pallas_src>
import math
from functools import lru_cache, partial

import jax
import jax.numpy as jnp
from jax import lax
from jax.experimental import pallas as pl
from jax.experimental.pallas import tpu as pltpu

X_DIM = 2
Y_DIM = 1
HIDDEN = 32
LATENT = 32
DEC_DIM = 2 * HIDDEN + LATENT   # 96, decoder trunk width
LANES = 128
SLAB_ALIGN = 16                 # bf16 packs 16 rows per vreg -> aligned slices


def _round_up(n, m):
    return ((n + m - 1) // m) * m


# ----------------------------- weight slab layout ------------------------------
# All 40 original parameters live in ONE bf16 (SLAB_ROWS, 128) slab; parallel
# layers are fused while packing (see pack_params).  name -> (rows, cols).
_SLAB_ENTRIES = (
    ("cx_W", (X_DIM, 3 * HIDDEN)),        # [r_in_Wx | z_in_Wx | r_ctx_W]
    ("cy_W", (Y_DIM, 2 * HIDDEN)),        # [r_in_Wy | z_in_Wy]
    ("cxy_b", (1, 3 * HIDDEN)),           # [r_in_b  | z_in_b  | r_ctx_b]
    ("enc_W0", (2 * HIDDEN, 2 * HIDDEN)), ("enc_b0", (1, 2 * HIDDEN)),
    ("enc_W1", (2 * HIDDEN, 2 * HIDDEN)), ("enc_b1", (1, 2 * HIDDEN)),
    ("enc_W2", (2 * HIDDEN, 2 * HIDDEN)), ("enc_b2", (1, 2 * HIDDEN)),
    ("tx_W", (X_DIM, 2 * HIDDEN)),        # [r_tgt_W | d_tgt_W]
    ("tx_b", (1, 2 * HIDDEN)),
    ("z_head_W", (HIDDEN, 2 * LATENT)),   # [z_mean_W | z_logvar_W]
    ("z_head_b", (1, 2 * LATENT)),
    ("dec_W0", (DEC_DIM, DEC_DIM)), ("dec_b0", (1, DEC_DIM)),
    ("dec_W1", (DEC_DIM, DEC_DIM)), ("dec_b1", (1, DEC_DIM)),
    ("dec_W2", (DEC_DIM, DEC_DIM)), ("dec_b2", (1, DEC_DIM)),
    ("dec_head_W", (DEC_DIM, 2)),         # [d_mean_W | d_logvar_W]
    ("dec_head_b", (1, 2)),
)


def _build_slab_layout():
    offs, row = {}, 0
    for name, (r, c) in _SLAB_ENTRIES:
        offs[name] = (row, r, c)
        row += _round_up(r, SLAB_ALIGN)   # every slice starts vreg-aligned
    return offs, row


_OFFSETS, SLAB_ROWS = _build_slab_layout()


def _act_layout(nc, nt):
    """Row offsets inside the packed per-batch activation block (f32 x 128)."""
    tgt_off = _round_up(nc, 8)
    eps_off = tgt_off + _round_up(nt, 8)
    rows = eps_off + 8
    return tgt_off, eps_off, rows


# ----------------------------- shared math helpers ----------------------------
def _relu(x):
    return jnp.maximum(x, 0.0)


def _softplus(x):
    # numerically stable log(1 + exp(x))
    return jnp.maximum(x, 0.0) + jnp.log(1.0 + jnp.exp(-jnp.abs(x)))


def _mxu(a, b):
    """Single-pass MXU matmul: bf16 operands, f32 accumulation."""
    return jnp.dot(a.astype(jnp.bfloat16), b.astype(jnp.bfloat16),
                   preferred_element_type=jnp.float32)


# ----------------------------- Pallas kernel ----------------------------------
def latent_model_kernel(acts_ref, slab_ref, out_ref, *,
                        bps, nc, nt, tgt_off, eps_off):
    def w(name):
        row, r, c = _OFFSETS[name]
        return slab_ref[row:row + r, 0:c]   # bf16, lazily loaded at point of use

    for b in range(bps):                    # static unroll over batches per step
        acts = acts_ref[b]                  # (ACT_ROWS, 128) f32, host-packed
        cx = acts[0:nc, 0:X_DIM]                          # (Nc, 2)
        cy = acts[0:nc, X_DIM:X_DIM + Y_DIM]              # (Nc, 1)
        tx = acts[tgt_off:tgt_off + nt, 0:X_DIM]          # (Nt, 2)
        eps = acts[eps_off:eps_off + 1, 0:LATENT]         # (1, L)

        # -- fused input layers (det-enc | latent-enc | context transform) as
        #    VPU FMAs: K<=2 contractions never pay an MXU round trip. --
        cxW = w("cx_W")                                   # (2, 96)
        h96 = (cx[:, 0:1] * cxW[0:1, :] + cx[:, 1:2] * cxW[1:2, :]
               + w("cxy_b"))                              # (Nc, 96)
        h = h96[:, :2 * HIDDEN] + cy * w("cy_W")          # (Nc, 64)
        xi = h96[:, 2 * HIDDEN:]                          # (Nc, 32) attn keys

        # -- fused 3-layer MLP (block-diagonal weights run both encoders) --
        h = _relu(_mxu(h, w("enc_W0")) + w("enc_b0"))
        h = _relu(_mxu(h, w("enc_W1")) + w("enc_b1"))
        h = _relu(_mxu(h, w("enc_W2")) + w("enc_b2"))
        ri = h[:, :HIDDEN]                                # (Nc, H) attn values
        si = h[:, HIDDEN:]                                # (Nc, H) latent path

        # -- fused target transforms (attention query | decoder x) as FMAs --
        txW = w("tx_W")                                   # (2, 64)
        th = (tx[:, 0:1] * txW[0:1, :] + tx[:, 1:2] * txW[1:2, :]
              + w("tx_b"))                                # (Nt, 64)
        x_star = th[:, :HIDDEN]
        xd = th[:, HIDDEN:]

        # -- dot-product attention over the context set --
        scores = lax.dot_general(
            x_star.astype(jnp.bfloat16), xi.astype(jnp.bfloat16),
            (((1,), (1,)), ((), ())),
            preferred_element_type=jnp.float32) * (1.0 / math.sqrt(HIDDEN))
        m = jnp.max(scores, axis=-1, keepdims=True)
        e = jnp.exp(scores - m)
        wgt = e * pl.reciprocal(jnp.sum(e, axis=-1, keepdims=True), approx=True)
        rc = _mxu(wgt, ri)                                # (Nt, H)

        # -- latent heads (fused mean | log_var) + reparameterised sample --
        sc = jnp.mean(si, axis=0, keepdims=True)          # (1, H)
        mv = _mxu(sc, w("z_head_W")) + w("z_head_b")      # (1, 2L)
        mu = mv[:, :LATENT]
        sig_z = 0.1 + 0.9 / (1.0 + jnp.exp(-mv[:, LATENT:]))   # exact sigmoid
        z = mu + sig_z * eps                              # (1, L)

        # -- decoder trunk: layer 0 as split matmul of cat([rc, z, xd]) --
        r0, _, c0 = _OFFSETS["dec_W0"]
        hd = _relu(_mxu(rc, slab_ref[r0:r0 + HIDDEN, 0:c0])
                   + _mxu(z, slab_ref[r0 + HIDDEN:r0 + HIDDEN + LATENT, 0:c0])
                   + _mxu(xd, slab_ref[r0 + HIDDEN + LATENT:r0 + DEC_DIM, 0:c0])
                   + w("dec_b0"))
        hd = _relu(_mxu(hd, w("dec_W1")) + w("dec_b1"))
        hd = _relu(_mxu(hd, w("dec_W2")) + w("dec_b2"))

        # -- fused output heads: [mean | log_sigma] -> [mean | sigma] store --
        ms = _mxu(hd, w("dec_head_W")) + w("dec_head_b")  # (Nt, 2)
        col = lax.broadcasted_iota(jnp.int32, ms.shape, 1)
        out_ref[b] = jnp.where(col == 0, ms, 0.1 + 0.9 * _softplus(ms))


# ----------------------------- wrapper -----------------------------------------
@lru_cache(maxsize=None)
def _build_forward(B, Nc, Nt, bps, single_buffer_slab):
    """Build & jit the packed-activation Pallas forward for one problem size."""
    tgt_off, eps_off, act_rows = _act_layout(Nc, Nt)
    kernel = partial(latent_model_kernel, bps=bps, nc=Nc, nt=Nt,
                     tgt_off=tgt_off, eps_off=eps_off)

    slab_kw = {}
    if single_buffer_slab:
        # Slab is grid-invariant (index_map always (0,0)): single-buffer it so
        # no second ~200 KiB VMEM copy / pipeline bookkeeping is allocated.
        slab_kw["pipeline_mode"] = pl.Buffered(1)

    call = pl.pallas_call(
        kernel,
        grid=(B // bps,),
        in_specs=[
            pl.BlockSpec((bps, act_rows, LANES), lambda g: (g, 0, 0)),
            pl.BlockSpec((SLAB_ROWS, LANES), lambda g: (0, 0), **slab_kw),
        ],
        out_specs=pl.BlockSpec((bps, Nt, 2), lambda g: (g, 0, 0)),
        out_shape=jax.ShapeDtypeStruct((B, Nt, 2), jnp.float32),
        compiler_params=pltpu.CompilerParams(
            dimension_semantics=("parallel",)),
    )

    def forward(cx, cy, tx, eps, slab):
        # Host-side packing of the 4 tiny activations into ONE padded block per
        # batch -> a single activation DMA per grid step.
        acts = jnp.zeros((B, act_rows, LANES), jnp.float32)
        acts = acts.at[:, 0:Nc, 0:X_DIM].set(cx)
        acts = acts.at[:, 0:Nc, X_DIM:X_DIM + Y_DIM].set(cy)
        acts = acts.at[:, tgt_off:tgt_off + Nt, 0:X_DIM].set(tx)
        acts = acts.at[:, eps_off:eps_off + 1, 0:LATENT].set(eps)
        out = call(acts, slab)
        return out[..., 0:1], out[..., 1:2]          # mean, sigma

    return jax.jit(forward)


def _batches_per_step(B):
    """Single-TC chips (v5e/v6e): fold the whole batch into one grid step.
    Dual-TC v7x: keep a 2-wide parallel grid so both TensorCores stay busy."""
    try:
        kind = jax.devices()[0].device_kind.lower()
    except Exception:
        kind = ""
    bps = max(1, B // 2) if "v7" in kind else B
    if bps < 1 or B % bps != 0:
        bps = 1
    return bps


def latent_model_forward(context_x, context_y, target_x, eps, slab):
    B, Nc, _ = context_x.shape
    Nt = target_x.shape[1]
    bps = _batches_per_step(B)
    try:
        fwd = _build_forward(B, Nc, Nt, bps, True)
        out = fwd(context_x, context_y, target_x, eps, slab)
        jax.block_until_ready(out)
    except Exception:
        # pl.Buffered(1) not supported by this JAX version -> default pipelining
        # (the grid-invariant index_map still avoids re-fetching the slab).
        fwd = _build_forward(B, Nc, Nt, bps, False)
        out = fwd(context_x, context_y, target_x, eps, slab)
    return out


# ----------------------------- parameters -------------------------------------
def _init_linear(key, fan_in, fan_out):
    kw, kb = jax.random.split(key)
    bound = 1.0 / math.sqrt(fan_in)
    W = jax.random.uniform(kw, (fan_in, fan_out), jnp.float32, -bound, bound)
    b = jax.random.uniform(kb, (1, fan_out), jnp.float32, -bound, bound)
    return W, b


def init_params(key):
    """Original (unfused) parameters, stored as [in, out] (pre-transposed)."""
    layers = [
        ("r_in", X_DIM + Y_DIM, HIDDEN),
        ("r_mlp0", HIDDEN, HIDDEN), ("r_mlp1", HIDDEN, HIDDEN), ("r_mlp2", HIDDEN, HIDDEN),
        ("r_tgt", X_DIM, HIDDEN), ("r_ctx", X_DIM, HIDDEN),
        ("z_in", X_DIM + Y_DIM, HIDDEN),
        ("z_mlp0", HIDDEN, HIDDEN), ("z_mlp1", HIDDEN, HIDDEN), ("z_mlp2", HIDDEN, HIDDEN),
        ("z_mean", HIDDEN, LATENT), ("z_logvar", HIDDEN, LATENT),
        ("d_tgt", X_DIM, HIDDEN),
        ("d_mlp0", DEC_DIM, DEC_DIM), ("d_mlp1", DEC_DIM, DEC_DIM), ("d_mlp2", DEC_DIM, DEC_DIM),
        ("d_mean", DEC_DIM, Y_DIM), ("d_logvar", DEC_DIM, Y_DIM),
    ]
    keys = jax.random.split(key, len(layers))
    p = {}
    for k, (name, fi, fo) in zip(keys, layers):
        W, b = _init_linear(k, fi, fo)
        p[name + "_W"], p[name + "_b"] = W, b
    return p


def _cat1(xs):
    return jnp.concatenate(xs, axis=1)


def _block_diag(a, b):
    top = _cat1([a, jnp.zeros((a.shape[0], b.shape[1]), a.dtype)])
    bot = _cat1([jnp.zeros((b.shape[0], a.shape[1]), a.dtype), b])
    return jnp.concatenate([top, bot], axis=0)


def pack_params(p):
    """Fuse parallel layers and pack everything into one bf16 (SLAB_ROWS, 128) slab."""
    fused = {
        "cx_W": _cat1([p["r_in_W"][:X_DIM], p["z_in_W"][:X_DIM], p["r_ctx_W"]]),
        "cy_W": _cat1([p["r_in_W"][X_DIM:], p["z_in_W"][X_DIM:]]),
        "cxy_b": _cat1([p["r_in_b"], p["z_in_b"], p["r_ctx_b"]]),
        "enc_W0": _block_diag(p["r_mlp0_W"], p["z_mlp0_W"]),
        "enc_b0": _cat1([p["r_mlp0_b"], p["z_mlp0_b"]]),
        "enc_W1": _block_diag(p["r_mlp1_W"], p["z_mlp1_W"]),
        "enc_b1": _cat1([p["r_mlp1_b"], p["z_mlp1_b"]]),
        "enc_W2": _block_diag(p["r_mlp2_W"], p["z_mlp2_W"]),
        "enc_b2": _cat1([p["r_mlp2_b"], p["z_mlp2_b"]]),
        "tx_W": _cat1([p["r_tgt_W"], p["d_tgt_W"]]),
        "tx_b": _cat1([p["r_tgt_b"], p["d_tgt_b"]]),
        "z_head_W": _cat1([p["z_mean_W"], p["z_logvar_W"]]),
        "z_head_b": _cat1([p["z_mean_b"], p["z_logvar_b"]]),
        "dec_W0": p["d_mlp0_W"], "dec_b0": p["d_mlp0_b"],
        "dec_W1": p["d_mlp1_W"], "dec_b1": p["d_mlp1_b"],
        "dec_W2": p["d_mlp2_W"], "dec_b2": p["d_mlp2_b"],
        "dec_head_W": _cat1([p["d_mean_W"], p["d_logvar_W"]]),
        "dec_head_b": _cat1([p["d_mean_b"], p["d_logvar_b"]]),
    }
    slab = jnp.zeros((SLAB_ROWS, LANES), jnp.bfloat16)
    for name, (row, r, c) in _OFFSETS.items():
        arr = fused[name]
        assert arr.shape == (r, c), (name, arr.shape, (r, c))
        slab = slab.at[row:row + r, :c].set(arr.astype(jnp.bfloat16))
    return slab


# ----------------------------- pure-JAX reference ------------------------------
def reference_forward(p, cx, cy, tx, eps):
    def fma_lin(x, W, b):
        # Small-K input layers as f32 elementwise FMAs (matches the kernel's VPU path).
        acc = b
        for k in range(W.shape[0]):
            acc = acc + x[:, k:k + 1] * W[k:k + 1, :]
        return acc

    def mxu_lin(x, W, b):
        return _mxu(x, W) + b

    def one(cx, cy, tx, eps):
        ci = jnp.concatenate([cx, cy], axis=-1)
        # DeterministicEncoder
        ri = fma_lin(ci, p["r_in_W"], p["r_in_b"])
        for i in range(3):
            ri = jax.nn.relu(mxu_lin(ri, p[f"r_mlp{i}_W"], p[f"r_mlp{i}_b"]))
        x_star = fma_lin(tx, p["r_tgt_W"], p["r_tgt_b"])
        xi = fma_lin(cx, p["r_ctx_W"], p["r_ctx_b"])
        scores = _mxu(x_star, xi.T) * (1.0 / math.sqrt(HIDDEN))
        wgt = jax.nn.softmax(scores, axis=-1)
        rc = _mxu(wgt, ri)
        # LatentEncoder on context
        si = fma_lin(ci, p["z_in_W"], p["z_in_b"])
        for i in range(3):
            si = jax.nn.relu(mxu_lin(si, p[f"z_mlp{i}_W"], p[f"z_mlp{i}_b"]))
        sc = jnp.mean(si, axis=0, keepdims=True)
        mu = mxu_lin(sc, p["z_mean_W"], p["z_mean_b"])
        logv = mxu_lin(sc, p["z_logvar_W"], p["z_logvar_b"])
        sig_z = 0.1 + 0.9 * jax.nn.sigmoid(logv)
        z = mu + sig_z * eps
        # Decoder
        xd = fma_lin(tx, p["d_tgt_W"], p["d_tgt_b"])
        h = jnp.concatenate(
            [rc, jnp.broadcast_to(z, (tx.shape[0], LATENT)), xd], axis=-1)
        for i in range(3):
            h = jax.nn.relu(mxu_lin(h, p[f"d_mlp{i}_W"], p[f"d_mlp{i}_b"]))
        mean = mxu_lin(h, p["d_mean_W"], p["d_mean_b"])
        log_sigma = mxu_lin(h, p["d_logvar_W"], p["d_logvar_b"])
        sigma = 0.1 + 0.9 * jax.nn.softplus(log_sigma)
        return mean, sigma

    return jax.vmap(one)(cx, cy, tx, eps)


# ----------------------------- main --------------------------------------------
if __name__ == "__main__":
    key = jax.random.PRNGKey(0)
    kp, kcx, kcy, ktx, keps = jax.random.split(key, 5)

    B, Nc, Nt = 2, 8, 8
    params = init_params(kp)
    # Round parameters to bf16 once so the bf16 weight slab and the f32
    # reference operate on bit-identical parameter values.
    params = jax.tree_util.tree_map(
        lambda a: a.astype(jnp.bfloat16).astype(jnp.float32), params)
    slab = pack_params(params)

    context_x = jax.random.normal(kcx, (B, Nc, X_DIM), jnp.float32)
    context_y = jax.random.normal(kcy, (B, Nc, Y_DIM), jnp.float32)
    target_x = jax.random.normal(ktx, (B, Nt, X_DIM), jnp.float32)
    eps = jax.random.normal(keps, (B, 1, LATENT), jnp.float32)   # rsample noise

    mean, sigma = latent_model_forward(context_x, context_y, target_x, eps, slab)
    jax.block_until_ready((mean, sigma))

    ref_mean, ref_sigma = reference_forward(params, context_x, context_y,
                                            target_x, eps)

    assert mean.shape == (B, Nt, Y_DIM) and sigma.shape == (B, Nt, Y_DIM)
    err_m = float(jnp.max(jnp.abs(mean - ref_mean)))
    err_s = float(jnp.max(jnp.abs(sigma - ref_sigma)))
    assert jnp.allclose(mean, ref_mean, rtol=3e-3, atol=3e-3), ("mean", err_m)
    assert jnp.allclose(sigma, ref_sigma, rtol=3e-3, atol=3e-3), ("sigma", err_s)
    assert bool(jnp.all(sigma > 0.0))

    print("KERNEL_OK")
</pallas_src>

<mosaic_0001>
module attributes {stable_mosaic.version = 11 : i64} {
  func.func @latent_model_kernel(%arg0: i32, %arg1: memref<2x24x128xf32, #tpu.memory_space<vmem>>, %arg2: memref<816x128xbf16, #tpu.memory_space<vmem>>, %arg3: memref<2x8x2xf32, #tpu.memory_space<vmem>>) attributes {dimension_semantics = [#tpu.dimension_semantics<parallel>], iteration_bounds = array<i64: 1>, scalar_prefetch = 0 : i64, scratch_operands = 0 : i64, tpu.core_type = #tpu.core_type<tc>, window_params = [{transform_indices = @transform_0, window_bounds = array<i64: 2, 24, 128>}, {pipeline_mode = #tpu.pipeline_mode<synchronous>, transform_indices = @transform_1, window_bounds = array<i64: 816, 128>}, {transform_indices = @transform_2, window_bounds = array<i64: 2, 8, 2>}]} {
    %c0 = arith.constant 0 : index
    %c0_0 = arith.constant 0 : index
    %c0_1 = arith.constant 0 : index
    %0 = vector.load %arg1[%c0, %c0_0, %c0_1] : memref<2x24x128xf32, #tpu.memory_space<vmem>>, vector<1x24x128xf32>
    %1 = vector.shape_cast %0 : vector<1x24x128xf32> to vector<24x128xf32>
    %2 = vector.extract_strided_slice %1 {offsets = [0, 0], sizes = [8, 2], strides = [1, 1]} : vector<24x128xf32> to vector<8x2xf32>
    %3 = vector.extract_strided_slice %1 {offsets = [0, 2], sizes = [8, 1], strides = [1, 1]} : vector<24x128xf32> to vector<8x1xf32>
    %4 = vector.extract_strided_slice %1 {offsets = [8, 0], sizes = [8, 2], strides = [1, 1]} : vector<24x128xf32> to vector<8x2xf32>
    %5 = vector.extract_strided_slice %1 {offsets = [16, 0], sizes = [1, 32], strides = [1, 1]} : vector<24x128xf32> to vector<1x32xf32>
    %c0_2 = arith.constant 0 : index
    %c0_3 = arith.constant 0 : index
    %6 = vector.load %arg2[%c0_2, %c0_3] : memref<816x128xbf16, #tpu.memory_space<vmem>>, vector<2x96xbf16>
    %7 = vector.extract_strided_slice %2 {offsets = [0, 0], sizes = [8, 1], strides = [1, 1]} : vector<8x2xf32> to vector<8x1xf32>
    %8 = vector.extract_strided_slice %6 {offsets = [0, 0], sizes = [1, 96], strides = [1, 1]} : vector<2x96xbf16> to vector<1x96xbf16>
    %9 = arith.extf %8 : vector<1x96xbf16> to vector<1x96xf32>
    %10 = vector.broadcast %7 : vector<8x1xf32> to vector<8x96xf32>
    %11 = vector.broadcast %9 : vector<1x96xf32> to vector<8x96xf32>
    %12 = arith.mulf %10, %11 : vector<8x96xf32>
    %13 = vector.extract_strided_slice %2 {offsets = [0, 1], sizes = [8, 1], strides = [1, 1]} : vector<8x2xf32> to vector<8x1xf32>
    %14 = vector.extract_strided_slice %6 {offsets = [1, 0], sizes = [1, 96], strides = [1, 1]} : vector<2x96xbf16> to vector<1x96xbf16>
    %15 = arith.extf %14 : vector<1x96xbf16> to vector<1x96xf32>
    %16 = vector.broadcast %13 : vector<8x1xf32> to vector<8x96xf32>
    %17 = vector.broadcast %15 : vector<1x96xf32> to vector<8x96xf32>
    %18 = arith.mulf %16, %17 : vector<8x96xf32>
    %19 = arith.addf %12, %18 : vector<8x96xf32>
    %c32 = arith.constant 32 : index
    %c0_4 = arith.constant 0 : index
    %20 = vector.load %arg2[%c32, %c0_4] : memref<816x128xbf16, #tpu.memory_space<vmem>>, vector<1x96xbf16>
    %21 = arith.extf %20 : vector<1x96xbf16> to vector<1x96xf32>
    %22 = vector.broadcast %21 : vector<1x96xf32> to vector<8x96xf32>
    %23 = arith.addf %19, %22 : vector<8x96xf32>
    %24 = vector.extract_strided_slice %23 {offsets = [0, 0], sizes = [8, 64], strides = [1, 1]} : vector<8x96xf32> to vector<8x64xf32>
    %c16 = arith.constant 16 : index
    %c0_5 = arith.constant 0 : index
    %25 = vector.load %arg2[%c16, %c0_5] : memref<816x128xbf16, #tpu.memory_space<vmem>>, vector<1x64xbf16>
    %26 = arith.extf %25 : vector<1x64xbf16> to vector<1x64xf32>
    %27 = vector.broadcast %3 : vector<8x1xf32> to vector<8x64xf32>
    %28 = vector.broadcast %26 : vector<1x64xf32> to vector<8x64xf32>
    %29 = arith.mulf %27, %28 : vector<8x64xf32>
    %30 = arith.addf %24, %29 : vector<8x64xf32>
    %31 = vector.extract_strided_slice %23 {offsets = [0, 64], sizes = [8, 32], strides = [1, 1]} : vector<8x96xf32> to vector<8x32xf32>
    %c48 = arith.constant 48 : index
    %c0_6 = arith.constant 0 : index
    %32 = vector.load %arg2[%c48, %c0_6] : memref<816x128xbf16, #tpu.memory_space<vmem>>, vector<64x64xbf16>
    %33 = arith.truncf %30 : vector<8x64xf32> to vector<8x64xbf16>
    %cst = arith.constant dense<0.000000e+00> : vector<8x64xf32>
    %34 = tpu.matmul %33, %32, %cst {dimension_numbers = #tpu.dot_dimension_numbers<[1], [0], [0], [1], [0, 0, 1, 1], [], []>} : vector<8x64xbf16>, vector<64x64xbf16>, vector<8x64xf32> -> vector<8x64xf32>
    %c112 = arith.constant 112 : index
    %c0_7 = arith.constant 0 : index
    %35 = vector.load %arg2[%c112, %c0_7] : memref<816x128xbf16, #tpu.memory_space<vmem>>, vector<1x64xbf16>
    %36 = arith.extf %35 : vector<1x64xbf16> to vector<1x64xf32>
    %37 = vector.broadcast %36 : vector<1x64xf32> to vector<8x64xf32>
    %38 = arith.addf %34, %37 : vector<8x64xf32>
    %cst_8 = arith.constant 0.000000e+00 : f32
    %39 = vector.broadcast %cst_8 : f32 to vector<8x64xf32>
    %40 = arith.maximumf %38, %39 : vector<8x64xf32>
    %c128 = arith.constant 128 : index
    %c0_9 = arith.constant 0 : index
    %41 = vector.load %arg2[%c128, %c0_9] : memref<816x128xbf16, #tpu.memory_space<vmem>>, vector<64x64xbf16>
    %42 = arith.truncf %40 : vector<8x64xf32> to vector<8x64xbf16>
    %cst_10 = arith.constant dense<0.000000e+00> : vector<8x64xf32>
    %43 = tpu.matmul %42, %41, %cst_10 {dimension_numbers = #tpu.dot_dimension_numbers<[1], [0], [0], [1], [0, 0, 1, 1], [], []>} : vector<8x64xbf16>, vector<64x64xbf16>, vector<8x64xf32> -> vector<8x64xf32>
    %c192 = arith.constant 192 : index
    %c0_11 = arith.constant 0 : index
    %44 = vector.load %arg2[%c192, %c0_11] : memref<816x128xbf16, #tpu.memory_space<vmem>>, vector<1x64xbf16>
    %45 = arith.extf %44 : vector<1x64xbf16> to vector<1x64xf32>
    %46 = vector.broadcast %45 : vector<1x64xf32> to vector<8x64xf32>
    %47 = arith.addf %43, %46 : vector<8x64xf32>
    %cst_12 = arith.constant 0.000000e+00 : f32
    %48 = vector.broadcast %cst_12 : f32 to vector<8x64xf32>
    %49 = arith.maximumf %47, %48 : vector<8x64xf32>
    %c208 = arith.constant 208 : index
    %c0_13 = arith.constant 0 : index
    %50 = vector.load %arg2[%c208, %c0_13] : memref<816x128xbf16, #tpu.memory_space<vmem>>, vector<64x64xbf16>
    %51 = arith.truncf %49 : vector<8x64xf32> to vector<8x64xbf16>
    %cst_14 = arith.constant dense<0.000000e+00> : vector<8x64xf32>
    %52 = tpu.matmul %51, %50, %cst_14 {dimension_numbers = #tpu.dot_dimension_numbers<[1], [0], [0], [1], [0, 0, 1, 1], [], []>} : vector<8x64xbf16>, vector<64x64xbf16>, vector<8x64xf32> -> vector<8x64xf32>
    %c272 = arith.constant 272 : index
    %c0_15 = arith.constant 0 : index
    %53 = vector.load %arg2[%c272, %c0_15] : memref<816x128xbf16, #tpu.memory_space<vmem>>, vector<1x64xbf16>
    %54 = arith.extf %53 : vector<1x64xbf16> to vector<1x64xf32>
    %55 = vector.broadcast %54 : vector<1x64xf32> to vector<8x64xf32>
    %56 = arith.addf %52, %55 : vector<8x64xf32>
    %cst_16 = arith.constant 0.000000e+00 : f32
    %57 = vector.broadcast %cst_16 : f32 to vector<8x64xf32>
    %58 = arith.maximumf %56, %57 : vector<8x64xf32>
    %59 = vector.extract_strided_slice %58 {offsets = [0, 0], sizes = [8, 32], strides = [1, 1]} : vector<8x64xf32> to vector<8x32xf32>
    %60 = vector.extract_strided_slice %58 {offsets = [0, 32], sizes = [8, 32], strides = [1, 1]} : vector<8x64xf32> to vector<8x32xf32>
    %c288 = arith.constant 288 : index
    %c0_17 = arith.constant 0 : index
    %61 = vector.load %arg2[%c288, %c0_17] : memref<816x128xbf16, #tpu.memory_space<vmem>>, vector<2x64xbf16>
    %62 = vector.extract_strided_slice %4 {offsets = [0, 0], sizes = [8, 1], strides = [1, 1]} : vector<8x2xf32> to vector<8x1xf32>
    %63 = vector.extract_strided_slice %61 {offsets = [0, 0], sizes = [1, 64], strides = [1, 1]} : vector<2x64xbf16> to vector<1x64xbf16>
    %64 = arith.extf %63 : vector<1x64xbf16> to vector<1x64xf32>
    %65 = vector.broadcast %62 : vector<8x1xf32> to vector<8x64xf32>
    %66 = vector.broadcast %64 : vector<1x64xf32> to vector<8x64xf32>
    %67 = arith.mulf %65, %66 : vector<8x64xf32>
    %68 = vector.extract_strided_slice %4 {offsets = [0, 1], sizes = [8, 1], strides = [1, 1]} : vector<8x2xf32> to vector<8x1xf32>
    %69 = vector.extract_strided_slice %61 {offsets = [1, 0], sizes = [1, 64], strides = [1, 1]} : vector<2x64xbf16> to vector<1x64xbf16>
    %70 = arith.extf %69 : vector<1x64xbf16> to vector<1x64xf32>
    %71 = vector.broadcast %68 : vector<8x1xf32> to vector<8x64xf32>
    %72 = vector.broadcast %70 : vector<1x64xf32> to vector<8x64xf32>
    %73 = arith.mulf %71, %72 : vector<8x64xf32>
    %74 = arith.addf %67, %73 : vector<8x64xf32>
    %c304 = arith.constant 304 : index
    %c0_18 = arith.constant 0 : index
    %75 = vector.load %arg2[%c304, %c0_18] : memref<816x128xbf16, #tpu.memory_space<vmem>>, vector<1x64xbf16>
    %76 = arith.extf %75 : vector<1x64xbf16> to vector<1x64xf32>
    %77 = vector.broadcast %76 : vector<1x64xf32> to vector<8x64xf32>
    %78 = arith.addf %74, %77 : vector<8x64xf32>
    %79 = vector.extract_strided_slice %78 {offsets = [0, 0], sizes = [8, 32], strides = [1, 1]} : vector<8x64xf32> to vector<8x32xf32>
    %80 = vector.extract_strided_slice %78 {offsets = [0, 32], sizes = [8, 32], strides = [1, 1]} : vector<8x64xf32> to vector<8x32xf32>
    %81 = arith.truncf %79 : vector<8x32xf32> to vector<8x32xbf16>
    %82 = arith.truncf %31 : vector<8x32xf32> to vector<8x32xbf16>
    %cst_19 = arith.constant dense<0.000000e+00> : vector<8x8xf32>
    %83 = tpu.matmul %81, %82, %cst_19 {dimension_numbers = #tpu.dot_dimension_numbers<[1], [1], [0], [0], [0, 0, 1, 0], [], []>} : vector<8x32xbf16>, vector<8x32xbf16>, vector<8x8xf32> -> vector<8x8xf32>
    %cst_20 = arith.constant 0.176776692 : f32
    %84 = vector.broadcast %cst_20 : f32 to vector<8x8xf32>
    %85 = arith.mulf %83, %84 : vector<8x8xf32>
    %cst_21 = arith.constant dense<0xFF800000> : vector<8xf32>
    %86 = vector.multi_reduction <maximumf>, %85, %cst_21 [1] : vector<8x8xf32> to vector<8xf32>
    %87 = vector.shape_cast %86 : vector<8xf32> to vector<8x1xf32>
    %88 = vector.broadcast %87 : vector<8x1xf32> to vector<8x8xf32>
    %89 = arith.subf %85, %88 : vector<8x8xf32>
    %90 = math.exp %89 : vector<8x8xf32>
    %cst_22 = arith.constant dense<0.000000e+00> : vector<8xf32>
    %91 = vector.multi_reduction <add>, %90, %cst_22 [1] : vector<8x8xf32> to vector<8xf32>
    %92 = vector.shape_cast %91 : vector<8xf32> to vector<8x1xf32>
    %93 = tpu.reciprocal %92 {approx = true} : vector<8x1xf32> -> vector<8x1xf32>
    %94 = vector.broadcast %93 : vector<8x1xf32> to vector<8x8xf32>
    %95 = arith.mulf %90, %94 : vector<8x8xf32>
    %96 = arith.truncf %95 : vector<8x8xf32> to vector<8x8xbf16>
    %97 = arith.truncf %59 : vector<8x32xf32> to vector<8x32xbf16>
    %cst_23 = arith.constant dense<0.000000e+00> : vector<8x32xf32>
    %98 = tpu.matmul %96, %97, %cst_23 {dimension_numbers = #tpu.dot_dimension_numbers<[1], [0], [0], [1], [0, 0, 1, 1], [], []>} : vector<8x8xbf16>, vector<8x32xbf16>, vector<8x32xf32> -> vector<8x32xf32>
    %cst_24 = arith.constant dense<0.000000e+00> : vector<32xf32>
    %99 = vector.multi_reduction <add>, %60, %cst_24 [0] : vector<8x32xf32> to vector<32xf32>
    %100 = vector.shape_cast %99 : vector<32xf32> to vector<1x32xf32>
    %cst_25 = arith.constant 8.000000e+00 : f32
    %101 = vector.broadcast %cst_25 : f32 to vector<1x32xf32>
    %102 = arith.divf %100, %101 : vector<1x32xf32>
    %c320 = arith.constant 320 : index
    %c0_26 = arith.constant 0 : index
    %103 = vector.load %arg2[%c320, %c0_26] : memref<816x128xbf16, #tpu.memory_space<vmem>>, vector<32x64xbf16>
    %104 = arith.truncf %102 : vector<1x32xf32> to vector<1x32xbf16>
    %cst_27 = arith.constant dense<0.000000e+00> : vector<1x64xf32>
    %105 = tpu.matmul %104, %103, %cst_27 {dimension_numbers = #tpu.dot_dimension_numbers<[1], [0], [0], [1], [0, 0, 1, 1], [], []>} : vector<1x32xbf16>, vector<32x64xbf16>, vector<1x64xf32> -> vector<1x64xf32>
    %c352 = arith.constant 352 : index
    %c0_28 = arith.constant 0 : index
    %106 = vector.load %arg2[%c352, %c0_28] : memref<816x128xbf16, #tpu.memory_space<vmem>>, vector<1x64xbf16>
    %107 = arith.extf %106 : vector<1x64xbf16> to vector<1x64xf32>
    %108 = arith.addf %105, %107 : vector<1x64xf32>
    %109 = vector.extract_strided_slice %108 {offsets = [0, 0], sizes = [1, 32], strides = [1, 1]} : vector<1x64xf32> to vector<1x32xf32>
    %110 = vector.extract_strided_slice %108 {offsets = [0, 32], sizes = [1, 32], strides = [1, 1]} : vector<1x64xf32> to vector<1x32xf32>
    %cst_29 = arith.constant 0.000000e+00 : f32
    %111 = vector.broadcast %cst_29 : f32 to vector<1x32xf32>
    %112 = arith.subf %111, %110 : vector<1x32xf32>
    %113 = math.exp %112 : vector<1x32xf32>
    %cst_30 = arith.constant 1.000000e+00 : f32
    %114 = vector.broadcast %cst_30 : f32 to vector<1x32xf32>
    %115 = arith.addf %114, %113 : vector<1x32xf32>
    %cst_31 = arith.constant 0.899999976 : f32
    %116 = vector.broadcast %cst_31 : f32 to vector<1x32xf32>
    %117 = arith.divf %116, %115 : vector<1x32xf32>
    %cst_32 = arith.constant 1.000000e-01 : f32
    %118 = vector.broadcast %cst_32 : f32 to vector<1x32xf32>
    %119 = arith.addf %118, %117 : vector<1x32xf32>
    %120 = arith.mulf %119, %5 : vector<1x32xf32>
    %121 = arith.addf %109, %120 : vector<1x32xf32>
    %c368 = arith.constant 368 : index
    %c0_33 = arith.constant 0 : index
    %122 = vector.load %arg2[%c368, %c0_33] : memref<816x128xbf16, #tpu.memory_space<vmem>>, vector<32x96xbf16>
    %123 = arith.truncf %98 : vector<8x32xf32> to vector<8x32xbf16>
    %cst_34 = arith.constant dense<0.000000e+00> : vector<8x96xf32>
    %124 = tpu.matmul %123, %122, %cst_34 {dimension_numbers = #tpu.dot_dimension_numbers<[1], [0], [0], [1], [0, 0, 1, 1], [], []>} : vector<8x32xbf16>, vector<32x96xbf16>, vector<8x96xf32> -> vector<8x96xf32>
    %c400 = arith.constant 400 : index
    %c0_35 = arith.constant 0 : index
    %125 = vector.load %arg2[%c400, %c0_35] : memref<816x128xbf16, #tpu.memory_space<vmem>>, vector<32x96xbf16>
    %126 = arith.truncf %121 : vector<1x32xf32> to vector<1x32xbf16>
    %cst_36 = arith.constant dense<0.000000e+00> : vector<1x96xf32>
    %127 = tpu.matmul %126, %125, %cst_36 {dimension_numbers = #tpu.dot_dimension_numbers<[1], [0], [0], [1], [0, 0, 1, 1], [], []>} : vector<1x32xbf16>, vector<32x96xbf16>, vector<1x96xf32> -> vector<1x96xf32>
    %128 = vector.broadcast %127 : vector<1x96xf32> to vector<8x96xf32>
    %129 = arith.addf %124, %128 : vector<8x96xf32>
    %c432 = arith.constant 432 : index
    %c0_37 = arith.constant 0 : index
    %130 = vector.load %arg2[%c432, %c0_37] : memref<816x128xbf16, #tpu.memory_space<vmem>>, vector<32x96xbf16>
    %131 = arith.truncf %80 : vector<8x32xf32> to vector<8x32xbf16>
    %cst_38 = arith.constant dense<0.000000e+00> : vector<8x96xf32>
    %132 = tpu.matmul %131, %130, %cst_38 {dimension_numbers = #tpu.dot_dimension_numbers<[1], [0], [0], [1], [0, 0, 1, 1], [], []>} : vector<8x32xbf16>, vector<32x96xbf16>, vector<8x96xf32> -> vector<8x96xf32>
    %133 = arith.addf %129, %132 : vector<8x96xf32>
    %c464 = arith.constant 464 : index
    %c0_39 = arith.constant 0 : index
    %134 = vector.load %arg2[%c464, %c0_39] : memref<816x128xbf16, #tpu.memory_space<vmem>>, vector<1x96xbf16>
    %135 = arith.extf %134 : vector<1x96xbf16> to vector<1x96xf32>
    %136 = vector.broadcast %135 : vector<1x96xf32> to vector<8x96xf32>
    %137 = arith.addf %133, %136 : vector<8x96xf32>
    %cst_40 = arith.constant 0.000000e+00 : f32
    %138 = vector.broadcast %cst_40 : f32 to vector<8x96xf32>
    %139 = arith.maximumf %137, %138 : vector<8x96xf32>
    %c480 = arith.constant 480 : index
    %c0_41 = arith.constant 0 : index
    %140 = vector.load %arg2[%c480, %c0_41] : memref<816x128xbf16, #tpu.memory_space<vmem>>, vector<96x96xbf16>
    %141 = arith.truncf %139 : vector<8x96xf32> to vector<8x96xbf16>
    %cst_42 = arith.constant dense<0.000000e+00> : vector<8x96xf32>
    %142 = tpu.matmul %141, %140, %cst_42 {dimension_numbers = #tpu.dot_dimension_numbers<[1], [0], [0], [1], [0, 0, 1, 1], [], []>} : vector<8x96xbf16>, vector<96x96xbf16>, vector<8x96xf32> -> vector<8x96xf32>
    %c576 = arith.constant 576 : index
    %c0_43 = arith.constant 0 : index
    %143 = vector.load %arg2[%c576, %c0_43] : memref<816x128xbf16, #tpu.memory_space<vmem>>, vector<1x96xbf16>
    %144 = arith.extf %143 : vector<1x96xbf16> to vector<1x96xf32>
    %145 = vector.broadcast %144 : vector<1x96xf32> to vector<8x96xf32>
    %146 = arith.addf %142, %145 : vector<8x96xf32>
    %cst_44 = arith.constant 0.000000e+00 : f32
    %147 = vector.broadcast %cst_44 : f32 to vector<8x96xf32>
    %148 = arith.maximumf %146, %147 : vector<8x96xf32>
    %c592 = arith.constant 592 : index
    %c0_45 = arith.constant 0 : index
    %149 = vector.load %arg2[%c592, %c0_45] : memref<816x128xbf16, #tpu.memory_space<vmem>>, vector<96x96xbf16>
    %150 = arith.truncf %148 : vector<8x96xf32> to vector<8x96xbf16>
    %cst_46 = arith.constant dense<0.000000e+00> : vector<8x96xf32>
    %151 = tpu.matmul %150, %149, %cst_46 {dimension_numbers = #tpu.dot_dimension_numbers<[1], [0], [0], [1], [0, 0, 1, 1], [], []>} : vector<8x96xbf16>, vector<96x96xbf16>, vector<8x96xf32> -> vector<8x96xf32>
    %c688 = arith.constant 688 : index
    %c0_47 = arith.constant 0 : index
    %152 = vector.load %arg2[%c688, %c0_47] : memref<816x128xbf16, #tpu.memory_space<vmem>>, vector<1x96xbf16>
    %153 = arith.extf %152 : vector<1x96xbf16> to vector<1x96xf32>
    %154 = vector.broadcast %153 : vector<1x96xf32> to vector<8x96xf32>
    %155 = arith.addf %151, %154 : vector<8x96xf32>
    %cst_48 = arith.constant 0.000000e+00 : f32
    %156 = vector.broadcast %cst_48 : f32 to vector<8x96xf32>
    %157 = arith.maximumf %155, %156 : vector<8x96xf32>
    %c704 = arith.constant 704 : index
    %c0_49 = arith.constant 0 : index
    %158 = vector.load %arg2[%c704, %c0_49] : memref<816x128xbf16, #tpu.memory_space<vmem>>, vector<96x2xbf16>
    %159 = arith.truncf %157 : vector<8x96xf32> to vector<8x96xbf16>
    %cst_50 = arith.constant dense<0.000000e+00> : vector<8x2xf32>
    %160 = tpu.matmul %159, %158, %cst_50 {dimension_numbers = #tpu.dot_dimension_numbers<[1], [0], [0], [1], [0, 0, 1, 1], [], []>} : vector<8x96xbf16>, vector<96x2xbf16>, vector<8x2xf32> -> vector<8x2xf32>
    %c800 = arith.constant 800 : index
    %c0_51 = arith.constant 0 : index
    %161 = vector.load %arg2[%c800, %c0_51] : memref<816x128xbf16, #tpu.memory_space<vmem>>, vector<1x2xbf16>
    %162 = arith.extf %161 : vector<1x2xbf16> to vector<1x2xf32>
    %163 = vector.broadcast %162 : vector<1x2xf32> to vector<8x2xf32>
    %164 = arith.addf %160, %163 : vector<8x2xf32>
    %165 = tpu.iota {dimensions = array<i32: 1>} : vector<8x2xi32>
    %c0_i32 = arith.constant 0 : i32
    %166 = vector.broadcast %c0_i32 : i32 to vector<8x2xi32>
    %167 = arith.cmpi eq, %165, %166 : vector<8x2xi32>
    %cst_52 = arith.constant 0.000000e+00 : f32
    %168 = vector.broadcast %cst_52 : f32 to vector<8x2xf32>
    %169 = arith.maximumf %164, %168 : vector<8x2xf32>
    %170 = math.absf %164 : vector<8x2xf32>
    %cst_53 = arith.constant 0.000000e+00 : f32
    %171 = vector.broadcast %cst_53 : f32 to vector<8x2xf32>
    %172 = arith.subf %171, %170 : vector<8x2xf32>
    %173 = math.exp %172 : vector<8x2xf32>
    %cst_54 = arith.constant 1.000000e+00 : f32
    %174 = vector.broadcast %cst_54 : f32 to vector<8x2xf32>
    %175 = arith.addf %174, %173 : vector<8x2xf32>
    %176 = math.log %175 : vector<8x2xf32>
    %177 = arith.addf %169, %176 : vector<8x2xf32>
    %cst_55 = arith.constant 0.899999976 : f32
    %178 = vector.broadcast %cst_55 : f32 to vector<8x2xf32>
    %179 = arith.mulf %178, %177 : vector<8x2xf32>
    %cst_56 = arith.constant 1.000000e-01 : f32
    %180 = vector.broadcast %cst_56 : f32 to vector<8x2xf32>
    %181 = arith.addf %180, %179 : vector<8x2xf32>
    %182 = arith.select %167, %164, %181 : vector<8x2xi1>, vector<8x2xf32>
    %c0_57 = arith.constant 0 : index
    %c0_58 = arith.constant 0 : index
    %c0_59 = arith.constant 0 : index
    %183 = vector.load %arg3[%c0_57, %c0_58, %c0_59] : memref<2x8x2xf32, #tpu.memory_space<vmem>>, vector<1x8x2xf32>
    %184 = vector.shape_cast %183 : vector<1x8x2xf32> to vector<8x2xf32>
    %185 = vector.shape_cast %182 : vector<8x2xf32> to vector<1x8x2xf32>
    tpu.vector_store %arg3[%c0_57, %c0_58, %c0_59], %185 {strides = array<i32>} : memref<2x8x2xf32, #tpu.memory_space<vmem>>, vector<1x8x2xf32>,
    %c1 = arith.constant 1 : index
    %c0_60 = arith.constant 0 : index
    %c0_61 = arith.constant 0 : index
    %186 = vector.load %arg1[%c1, %c0_60, %c0_61] : memref<2x24x128xf32, #tpu.memory_space<vmem>>, vector<1x24x128xf32>
    %187 = vector.shape_cast %186 : vector<1x24x128xf32> to vector<24x128xf32>
    %188 = vector.extract_strided_slice %187 {offsets = [0, 0], sizes = [8, 2], strides = [1, 1]} : vector<24x128xf32> to vector<8x2xf32>
    %189 = vector.extract_strided_slice %187 {offsets = [0, 2], sizes = [8, 1], strides = [1, 1]} : vector<24x128xf32> to vector<8x1xf32>
    %190 = vector.extract_strided_slice %187 {offsets = [8, 0], sizes = [8, 2], strides = [1, 1]} : vector<24x128xf32> to vector<8x2xf32>
    %191 = vector.extract_strided_slice %187 {offsets = [16, 0], sizes = [1, 32], strides = [1, 1]} : vector<24x128xf32> to vector<1x32xf32>
    %c0_62 = arith.constant 0 : index
    %c0_63 = arith.constant 0 : index
    %192 = vector.load %arg2[%c0_62, %c0_63] : memref<816x128xbf16, #tpu.memory_space<vmem>>, vector<2x96xbf16>
    %193 = vector.extract_strided_slice %188 {offsets = [0, 0], sizes = [8, 1], strides = [1, 1]} : vector<8x2xf32> to vector<8x1xf32>
    %194 = vector.extract_strided_slice %192 {offsets = [0, 0], sizes = [1, 96], strides = [1, 1]} : vector<2x96xbf16> to vector<1x96xbf16>
    %195 = arith.extf %194 : vector<1x96xbf16> to vector<1x96xf32>
    %196 = vector.broadcast %193 : vector<8x1xf32> to vector<8x96xf32>
    %197 = vector.broadcast %195 : vector<1x96xf32> to vector<8x96xf32>
    %198 = arith.mulf %196, %197 : vector<8x96xf32>
    %199 = vector.extract_strided_slice %188 {offsets = [0, 1], sizes = [8, 1], strides = [1, 1]} : vector<8x2xf32> to vector<8x1xf32>
    %200 = vector.extract_strided_slice %192 {offsets = [1, 0], sizes = [1, 96], strides = [1, 1]} : vector<2x96xbf16> to vector<1x96xbf16>
    %201 = arith.extf %200 : vector<1x96xbf16> to vector<1x96xf32>
    %202 = vector.broadcast %199 : vector<8x1xf32> to vector<8x96xf32>
    %203 = vector.broadcast %201 : vector<1x96xf32> to vector<8x96xf32>
    %204 = arith.mulf %202, %203 : vector<8x96xf32>
    %205 = arith.addf %198, %204 : vector<8x96xf32>
    %c32_64 = arith.constant 32 : index
    %c0_65 = arith.constant 0 : index
    %206 = vector.load %arg2[%c32_64, %c0_65] : memref<816x128xbf16, #tpu.memory_space<vmem>>, vector<1x96xbf16>
    %207 = arith.extf %206 : vector<1x96xbf16> to vector<1x96xf32>
    %208 = vector.broadcast %207 : vector<1x96xf32> to vector<8x96xf32>
    %209 = arith.addf %205, %208 : vector<8x96xf32>
    %210 = vector.extract_strided_slice %209 {offsets = [0, 0], sizes = [8, 64], strides = [1, 1]} : vector<8x96xf32> to vector<8x64xf32>
    %c16_66 = arith.constant 16 : index
    %c0_67 = arith.constant 0 : index
    %211 = vector.load %arg2[%c16_66, %c0_67] : memref<816x128xbf16, #tpu.memory_space<vmem>>, vector<1x64xbf16>
    %212 = arith.extf %211 : vector<1x64xbf16> to vector<1x64xf32>
    %213 = vector.broadcast %189 : vector<8x1xf32> to vector<8x64xf32>
    %214 = vector.broadcast %212 : vector<1x64xf32> to vector<8x64xf32>
    %215 = arith.mulf %213, %214 : vector<8x64xf32>
    %216 = arith.addf %210, %215 : vector<8x64xf32>
    %217 = vector.extract_strided_slice %209 {offsets = [0, 64], sizes = [8, 32], strides = [1, 1]} : vector<8x96xf32> to vector<8x32xf32>
    %c48_68 = arith.constant 48 : index
    %c0_69 = arith.constant 0 : index
    %218 = vector.load %arg2[%c48_68, %c0_69] : memref<816x128xbf16, #tpu.memory_space<vmem>>, vector<64x64xbf16>
    %219 = arith.truncf %216 : vector<8x64xf32> to vector<8x64xbf16>
    %cst_70 = arith.constant dense<0.000000e+00> : vector<8x64xf32>
    %220 = tpu.matmul %219, %218, %cst_70 {dimension_numbers = #tpu.dot_dimension_numbers<[1], [0], [0], [1], [0, 0, 1, 1], [], []>} : vector<8x64xbf16>, vector<64x64xbf16>, vector<8x64xf32> -> vector<8x64xf32>
    %c112_71 = arith.constant 112 : index
    %c0_72 = arith.constant 0 : index
    %221 = vector.load %arg2[%c112_71, %c0_72] : memref<816x128xbf16, #tpu.memory_space<vmem>>, vector<1x64xbf16>
    %222 = arith.extf %221 : vector<1x64xbf16> to vector<1x64xf32>
    %223 = vector.broadcast %222 : vector<1x64xf32> to vector<8x64xf32>
    %224 = arith.addf %220, %223 : vector<8x64xf32>
    %cst_73 = arith.constant 0.000000e+00 : f32
    %225 = vector.broadcast %cst_73 : f32 to vector<8x64xf32>
    %226 = arith.maximumf %224, %225 : vector<8x64xf32>
    %c128_74 = arith.constant 128 : index
    %c0_75 = arith.constant 0 : index
    %227 = vector.load %arg2[%c128_74, %c0_75] : memref<816x128xbf16, #tpu.memory_space<vmem>>, vector<64x64xbf16>
    %228 = arith.truncf %226 : vector<8x64xf32> to vector<8x64xbf16>
    %cst_76 = arith.constant dense<0.000000e+00> : vector<8x64xf32>
    %229 = tpu.matmul %228, %227, %cst_76 {dimension_numbers = #tpu.dot_dimension_numbers<[1], [0], [0], [1], [0, 0, 1, 1], [], []>} : vector<8x64xbf16>, vector<64x64xbf16>, vector<8x64xf32> -> vector<8x64xf32>
    %c192_77 = arith.constant 192 : index
    %c0_78 = arith.constant 0 : index
    %230 = vector.load %arg2[%c192_77, %c0_78] : memref<816x128xbf16, #tpu.memory_space<vmem>>, vector<1x64xbf16>
    %231 = arith.extf %230 : vector<1x64xbf16> to vector<1x64xf32>
    %232 = vector.broadcast %231 : vector<1x64xf32> to vector<8x64xf32>
    %233 = arith.addf %229, %232 : vector<8x64xf32>
    %cst_79 = arith.constant 0.000000e+00 : f32
    %234 = vector.broadcast %cst_79 : f32 to vector<8x64xf32>
    %235 = arith.maximumf %233, %234 : vector<8x64xf32>
    %c208_80 = arith.constant 208 : index
    %c0_81 = arith.constant 0 : index
    %236 = vector.load %arg2[%c208_80, %c0_81] : memref<816x128xbf16, #tpu.memory_space<vmem>>, vector<64x64xbf16>
    %237 = arith.truncf %235 : vector<8x64xf32> to vector<8x64xbf16>
    %cst_82 = arith.constant dense<0.000000e+00> : vector<8x64xf32>
    %238 = tpu.matmul %237, %236, %cst_82 {dimension_numbers = #tpu.dot_dimension_numbers<[1], [0], [0], [1], [0, 0, 1, 1], [], []>} : vector<8x64xbf16>, vector<64x64xbf16>, vector<8x64xf32> -> vector<8x64xf32>
    %c272_83 = arith.constant 272 : index
    %c0_84 = arith.constant 0 : index
    %239 = vector.load %arg2[%c272_83, %c0_84] : memref<816x128xbf16, #tpu.memory_space<vmem>>, vector<1x64xbf16>
    %240 = arith.extf %239 : vector<1x64xbf16> to vector<1x64xf32>
    %241 = vector.broadcast %240 : vector<1x64xf32> to vector<8x64xf32>
    %242 = arith.addf %238, %241 : vector<8x64xf32>
    %cst_85 = arith.constant 0.000000e+00 : f32
    %243 = vector.broadcast %cst_85 : f32 to vector<8x64xf32>
    %244 = arith.maximumf %242, %243 : vector<8x64xf32>
    %245 = vector.extract_strided_slice %244 {offsets = [0, 0], sizes = [8, 32], strides = [1, 1]} : vector<8x64xf32> to vector<8x32xf32>
    %246 = vector.extract_strided_slice %244 {offsets = [0, 32], sizes = [8, 32], strides = [1, 1]} : vector<8x64xf32> to vector<8x32xf32>
    %c288_86 = arith.constant 288 : index
    %c0_87 = arith.constant 0 : index
    %247 = vector.load %arg2[%c288_86, %c0_87] : memref<816x128xbf16, #tpu.memory_space<vmem>>, vector<2x64xbf16>
    %248 = vector.extract_strided_slice %190 {offsets = [0, 0], sizes = [8, 1], strides = [1, 1]} : vector<8x2xf32> to vector<8x1xf32>
    %249 = vector.extract_strided_slice %247 {offsets = [0, 0], sizes = [1, 64], strides = [1, 1]} : vector<2x64xbf16> to vector<1x64xbf16>
    %250 = arith.extf %249 : vector<1x64xbf16> to vector<1x64xf32>
    %251 = vector.broadcast %248 : vector<8x1xf32> to vector<8x64xf32>
    %252 = vector.broadcast %250 : vector<1x64xf32> to vector<8x64xf32>
    %253 = arith.mulf %251, %252 : vector<8x64xf32>
    %254 = vector.extract_strided_slice %190 {offsets = [0, 1], sizes = [8, 1], strides = [1, 1]} : vector<8x2xf32> to vector<8x1xf32>
    %255 = vector.extract_strided_slice %247 {offsets = [1, 0], sizes = [1, 64], strides = [1, 1]} : vector<2x64xbf16> to vector<1x64xbf16>
    %256 = arith.extf %255 : vector<1x64xbf16> to vector<1x64xf32>
    %257 = vector.broadcast %254 : vector<8x1xf32> to vector<8x64xf32>
    %258 = vector.broadcast %256 : vector<1x64xf32> to vector<8x64xf32>
    %259 = arith.mulf %257, %258 : vector<8x64xf32>
    %260 = arith.addf %253, %259 : vector<8x64xf32>
    %c304_88 = arith.constant 304 : index
    %c0_89 = arith.constant 0 : index
    %261 = vector.load %arg2[%c304_88, %c0_89] : memref<816x128xbf16, #tpu.memory_space<vmem>>, vector<1x64xbf16>
    %262 = arith.extf %261 : vector<1x64xbf16> to vector<1x64xf32>
    %263 = vector.broadcast %262 : vector<1x64xf32> to vector<8x64xf32>
    %264 = arith.addf %260, %263 : vector<8x64xf32>
    %265 = vector.extract_strided_slice %264 {offsets = [0, 0], sizes = [8, 32], strides = [1, 1]} : vector<8x64xf32> to vector<8x32xf32>
    %266 = vector.extract_strided_slice %264 {offsets = [0, 32], sizes = [8, 32], strides = [1, 1]} : vector<8x64xf32> to vector<8x32xf32>
    %267 = arith.truncf %265 : vector<8x32xf32> to vector<8x32xbf16>
    %268 = arith.truncf %217 : vector<8x32xf32> to vector<8x32xbf16>
    %cst_90 = arith.constant dense<0.000000e+00> : vector<8x8xf32>
    %269 = tpu.matmul %267, %268, %cst_90 {dimension_numbers = #tpu.dot_dimension_numbers<[1], [1], [0], [0], [0, 0, 1, 0], [], []>} : vector<8x32xbf16>, vector<8x32xbf16>, vector<8x8xf32> -> vector<8x8xf32>
    %cst_91 = arith.constant 0.176776692 : f32
    %270 = vector.broadcast %cst_91 : f32 to vector<8x8xf32>
    %271 = arith.mulf %269, %270 : vector<8x8xf32>
    %cst_92 = arith.constant dense<0xFF800000> : vector<8xf32>
    %272 = vector.multi_reduction <maximumf>, %271, %cst_92 [1] : vector<8x8xf32> to vector<8xf32>
    %273 = vector.shape_cast %272 : vector<8xf32> to vector<8x1xf32>
    %274 = vector.broadcast %273 : vector<8x1xf32> to vector<8x8xf32>
    %275 = arith.subf %271, %274 : vector<8x8xf32>
    %276 = math.exp %275 : vector<8x8xf32>
    %cst_93 = arith.constant dense<0.000000e+00> : vector<8xf32>
    %277 = vector.multi_reduction <add>, %276, %cst_93 [1] : vector<8x8xf32> to vector<8xf32>
    %278 = vector.shape_cast %277 : vector<8xf32> to vector<8x1xf32>
    %279 = tpu.reciprocal %278 {approx = true} : vector<8x1xf32> -> vector<8x1xf32>
    %280 = vector.broadcast %279 : vector<8x1xf32> to vector<8x8xf32>
    %281 = arith.mulf %276, %280 : vector<8x8xf32>
    %282 = arith.truncf %281 : vector<8x8xf32> to vector<8x8xbf16>
    %283 = arith.truncf %245 : vector<8x32xf32> to vector<8x32xbf16>
    %cst_94 = arith.constant dense<0.000000e+00> : vector<8x32xf32>
    %284 = tpu.matmul %282, %283, %cst_94 {dimension_numbers = #tpu.dot_dimension_numbers<[1], [0], [0], [1], [0, 0, 1, 1], [], []>} : vector<8x8xbf16>, vector<8x32xbf16>, vector<8x32xf32> -> vector<8x32xf32>
    %cst_95 = arith.constant dense<0.000000e+00> : vector<32xf32>
    %285 = vector.multi_reduction <add>, %246, %cst_95 [0] : vector<8x32xf32> to vector<32xf32>
    %286 = vector.shape_cast %285 : vector<32xf32> to vector<1x32xf32>
    %cst_96 = arith.constant 8.000000e+00 : f32
    %287 = vector.broadcast %cst_96 : f32 to vector<1x32xf32>
    %288 = arith.divf %286, %287 : vector<1x32xf32>
    %c320_97 = arith.constant 320 : index
    %c0_98 = arith.constant 0 : index
    %289 = vector.load %arg2[%c320_97, %c0_98] : memref<816x128xbf16, #tpu.memory_space<vmem>>, vector<32x64xbf16>
    %290 = arith.truncf %288 : vector<1x32xf32> to vector<1x32xbf16>
    %cst_99 = arith.constant dense<0.000000e+00> : vector<1x64xf32>
    %291 = tpu.matmul %290, %289, %cst_99 {dimension_numbers = #tpu.dot_dimension_numbers<[1], [0], [0], [1], [0, 0, 1, 1], [], []>} : vector<1x32xbf16>, vector<32x64xbf16>, vector<1x64xf32> -> vector<1x64xf32>
    %c352_100 = arith.constant 352 : index
    %c0_101 = arith.constant 0 : index
    %292 = vector.load %arg2[%c352_100, %c0_101] : memref<816x128xbf16, #tpu.memory_space<vmem>>, vector<1x64xbf16>
    %293 = arith.extf %292 : vector<1x64xbf16> to vector<1x64xf32>
    %294 = arith.addf %291, %293 : vector<1x64xf32>
    %295 = vector.extract_strided_slice %294 {offsets = [0, 0], sizes = [1, 32], strides = [1, 1]} : vector<1x64xf32> to vector<1x32xf32>
    %296 = vector.extract_strided_slice %294 {offsets = [0, 32], sizes = [1, 32], strides = [1, 1]} : vector<1x64xf32> to vector<1x32xf32>
    %cst_102 = arith.constant 0.000000e+00 : f32
    %297 = vector.broadcast %cst_102 : f32 to vector<1x32xf32>
    %298 = arith.subf %297, %296 : vector<1x32xf32>
    %299 = math.exp %298 : vector<1x32xf32>
    %cst_103 = arith.constant 1.000000e+00 : f32
    %300 = vector.broadcast %cst_103 : f32 to vector<1x32xf32>
    %301 = arith.addf %300, %299 : vector<1x32xf32>
    %cst_104 = arith.constant 0.899999976 : f32
    %302 = vector.broadcast %cst_104 : f32 to vector<1x32xf32>
    %303 = arith.divf %302, %301 : vector<1x32xf32>
    %cst_105 = arith.constant 1.000000e-01 : f32
    %304 = vector.broadcast %cst_105 : f32 to vector<1x32xf32>
    %305 = arith.addf %304, %303 : vector<1x32xf32>
    %306 = arith.mulf %305, %191 : vector<1x32xf32>
    %307 = arith.addf %295, %306 : vector<1x32xf32>
    %c368_106 = arith.constant 368 : index
    %c0_107 = arith.constant 0 : index
    %308 = vector.load %arg2[%c368_106, %c0_107] : memref<816x128xbf16, #tpu.memory_space<vmem>>, vector<32x96xbf16>
    %309 = arith.truncf %284 : vector<8x32xf32> to vector<8x32xbf16>
    %cst_108 = arith.constant dense<0.000000e+00> : vector<8x96xf32>
    %310 = tpu.matmul %309, %308, %cst_108 {dimension_numbers = #tpu.dot_dimension_numbers<[1], [0], [0], [1], [0, 0, 1, 1], [], []>} : vector<8x32xbf16>, vector<32x96xbf16>, vector<8x96xf32> -> vector<8x96xf32>
    %c400_109 = arith.constant 400 : index
    %c0_110 = arith.constant 0 : index
    %311 = vector.load %arg2[%c400_109, %c0_110] : memref<816x128xbf16, #tpu.memory_space<vmem>>, vector<32x96xbf16>
    %312 = arith.truncf %307 : vector<1x32xf32> to vector<1x32xbf16>
    %cst_111 = arith.constant dense<0.000000e+00> : vector<1x96xf32>
    %313 = tpu.matmul %312, %311, %cst_111 {dimension_numbers = #tpu.dot_dimension_numbers<[1], [0], [0], [1], [0, 0, 1, 1], [], []>} : vector<1x32xbf16>, vector<32x96xbf16>, vector<1x96xf32> -> vector<1x96xf32>
    %314 = vector.broadcast %313 : vector<1x96xf32> to vector<8x96xf32>
    %315 = arith.addf %310, %314 : vector<8x96xf32>
    %c432_112 = arith.constant 432 : index
    %c0_113 = arith.constant 0 : index
    %316 = vector.load %arg2[%c432_112, %c0_113] : memref<816x128xbf16, #tpu.memory_space<vmem>>, vector<32x96xbf16>
    %317 = arith.truncf %266 : vector<8x32xf32> to vector<8x32xbf16>
    %cst_114 = arith.constant dense<0.000000e+00> : vector<8x96xf32>
    %318 = tpu.matmul %317, %316, %cst_114 {dimension_numbers = #tpu.dot_dimension_numbers<[1], [0], [0], [1], [0, 0, 1, 1], [], []>} : vector<8x32xbf16>, vector<32x96xbf16>, vector<8x96xf32> -> vector<8x96xf32>
    %319 = arith.addf %315, %318 : vector<8x96xf32>
    %c464_115 = arith.constant 464 : index
    %c0_116 = arith.constant 0 : index
    %320 = vector.load %arg2[%c464_115, %c0_116] : memref<816x128xbf16, #tpu.memory_space<vmem>>, vector<1x96xbf16>
    %321 = arith.extf %320 : vector<1x96xbf16> to vector<1x96xf32>
    %322 = vector.broadcast %321 : vector<1x96xf32> to vector<8x96xf32>
    %323 = arith.addf %319, %322 : vector<8x96xf32>
    %cst_117 = arith.constant 0.000000e+00 : f32
    %324 = vector.broadcast %cst_117 : f32 to vector<8x96xf32>
    %325 = arith.maximumf %323, %324 : vector<8x96xf32>
    %c480_118 = arith.constant 480 : index
    %c0_119 = arith.constant 0 : index
    %326 = vector.load %arg2[%c480_118, %c0_119] : memref<816x128xbf16, #tpu.memory_space<vmem>>, vector<96x96xbf16>
    %327 = arith.truncf %325 : vector<8x96xf32> to vector<8x96xbf16>
    %cst_120 = arith.constant dense<0.000000e+00> : vector<8x96xf32>
    %328 = tpu.matmul %327, %326, %cst_120 {dimension_numbers = #tpu.dot_dimension_numbers<[1], [0], [0], [1], [0, 0, 1, 1], [], []>} : vector<8x96xbf16>, vector<96x96xbf16>, vector<8x96xf32> -> vector<8x96xf32>
    %c576_121 = arith.constant 576 : index
    %c0_122 = arith.constant 0 : index
    %329 = vector.load %arg2[%c576_121, %c0_122] : memref<816x128xbf16, #tpu.memory_space<vmem>>, vector<1x96xbf16>
    %330 = arith.extf %329 : vector<1x96xbf16> to vector<1x96xf32>
    %331 = vector.broadcast %330 : vector<1x96xf32> to vector<8x96xf32>
    %332 = arith.addf %328, %331 : vector<8x96xf32>
    %cst_123 = arith.constant 0.000000e+00 : f32
    %333 = vector.broadcast %cst_123 : f32 to vector<8x96xf32>
    %334 = arith.maximumf %332, %333 : vector<8x96xf32>
    %c592_124 = arith.constant 592 : index
    %c0_125 = arith.constant 0 : index
    %335 = vector.load %arg2[%c592_124, %c0_125] : memref<816x128xbf16, #tpu.memory_space<vmem>>, vector<96x96xbf16>
    %336 = arith.truncf %334 : vector<8x96xf32> to vector<8x96xbf16>
    %cst_126 = arith.constant dense<0.000000e+00> : vector<8x96xf32>
    %337 = tpu.matmul %336, %335, %cst_126 {dimension_numbers = #tpu.dot_dimension_numbers<[1], [0], [0], [1], [0, 0, 1, 1], [], []>} : vector<8x96xbf16>, vector<96x96xbf16>, vector<8x96xf32> -> vector<8x96xf32>
    %c688_127 = arith.constant 688 : index
    %c0_128 = arith.constant 0 : index
    %338 = vector.load %arg2[%c688_127, %c0_128] : memref<816x128xbf16, #tpu.memory_space<vmem>>, vector<1x96xbf16>
    %339 = arith.extf %338 : vector<1x96xbf16> to vector<1x96xf32>
    %340 = vector.broadcast %339 : vector<1x96xf32> to vector<8x96xf32>
    %341 = arith.addf %337, %340 : vector<8x96xf32>
    %cst_129 = arith.constant 0.000000e+00 : f32
    %342 = vector.broadcast %cst_129 : f32 to vector<8x96xf32>
    %343 = arith.maximumf %341, %342 : vector<8x96xf32>
    %c704_130 = arith.constant 704 : index
    %c0_131 = arith.constant 0 : index
    %344 = vector.load %arg2[%c704_130, %c0_131] : memref<816x128xbf16, #tpu.memory_space<vmem>>, vector<96x2xbf16>
    %345 = arith.truncf %343 : vector<8x96xf32> to vector<8x96xbf16>
    %cst_132 = arith.constant dense<0.000000e+00> : vector<8x2xf32>
    %346 = tpu.matmul %345, %344, %cst_132 {dimension_numbers = #tpu.dot_dimension_numbers<[1], [0], [0], [1], [0, 0, 1, 1], [], []>} : vector<8x96xbf16>, vector<96x2xbf16>, vector<8x2xf32> -> vector<8x2xf32>
    %c800_133 = arith.constant 800 : index
    %c0_134 = arith.constant 0 : index
    %347 = vector.load %arg2[%c800_133, %c0_134] : memref<816x128xbf16, #tpu.memory_space<vmem>>, vector<1x2xbf16>
    %348 = arith.extf %347 : vector<1x2xbf16> to vector<1x2xf32>
    %349 = vector.broadcast %348 : vector<1x2xf32> to vector<8x2xf32>
    %350 = arith.addf %346, %349 : vector<8x2xf32>
    %351 = tpu.iota {dimensions = array<i32: 1>} : vector<8x2xi32>
    %c0_i32_135 = arith.constant 0 : i32
    %352 = vector.broadcast %c0_i32_135 : i32 to vector<8x2xi32>
    %353 = arith.cmpi eq, %351, %352 : vector<8x2xi32>
    %cst_136 = arith.constant 0.000000e+00 : f32
    %354 = vector.broadcast %cst_136 : f32 to vector<8x2xf32>
    %355 = arith.maximumf %350, %354 : vector<8x2xf32>
    %356 = math.absf %350 : vector<8x2xf32>
    %cst_137 = arith.constant 0.000000e+00 : f32
    %357 = vector.broadcast %cst_137 : f32 to vector<8x2xf32>
    %358 = arith.subf %357, %356 : vector<8x2xf32>
    %359 = math.exp %358 : vector<8x2xf32>
    %cst_138 = arith.constant 1.000000e+00 : f32
    %360 = vector.broadcast %cst_138 : f32 to vector<8x2xf32>
    %361 = arith.addf %360, %359 : vector<8x2xf32>
    %362 = math.log %361 : vector<8x2xf32>
    %363 = arith.addf %355, %362 : vector<8x2xf32>
    %cst_139 = arith.constant 0.899999976 : f32
    %364 = vector.broadcast %cst_139 : f32 to vector<8x2xf32>
    %365 = arith.mulf %364, %363 : vector<8x2xf32>
    %cst_140 = arith.constant 1.000000e-01 : f32
    %366 = vector.broadcast %cst_140 : f32 to vector<8x2xf32>
    %367 = arith.addf %366, %365 : vector<8x2xf32>
    %368 = arith.select %353, %350, %367 : vector<8x2xi1>, vector<8x2xf32>
    %c1_141 = arith.constant 1 : index
    %c0_142 = arith.constant 0 : index
    %c0_143 = arith.constant 0 : index
    %369 = vector.load %arg3[%c1_141, %c0_142, %c0_143] : memref<2x8x2xf32, #tpu.memory_space<vmem>>, vector<1x8x2xf32>
    %370 = vector.shape_cast %369 : vector<1x8x2xf32> to vector<8x2xf32>
    %371 = vector.shape_cast %368 : vector<8x2xf32> to vector<1x8x2xf32>
    tpu.vector_store %arg3[%c1_141, %c0_142, %c0_143], %371 {strides = array<i32>} : memref<2x8x2xf32, #tpu.memory_space<vmem>>, vector<1x8x2xf32>,
    return
  }
  func.func @transform_0(%arg0: i32) -> (i32, i32, i32) {
    %c0_i32 = arith.constant 0 : i32
    %c0_i32_0 = arith.constant 0 : i32
    %c0_i32_1 = arith.constant 0 : i32
    return %arg0, %c0_i32, %c0_i32_0 : i32, i32, i32
  }
  func.func @transform_1(%arg0: i32) -> (i32, i32) {
    %c0_i32 = arith.constant 0 : i32
    %c0_i32_0 = arith.constant 0 : i32
    %c0_i32_1 = arith.constant 0 : i32
    return %c0_i32, %c0_i32_0 : i32, i32
  }
  func.func @transform_2(%arg0: i32) -> (i32, i32, i32) {
    %c0_i32 = arith.constant 0 : i32
    %c0_i32_0 = arith.constant 0 : i32
    %c0_i32_1 = arith.constant 0 : i32
    return %arg0, %c0_i32, %c0_i32_0 : i32, i32, i32
  }
}

module attributes {stable_mosaic.version = 11 : i64} {
  func.func @latent_model_kernel(%arg0: i32, %arg1: memref<2x24x128xf32, #tpu.memory_space<vmem>>, %arg2: memref<816x128xbf16, #tpu.memory_space<vmem>>, %arg3: memref<2x8x2xf32, #tpu.memory_space<vmem>>) attributes {dimension_semantics = [#tpu.dimension_semantics<parallel>], iteration_bounds = array<i64: 1>, scalar_prefetch = 0 : i64, scratch_operands = 0 : i64, tpu.core_type = #tpu.core_type<tc>, window_params = [{transform_indices = @transform_0, window_bounds = array<i64: 2, 24, 128>}, {pipeline_mode = #tpu.pipeline_mode<synchronous>, transform_indices = @transform_1, window_bounds = array<i64: 816, 128>}, {transform_indices = @transform_2, window_bounds = array<i64: 2, 8, 2>}]} {
    %c0 = arith.constant 0 : index
    %c0_0 = arith.constant 0 : index
    %c0_1 = arith.constant 0 : index
    %0 = vector.load %arg1[%c0, %c0_0, %c0_1] : memref<2x24x128xf32, #tpu.memory_space<vmem>>, vector<1x24x128xf32>
    %1 = vector.shape_cast %0 : vector<1x24x128xf32> to vector<24x128xf32>
    %2 = vector.extract_strided_slice %1 {offsets = [0, 0], sizes = [8, 2], strides = [1, 1]} : vector<24x128xf32> to vector<8x2xf32>
    %3 = vector.extract_strided_slice %1 {offsets = [0, 2], sizes = [8, 1], strides = [1, 1]} : vector<24x128xf32> to vector<8x1xf32>
    %4 = vector.extract_strided_slice %1 {offsets = [8, 0], sizes = [8, 2], strides = [1, 1]} : vector<24x128xf32> to vector<8x2xf32>
    %5 = vector.extract_strided_slice %1 {offsets = [16, 0], sizes = [1, 32], strides = [1, 1]} : vector<24x128xf32> to vector<1x32xf32>
    %c0_2 = arith.constant 0 : index
    %c0_3 = arith.constant 0 : index
    %6 = vector.load %arg2[%c0_2, %c0_3] : memref<816x128xbf16, #tpu.memory_space<vmem>>, vector<2x96xbf16>
    %7 = vector.extract_strided_slice %2 {offsets = [0, 0], sizes = [8, 1], strides = [1, 1]} : vector<8x2xf32> to vector<8x1xf32>
    %8 = vector.extract_strided_slice %6 {offsets = [0, 0], sizes = [1, 96], strides = [1, 1]} : vector<2x96xbf16> to vector<1x96xbf16>
    %9 = arith.extf %8 : vector<1x96xbf16> to vector<1x96xf32>
    %10 = vector.broadcast %7 : vector<8x1xf32> to vector<8x96xf32>
    %11 = vector.broadcast %9 : vector<1x96xf32> to vector<8x96xf32>
    %12 = arith.mulf %10, %11 : vector<8x96xf32>
    %13 = vector.extract_strided_slice %2 {offsets = [0, 1], sizes = [8, 1], strides = [1, 1]} : vector<8x2xf32> to vector<8x1xf32>
    %14 = vector.extract_strided_slice %6 {offsets = [1, 0], sizes = [1, 96], strides = [1, 1]} : vector<2x96xbf16> to vector<1x96xbf16>
    %15 = arith.extf %14 : vector<1x96xbf16> to vector<1x96xf32>
    %16 = vector.broadcast %13 : vector<8x1xf32> to vector<8x96xf32>
    %17 = vector.broadcast %15 : vector<1x96xf32> to vector<8x96xf32>
    %18 = arith.mulf %16, %17 : vector<8x96xf32>
    %19 = arith.addf %12, %18 : vector<8x96xf32>
    %c32 = arith.constant 32 : index
    %c0_4 = arith.constant 0 : index
    %20 = vector.load %arg2[%c32, %c0_4] : memref<816x128xbf16, #tpu.memory_space<vmem>>, vector<1x96xbf16>
    %21 = arith.extf %20 : vector<1x96xbf16> to vector<1x96xf32>
    %22 = vector.broadcast %21 : vector<1x96xf32> to vector<8x96xf32>
    %23 = arith.addf %19, %22 : vector<8x96xf32>
    %24 = vector.extract_strided_slice %23 {offsets = [0, 0], sizes = [8, 64], strides = [1, 1]} : vector<8x96xf32> to vector<8x64xf32>
    %c16 = arith.constant 16 : index
    %c0_5 = arith.constant 0 : index
    %25 = vector.load %arg2[%c16, %c0_5] : memref<816x128xbf16, #tpu.memory_space<vmem>>, vector<1x64xbf16>
    %26 = arith.extf %25 : vector<1x64xbf16> to vector<1x64xf32>
    %27 = vector.broadcast %3 : vector<8x1xf32> to vector<8x64xf32>
    %28 = vector.broadcast %26 : vector<1x64xf32> to vector<8x64xf32>
    %29 = arith.mulf %27, %28 : vector<8x64xf32>
    %30 = arith.addf %24, %29 : vector<8x64xf32>
    %31 = vector.extract_strided_slice %23 {offsets = [0, 64], sizes = [8, 32], strides = [1, 1]} : vector<8x96xf32> to vector<8x32xf32>
    %c48 = arith.constant 48 : index
    %c0_6 = arith.constant 0 : index
    %32 = vector.load %arg2[%c48, %c0_6] : memref<816x128xbf16, #tpu.memory_space<vmem>>, vector<64x64xbf16>
    %33 = arith.truncf %30 : vector<8x64xf32> to vector<8x64xbf16>
    %cst = arith.constant dense<0.000000e+00> : vector<8x64xf32>
    %34 = tpu.matmul %33, %32, %cst {dimension_numbers = #tpu.dot_dimension_numbers<[1], [0], [0], [1], [0, 0, 1, 1], [], []>} : vector<8x64xbf16>, vector<64x64xbf16>, vector<8x64xf32> -> vector<8x64xf32>
    %c112 = arith.constant 112 : index
    %c0_7 = arith.constant 0 : index
    %35 = vector.load %arg2[%c112, %c0_7] : memref<816x128xbf16, #tpu.memory_space<vmem>>, vector<1x64xbf16>
    %36 = arith.extf %35 : vector<1x64xbf16> to vector<1x64xf32>
    %37 = vector.broadcast %36 : vector<1x64xf32> to vector<8x64xf32>
    %38 = arith.addf %34, %37 : vector<8x64xf32>
    %cst_8 = arith.constant 0.000000e+00 : f32
    %39 = vector.broadcast %cst_8 : f32 to vector<8x64xf32>
    %40 = arith.maximumf %38, %39 : vector<8x64xf32>
    %c128 = arith.constant 128 : index
    %c0_9 = arith.constant 0 : index
    %41 = vector.load %arg2[%c128, %c0_9] : memref<816x128xbf16, #tpu.memory_space<vmem>>, vector<64x64xbf16>
    %42 = arith.truncf %40 : vector<8x64xf32> to vector<8x64xbf16>
    %cst_10 = arith.constant dense<0.000000e+00> : vector<8x64xf32>
    %43 = tpu.matmul %42, %41, %cst_10 {dimension_numbers = #tpu.dot_dimension_numbers<[1], [0], [0], [1], [0, 0, 1, 1], [], []>} : vector<8x64xbf16>, vector<64x64xbf16>, vector<8x64xf32> -> vector<8x64xf32>
    %c192 = arith.constant 192 : index
    %c0_11 = arith.constant 0 : index
    %44 = vector.load %arg2[%c192, %c0_11] : memref<816x128xbf16, #tpu.memory_space<vmem>>, vector<1x64xbf16>
    %45 = arith.extf %44 : vector<1x64xbf16> to vector<1x64xf32>
    %46 = vector.broadcast %45 : vector<1x64xf32> to vector<8x64xf32>
    %47 = arith.addf %43, %46 : vector<8x64xf32>
    %cst_12 = arith.constant 0.000000e+00 : f32
    %48 = vector.broadcast %cst_12 : f32 to vector<8x64xf32>
    %49 = arith.maximumf %47, %48 : vector<8x64xf32>
    %c208 = arith.constant 208 : index
    %c0_13 = arith.constant 0 : index
    %50 = vector.load %arg2[%c208, %c0_13] : memref<816x128xbf16, #tpu.memory_space<vmem>>, vector<64x64xbf16>
    %51 = arith.truncf %49 : vector<8x64xf32> to vector<8x64xbf16>
    %cst_14 = arith.constant dense<0.000000e+00> : vector<8x64xf32>
    %52 = tpu.matmul %51, %50, %cst_14 {dimension_numbers = #tpu.dot_dimension_numbers<[1], [0], [0], [1], [0, 0, 1, 1], [], []>} : vector<8x64xbf16>, vector<64x64xbf16>, vector<8x64xf32> -> vector<8x64xf32>
    %c272 = arith.constant 272 : index
    %c0_15 = arith.constant 0 : index
    %53 = vector.load %arg2[%c272, %c0_15] : memref<816x128xbf16, #tpu.memory_space<vmem>>, vector<1x64xbf16>
    %54 = arith.extf %53 : vector<1x64xbf16> to vector<1x64xf32>
    %55 = vector.broadcast %54 : vector<1x64xf32> to vector<8x64xf32>
    %56 = arith.addf %52, %55 : vector<8x64xf32>
    %cst_16 = arith.constant 0.000000e+00 : f32
    %57 = vector.broadcast %cst_16 : f32 to vector<8x64xf32>
    %58 = arith.maximumf %56, %57 : vector<8x64xf32>
    %59 = vector.extract_strided_slice %58 {offsets = [0, 0], sizes = [8, 32], strides = [1, 1]} : vector<8x64xf32> to vector<8x32xf32>
    %60 = vector.extract_strided_slice %58 {offsets = [0, 32], sizes = [8, 32], strides = [1, 1]} : vector<8x64xf32> to vector<8x32xf32>
    %c288 = arith.constant 288 : index
    %c0_17 = arith.constant 0 : index
    %61 = vector.load %arg2[%c288, %c0_17] : memref<816x128xbf16, #tpu.memory_space<vmem>>, vector<2x64xbf16>
    %62 = vector.extract_strided_slice %4 {offsets = [0, 0], sizes = [8, 1], strides = [1, 1]} : vector<8x2xf32> to vector<8x1xf32>
    %63 = vector.extract_strided_slice %61 {offsets = [0, 0], sizes = [1, 64], strides = [1, 1]} : vector<2x64xbf16> to vector<1x64xbf16>
    %64 = arith.extf %63 : vector<1x64xbf16> to vector<1x64xf32>
    %65 = vector.broadcast %62 : vector<8x1xf32> to vector<8x64xf32>
    %66 = vector.broadcast %64 : vector<1x64xf32> to vector<8x64xf32>
    %67 = arith.mulf %65, %66 : vector<8x64xf32>
    %68 = vector.extract_strided_slice %4 {offsets = [0, 1], sizes = [8, 1], strides = [1, 1]} : vector<8x2xf32> to vector<8x1xf32>
    %69 = vector.extract_strided_slice %61 {offsets = [1, 0], sizes = [1, 64], strides = [1, 1]} : vector<2x64xbf16> to vector<1x64xbf16>
    %70 = arith.extf %69 : vector<1x64xbf16> to vector<1x64xf32>
    %71 = vector.broadcast %68 : vector<8x1xf32> to vector<8x64xf32>
    %72 = vector.broadcast %70 : vector<1x64xf32> to vector<8x64xf32>
    %73 = arith.mulf %71, %72 : vector<8x64xf32>
    %74 = arith.addf %67, %73 : vector<8x64xf32>
    %c304 = arith.constant 304 : index
    %c0_18 = arith.constant 0 : index
    %75 = vector.load %arg2[%c304, %c0_18] : memref<816x128xbf16, #tpu.memory_space<vmem>>, vector<1x64xbf16>
    %76 = arith.extf %75 : vector<1x64xbf16> to vector<1x64xf32>
    %77 = vector.broadcast %76 : vector<1x64xf32> to vector<8x64xf32>
    %78 = arith.addf %74, %77 : vector<8x64xf32>
    %79 = vector.extract_strided_slice %78 {offsets = [0, 0], sizes = [8, 32], strides = [1, 1]} : vector<8x64xf32> to vector<8x32xf32>
    %80 = vector.extract_strided_slice %78 {offsets = [0, 32], sizes = [8, 32], strides = [1, 1]} : vector<8x64xf32> to vector<8x32xf32>
    %81 = arith.truncf %79 : vector<8x32xf32> to vector<8x32xbf16>
    %82 = arith.truncf %31 : vector<8x32xf32> to vector<8x32xbf16>
    %cst_19 = arith.constant dense<0.000000e+00> : vector<8x8xf32>
    %83 = tpu.matmul %81, %82, %cst_19 {dimension_numbers = #tpu.dot_dimension_numbers<[1], [1], [0], [0], [0, 0, 1, 0], [], []>} : vector<8x32xbf16>, vector<8x32xbf16>, vector<8x8xf32> -> vector<8x8xf32>
    %cst_20 = arith.constant 0.176776692 : f32
    %84 = vector.broadcast %cst_20 : f32 to vector<8x8xf32>
    %85 = arith.mulf %83, %84 : vector<8x8xf32>
    %cst_21 = arith.constant dense<0xFF800000> : vector<8xf32>
    %86 = vector.multi_reduction <maximumf>, %85, %cst_21 [1] : vector<8x8xf32> to vector<8xf32>
    %87 = vector.shape_cast %86 : vector<8xf32> to vector<8x1xf32>
    %88 = vector.broadcast %87 : vector<8x1xf32> to vector<8x8xf32>
    %89 = arith.subf %85, %88 : vector<8x8xf32>
    %90 = math.exp %89 : vector<8x8xf32>
    %cst_22 = arith.constant dense<0.000000e+00> : vector<8xf32>
    %91 = vector.multi_reduction <add>, %90, %cst_22 [1] : vector<8x8xf32> to vector<8xf32>
    %92 = vector.shape_cast %91 : vector<8xf32> to vector<8x1xf32>
    %93 = tpu.reciprocal %92 {approx = true} : vector<8x1xf32> -> vector<8x1xf32>
    %94 = vector.broadcast %93 : vector<8x1xf32> to vector<8x8xf32>
    %95 = arith.mulf %90, %94 : vector<8x8xf32>
    %96 = arith.truncf %95 : vector<8x8xf32> to vector<8x8xbf16>
    %97 = arith.truncf %59 : vector<8x32xf32> to vector<8x32xbf16>
    %cst_23 = arith.constant dense<0.000000e+00> : vector<8x32xf32>
    %98 = tpu.matmul %96, %97, %cst_23 {dimension_numbers = #tpu.dot_dimension_numbers<[1], [0], [0], [1], [0, 0, 1, 1], [], []>} : vector<8x8xbf16>, vector<8x32xbf16>, vector<8x32xf32> -> vector<8x32xf32>
    %cst_24 = arith.constant dense<0.000000e+00> : vector<32xf32>
    %99 = vector.multi_reduction <add>, %60, %cst_24 [0] : vector<8x32xf32> to vector<32xf32>
    %100 = vector.shape_cast %99 : vector<32xf32> to vector<1x32xf32>
    %cst_25 = arith.constant 8.000000e+00 : f32
    %101 = vector.broadcast %cst_25 : f32 to vector<1x32xf32>
    %102 = arith.divf %100, %101 : vector<1x32xf32>
    %c320 = arith.constant 320 : index
    %c0_26 = arith.constant 0 : index
    %103 = vector.load %arg2[%c320, %c0_26] : memref<816x128xbf16, #tpu.memory_space<vmem>>, vector<32x64xbf16>
    %104 = arith.truncf %102 : vector<1x32xf32> to vector<1x32xbf16>
    %cst_27 = arith.constant dense<0.000000e+00> : vector<1x64xf32>
    %105 = tpu.matmul %104, %103, %cst_27 {dimension_numbers = #tpu.dot_dimension_numbers<[1], [0], [0], [1], [0, 0, 1, 1], [], []>} : vector<1x32xbf16>, vector<32x64xbf16>, vector<1x64xf32> -> vector<1x64xf32>
    %c352 = arith.constant 352 : index
    %c0_28 = arith.constant 0 : index
    %106 = vector.load %arg2[%c352, %c0_28] : memref<816x128xbf16, #tpu.memory_space<vmem>>, vector<1x64xbf16>
    %107 = arith.extf %106 : vector<1x64xbf16> to vector<1x64xf32>
    %108 = arith.addf %105, %107 : vector<1x64xf32>
    %109 = vector.extract_strided_slice %108 {offsets = [0, 0], sizes = [1, 32], strides = [1, 1]} : vector<1x64xf32> to vector<1x32xf32>
    %110 = vector.extract_strided_slice %108 {offsets = [0, 32], sizes = [1, 32], strides = [1, 1]} : vector<1x64xf32> to vector<1x32xf32>
    %cst_29 = arith.constant 0.000000e+00 : f32
    %111 = vector.broadcast %cst_29 : f32 to vector<1x32xf32>
    %112 = arith.subf %111, %110 : vector<1x32xf32>
    %113 = math.exp %112 : vector<1x32xf32>
    %cst_30 = arith.constant 1.000000e+00 : f32
    %114 = vector.broadcast %cst_30 : f32 to vector<1x32xf32>
    %115 = arith.addf %114, %113 : vector<1x32xf32>
    %cst_31 = arith.constant 0.899999976 : f32
    %116 = vector.broadcast %cst_31 : f32 to vector<1x32xf32>
    %117 = arith.divf %116, %115 : vector<1x32xf32>
    %cst_32 = arith.constant 1.000000e-01 : f32
    %118 = vector.broadcast %cst_32 : f32 to vector<1x32xf32>
    %119 = arith.addf %118, %117 : vector<1x32xf32>
    %120 = arith.mulf %119, %5 : vector<1x32xf32>
    %121 = arith.addf %109, %120 : vector<1x32xf32>
    %c368 = arith.constant 368 : index
    %c0_33 = arith.constant 0 : index
    %122 = vector.load %arg2[%c368, %c0_33] : memref<816x128xbf16, #tpu.memory_space<vmem>>, vector<32x96xbf16>
    %123 = arith.truncf %98 : vector<8x32xf32> to vector<8x32xbf16>
    %cst_34 = arith.constant dense<0.000000e+00> : vector<8x96xf32>
    %124 = tpu.matmul %123, %122, %cst_34 {dimension_numbers = #tpu.dot_dimension_numbers<[1], [0], [0], [1], [0, 0, 1, 1], [], []>} : vector<8x32xbf16>, vector<32x96xbf16>, vector<8x96xf32> -> vector<8x96xf32>
    %c400 = arith.constant 400 : index
    %c0_35 = arith.constant 0 : index
    %125 = vector.load %arg2[%c400, %c0_35] : memref<816x128xbf16, #tpu.memory_space<vmem>>, vector<32x96xbf16>
    %126 = arith.truncf %121 : vector<1x32xf32> to vector<1x32xbf16>
    %cst_36 = arith.constant dense<0.000000e+00> : vector<1x96xf32>
    %127 = tpu.matmul %126, %125, %cst_36 {dimension_numbers = #tpu.dot_dimension_numbers<[1], [0], [0], [1], [0, 0, 1, 1], [], []>} : vector<1x32xbf16>, vector<32x96xbf16>, vector<1x96xf32> -> vector<1x96xf32>
    %128 = vector.broadcast %127 : vector<1x96xf32> to vector<8x96xf32>
    %129 = arith.addf %124, %128 : vector<8x96xf32>
    %c432 = arith.constant 432 : index
    %c0_37 = arith.constant 0 : index
    %130 = vector.load %arg2[%c432, %c0_37] : memref<816x128xbf16, #tpu.memory_space<vmem>>, vector<32x96xbf16>
    %131 = arith.truncf %80 : vector<8x32xf32> to vector<8x32xbf16>
    %cst_38 = arith.constant dense<0.000000e+00> : vector<8x96xf32>
    %132 = tpu.matmul %131, %130, %cst_38 {dimension_numbers = #tpu.dot_dimension_numbers<[1], [0], [0], [1], [0, 0, 1, 1], [], []>} : vector<8x32xbf16>, vector<32x96xbf16>, vector<8x96xf32> -> vector<8x96xf32>
    %133 = arith.addf %129, %132 : vector<8x96xf32>
    %c464 = arith.constant 464 : index
    %c0_39 = arith.constant 0 : index
    %134 = vector.load %arg2[%c464, %c0_39] : memref<816x128xbf16, #tpu.memory_space<vmem>>, vector<1x96xbf16>
    %135 = arith.extf %134 : vector<1x96xbf16> to vector<1x96xf32>
    %136 = vector.broadcast %135 : vector<1x96xf32> to vector<8x96xf32>
    %137 = arith.addf %133, %136 : vector<8x96xf32>
    %cst_40 = arith.constant 0.000000e+00 : f32
    %138 = vector.broadcast %cst_40 : f32 to vector<8x96xf32>
    %139 = arith.maximumf %137, %138 : vector<8x96xf32>
    %c480 = arith.constant 480 : index
    %c0_41 = arith.constant 0 : index
    %140 = vector.load %arg2[%c480, %c0_41] : memref<816x128xbf16, #tpu.memory_space<vmem>>, vector<96x96xbf16>
    %141 = arith.truncf %139 : vector<8x96xf32> to vector<8x96xbf16>
    %cst_42 = arith.constant dense<0.000000e+00> : vector<8x96xf32>
    %142 = tpu.matmul %141, %140, %cst_42 {dimension_numbers = #tpu.dot_dimension_numbers<[1], [0], [0], [1], [0, 0, 1, 1], [], []>} : vector<8x96xbf16>, vector<96x96xbf16>, vector<8x96xf32> -> vector<8x96xf32>
    %c576 = arith.constant 576 : index
    %c0_43 = arith.constant 0 : index
    %143 = vector.load %arg2[%c576, %c0_43] : memref<816x128xbf16, #tpu.memory_space<vmem>>, vector<1x96xbf16>
    %144 = arith.extf %143 : vector<1x96xbf16> to vector<1x96xf32>
    %145 = vector.broadcast %144 : vector<1x96xf32> to vector<8x96xf32>
    %146 = arith.addf %142, %145 : vector<8x96xf32>
    %cst_44 = arith.constant 0.000000e+00 : f32
    %147 = vector.broadcast %cst_44 : f32 to vector<8x96xf32>
    %148 = arith.maximumf %146, %147 : vector<8x96xf32>
    %c592 = arith.constant 592 : index
    %c0_45 = arith.constant 0 : index
    %149 = vector.load %arg2[%c592, %c0_45] : memref<816x128xbf16, #tpu.memory_space<vmem>>, vector<96x96xbf16>
    %150 = arith.truncf %148 : vector<8x96xf32> to vector<8x96xbf16>
    %cst_46 = arith.constant dense<0.000000e+00> : vector<8x96xf32>
    %151 = tpu.matmul %150, %149, %cst_46 {dimension_numbers = #tpu.dot_dimension_numbers<[1], [0], [0], [1], [0, 0, 1, 1], [], []>} : vector<8x96xbf16>, vector<96x96xbf16>, vector<8x96xf32> -> vector<8x96xf32>
    %c688 = arith.constant 688 : index
    %c0_47 = arith.constant 0 : index
    %152 = vector.load %arg2[%c688, %c0_47] : memref<816x128xbf16, #tpu.memory_space<vmem>>, vector<1x96xbf16>
    %153 = arith.extf %152 : vector<1x96xbf16> to vector<1x96xf32>
    %154 = vector.broadcast %153 : vector<1x96xf32> to vector<8x96xf32>
    %155 = arith.addf %151, %154 : vector<8x96xf32>
    %cst_48 = arith.constant 0.000000e+00 : f32
    %156 = vector.broadcast %cst_48 : f32 to vector<8x96xf32>
    %157 = arith.maximumf %155, %156 : vector<8x96xf32>
    %c704 = arith.constant 704 : index
    %c0_49 = arith.constant 0 : index
    %158 = vector.load %arg2[%c704, %c0_49] : memref<816x128xbf16, #tpu.memory_space<vmem>>, vector<96x2xbf16>
    %159 = arith.truncf %157 : vector<8x96xf32> to vector<8x96xbf16>
    %cst_50 = arith.constant dense<0.000000e+00> : vector<8x2xf32>
    %160 = tpu.matmul %159, %158, %cst_50 {dimension_numbers = #tpu.dot_dimension_numbers<[1], [0], [0], [1], [0, 0, 1, 1], [], []>} : vector<8x96xbf16>, vector<96x2xbf16>, vector<8x2xf32> -> vector<8x2xf32>
    %c800 = arith.constant 800 : index
    %c0_51 = arith.constant 0 : index
    %161 = vector.load %arg2[%c800, %c0_51] : memref<816x128xbf16, #tpu.memory_space<vmem>>, vector<1x2xbf16>
    %162 = arith.extf %161 : vector<1x2xbf16> to vector<1x2xf32>
    %163 = vector.broadcast %162 : vector<1x2xf32> to vector<8x2xf32>
    %164 = arith.addf %160, %163 : vector<8x2xf32>
    %165 = tpu.iota {dimensions = array<i32: 1>} : vector<8x2xi32>
    %c0_i32 = arith.constant 0 : i32
    %166 = vector.broadcast %c0_i32 : i32 to vector<8x2xi32>
    %167 = arith.cmpi eq, %165, %166 : vector<8x2xi32>
    %cst_52 = arith.constant 0.000000e+00 : f32
    %168 = vector.broadcast %cst_52 : f32 to vector<8x2xf32>
    %169 = arith.maximumf %164, %168 : vector<8x2xf32>
    %170 = math.absf %164 : vector<8x2xf32>
    %cst_53 = arith.constant 0.000000e+00 : f32
    %171 = vector.broadcast %cst_53 : f32 to vector<8x2xf32>
    %172 = arith.subf %171, %170 : vector<8x2xf32>
    %173 = math.exp %172 : vector<8x2xf32>
    %cst_54 = arith.constant 1.000000e+00 : f32
    %174 = vector.broadcast %cst_54 : f32 to vector<8x2xf32>
    %175 = arith.addf %174, %173 : vector<8x2xf32>
    %176 = math.log %175 : vector<8x2xf32>
    %177 = arith.addf %169, %176 : vector<8x2xf32>
    %cst_55 = arith.constant 0.899999976 : f32
    %178 = vector.broadcast %cst_55 : f32 to vector<8x2xf32>
    %179 = arith.mulf %178, %177 : vector<8x2xf32>
    %cst_56 = arith.constant 1.000000e-01 : f32
    %180 = vector.broadcast %cst_56 : f32 to vector<8x2xf32>
    %181 = arith.addf %180, %179 : vector<8x2xf32>
    %182 = arith.select %167, %164, %181 : vector<8x2xi1>, vector<8x2xf32>
    %c0_57 = arith.constant 0 : index
    %c0_58 = arith.constant 0 : index
    %c0_59 = arith.constant 0 : index
    %183 = vector.load %arg3[%c0_57, %c0_58, %c0_59] : memref<2x8x2xf32, #tpu.memory_space<vmem>>, vector<1x8x2xf32>
    %184 = vector.shape_cast %183 : vector<1x8x2xf32> to vector<8x2xf32>
    %185 = vector.shape_cast %182 : vector<8x2xf32> to vector<1x8x2xf32>
    tpu.vector_store %arg3[%c0_57, %c0_58, %c0_59], %185 {strides = array<i32>} : memref<2x8x2xf32, #tpu.memory_space<vmem>>, vector<1x8x2xf32>,
    %c1 = arith.constant 1 : index
    %c0_60 = arith.constant 0 : index
    %c0_61 = arith.constant 0 : index
    %186 = vector.load %arg1[%c1, %c0_60, %c0_61] : memref<2x24x128xf32, #tpu.memory_space<vmem>>, vector<1x24x128xf32>
    %187 = vector.shape_cast %186 : vector<1x24x128xf32> to vector<24x128xf32>
    %188 = vector.extract_strided_slice %187 {offsets = [0, 0], sizes = [8, 2], strides = [1, 1]} : vector<24x128xf32> to vector<8x2xf32>
    %189 = vector.extract_strided_slice %187 {offsets = [0, 2], sizes = [8, 1], strides = [1, 1]} : vector<24x128xf32> to vector<8x1xf32>
    %190 = vector.extract_strided_slice %187 {offsets = [8, 0], sizes = [8, 2], strides = [1, 1]} : vector<24x128xf32> to vector<8x2xf32>
    %191 = vector.extract_strided_slice %187 {offsets = [16, 0], sizes = [1, 32], strides = [1, 1]} : vector<24x128xf32> to vector<1x32xf32>
    %c0_62 = arith.constant 0 : index
    %c0_63 = arith.constant 0 : index
    %192 = vector.load %arg2[%c0_62, %c0_63] : memref<816x128xbf16, #tpu.memory_space<vmem>>, vector<2x96xbf16>
    %193 = vector.extract_strided_slice %188 {offsets = [0, 0], sizes = [8, 1], strides = [1, 1]} : vector<8x2xf32> to vector<8x1xf32>
    %194 = vector.extract_strided_slice %192 {offsets = [0, 0], sizes = [1, 96], strides = [1, 1]} : vector<2x96xbf16> to vector<1x96xbf16>
    %195 = arith.extf %194 : vector<1x96xbf16> to vector<1x96xf32>
    %196 = vector.broadcast %193 : vector<8x1xf32> to vector<8x96xf32>
    %197 = vector.broadcast %195 : vector<1x96xf32> to vector<8x96xf32>
    %198 = arith.mulf %196, %197 : vector<8x96xf32>
    %199 = vector.extract_strided_slice %188 {offsets = [0, 1], sizes = [8, 1], strides = [1, 1]} : vector<8x2xf32> to vector<8x1xf32>
    %200 = vector.extract_strided_slice %192 {offsets = [1, 0], sizes = [1, 96], strides = [1, 1]} : vector<2x96xbf16> to vector<1x96xbf16>
    %201 = arith.extf %200 : vector<1x96xbf16> to vector<1x96xf32>
    %202 = vector.broadcast %199 : vector<8x1xf32> to vector<8x96xf32>
    %203 = vector.broadcast %201 : vector<1x96xf32> to vector<8x96xf32>
    %204 = arith.mulf %202, %203 : vector<8x96xf32>
    %205 = arith.addf %198, %204 : vector<8x96xf32>
    %c32_64 = arith.constant 32 : index
    %c0_65 = arith.constant 0 : index
    %206 = vector.load %arg2[%c32_64, %c0_65] : memref<816x128xbf16, #tpu.memory_space<vmem>>, vector<1x96xbf16>
    %207 = arith.extf %206 : vector<1x96xbf16> to vector<1x96xf32>
    %208 = vector.broadcast %207 : vector<1x96xf32> to vector<8x96xf32>
    %209 = arith.addf %205, %208 : vector<8x96xf32>
    %210 = vector.extract_strided_slice %209 {offsets = [0, 0], sizes = [8, 64], strides = [1, 1]} : vector<8x96xf32> to vector<8x64xf32>
    %c16_66 = arith.constant 16 : index
    %c0_67 = arith.constant 0 : index
    %211 = vector.load %arg2[%c16_66, %c0_67] : memref<816x128xbf16, #tpu.memory_space<vmem>>, vector<1x64xbf16>
    %212 = arith.extf %211 : vector<1x64xbf16> to vector<1x64xf32>
    %213 = vector.broadcast %189 : vector<8x1xf32> to vector<8x64xf32>
    %214 = vector.broadcast %212 : vector<1x64xf32> to vector<8x64xf32>
    %215 = arith.mulf %213, %214 : vector<8x64xf32>
    %216 = arith.addf %210, %215 : vector<8x64xf32>
    %217 = vector.extract_strided_slice %209 {offsets = [0, 64], sizes = [8, 32], strides = [1, 1]} : vector<8x96xf32> to vector<8x32xf32>
    %c48_68 = arith.constant 48 : index
    %c0_69 = arith.constant 0 : index
    %218 = vector.load %arg2[%c48_68, %c0_69] : memref<816x128xbf16, #tpu.memory_space<vmem>>, vector<64x64xbf16>
    %219 = arith.truncf %216 : vector<8x64xf32> to vector<8x64xbf16>
    %cst_70 = arith.constant dense<0.000000e+00> : vector<8x64xf32>
    %220 = tpu.matmul %219, %218, %cst_70 {dimension_numbers = #tpu.dot_dimension_numbers<[1], [0], [0], [1], [0, 0, 1, 1], [], []>} : vector<8x64xbf16>, vector<64x64xbf16>, vector<8x64xf32> -> vector<8x64xf32>
    %c112_71 = arith.constant 112 : index
    %c0_72 = arith.constant 0 : index
    %221 = vector.load %arg2[%c112_71, %c0_72] : memref<816x128xbf16, #tpu.memory_space<vmem>>, vector<1x64xbf16>
    %222 = arith.extf %221 : vector<1x64xbf16> to vector<1x64xf32>
    %223 = vector.broadcast %222 : vector<1x64xf32> to vector<8x64xf32>
    %224 = arith.addf %220, %223 : vector<8x64xf32>
    %cst_73 = arith.constant 0.000000e+00 : f32
    %225 = vector.broadcast %cst_73 : f32 to vector<8x64xf32>
    %226 = arith.maximumf %224, %225 : vector<8x64xf32>
    %c128_74 = arith.constant 128 : index
    %c0_75 = arith.constant 0 : index
    %227 = vector.load %arg2[%c128_74, %c0_75] : memref<816x128xbf16, #tpu.memory_space<vmem>>, vector<64x64xbf16>
    %228 = arith.truncf %226 : vector<8x64xf32> to vector<8x64xbf16>
    %cst_76 = arith.constant dense<0.000000e+00> : vector<8x64xf32>
    %229 = tpu.matmul %228, %227, %cst_76 {dimension_numbers = #tpu.dot_dimension_numbers<[1], [0], [0], [1], [0, 0, 1, 1], [], []>} : vector<8x64xbf16>, vector<64x64xbf16>, vector<8x64xf32> -> vector<8x64xf32>
    %c192_77 = arith.constant 192 : index
    %c0_78 = arith.constant 0 : index
    %230 = vector.load %arg2[%c192_77, %c0_78] : memref<816x128xbf16, #tpu.memory_space<vmem>>, vector<1x64xbf16>
    %231 = arith.extf %230 : vector<1x64xbf16> to vector<1x64xf32>
    %232 = vector.broadcast %231 : vector<1x64xf32> to vector<8x64xf32>
    %233 = arith.addf %229, %232 : vector<8x64xf32>
    %cst_79 = arith.constant 0.000000e+00 : f32
    %234 = vector.broadcast %cst_79 : f32 to vector<8x64xf32>
    %235 = arith.maximumf %233, %234 : vector<8x64xf32>
    %c208_80 = arith.constant 208 : index
    %c0_81 = arith.constant 0 : index
    %236 = vector.load %arg2[%c208_80, %c0_81] : memref<816x128xbf16, #tpu.memory_space<vmem>>, vector<64x64xbf16>
    %237 = arith.truncf %235 : vector<8x64xf32> to vector<8x64xbf16>
    %cst_82 = arith.constant dense<0.000000e+00> : vector<8x64xf32>
    %238 = tpu.matmul %237, %236, %cst_82 {dimension_numbers = #tpu.dot_dimension_numbers<[1], [0], [0], [1], [0, 0, 1, 1], [], []>} : vector<8x64xbf16>, vector<64x64xbf16>, vector<8x64xf32> -> vector<8x64xf32>
    %c272_83 = arith.constant 272 : index
    %c0_84 = arith.constant 0 : index
    %239 = vector.load %arg2[%c272_83, %c0_84] : memref<816x128xbf16, #tpu.memory_space<vmem>>, vector<1x64xbf16>
    %240 = arith.extf %239 : vector<1x64xbf16> to vector<1x64xf32>
    %241 = vector.broadcast %240 : vector<1x64xf32> to vector<8x64xf32>
    %242 = arith.addf %238, %241 : vector<8x64xf32>
    %cst_85 = arith.constant 0.000000e+00 : f32
    %243 = vector.broadcast %cst_85 : f32 to vector<8x64xf32>
    %244 = arith.maximumf %242, %243 : vector<8x64xf32>
    %245 = vector.extract_strided_slice %244 {offsets = [0, 0], sizes = [8, 32], strides = [1, 1]} : vector<8x64xf32> to vector<8x32xf32>
    %246 = vector.extract_strided_slice %244 {offsets = [0, 32], sizes = [8, 32], strides = [1, 1]} : vector<8x64xf32> to vector<8x32xf32>
    %c288_86 = arith.constant 288 : index
    %c0_87 = arith.constant 0 : index
    %247 = vector.load %arg2[%c288_86, %c0_87] : memref<816x128xbf16, #tpu.memory_space<vmem>>, vector<2x64xbf16>
    %248 = vector.extract_strided_slice %190 {offsets = [0, 0], sizes = [8, 1], strides = [1, 1]} : vector<8x2xf32> to vector<8x1xf32>
    %249 = vector.extract_strided_slice %247 {offsets = [0, 0], sizes = [1, 64], strides = [1, 1]} : vector<2x64xbf16> to vector<1x64xbf16>
    %250 = arith.extf %249 : vector<1x64xbf16> to vector<1x64xf32>
    %251 = vector.broadcast %248 : vector<8x1xf32> to vector<8x64xf32>
    %252 = vector.broadcast %250 : vector<1x64xf32> to vector<8x64xf32>
    %253 = arith.mulf %251, %252 : vector<8x64xf32>
    %254 = vector.extract_strided_slice %190 {offsets = [0, 1], sizes = [8, 1], strides = [1, 1]} : vector<8x2xf32> to vector<8x1xf32>
    %255 = vector.extract_strided_slice %247 {offsets = [1, 0], sizes = [1, 64], strides = [1, 1]} : vector<2x64xbf16> to vector<1x64xbf16>
    %256 = arith.extf %255 : vector<1x64xbf16> to vector<1x64xf32>
    %257 = vector.broadcast %254 : vector<8x1xf32> to vector<8x64xf32>
    %258 = vector.broadcast %256 : vector<1x64xf32> to vector<8x64xf32>
    %259 = arith.mulf %257, %258 : vector<8x64xf32>
    %260 = arith.addf %253, %259 : vector<8x64xf32>
    %c304_88 = arith.constant 304 : index
    %c0_89 = arith.constant 0 : index
    %261 = vector.load %arg2[%c304_88, %c0_89] : memref<816x128xbf16, #tpu.memory_space<vmem>>, vector<1x64xbf16>
    %262 = arith.extf %261 : vector<1x64xbf16> to vector<1x64xf32>
    %263 = vector.broadcast %262 : vector<1x64xf32> to vector<8x64xf32>
    %264 = arith.addf %260, %263 : vector<8x64xf32>
    %265 = vector.extract_strided_slice %264 {offsets = [0, 0], sizes = [8, 32], strides = [1, 1]} : vector<8x64xf32> to vector<8x32xf32>
    %266 = vector.extract_strided_slice %264 {offsets = [0, 32], sizes = [8, 32], strides = [1, 1]} : vector<8x64xf32> to vector<8x32xf32>
    %267 = arith.truncf %265 : vector<8x32xf32> to vector<8x32xbf16>
    %268 = arith.truncf %217 : vector<8x32xf32> to vector<8x32xbf16>
    %cst_90 = arith.constant dense<0.000000e+00> : vector<8x8xf32>
    %269 = tpu.matmul %267, %268, %cst_90 {dimension_numbers = #tpu.dot_dimension_numbers<[1], [1], [0], [0], [0, 0, 1, 0], [], []>} : vector<8x32xbf16>, vector<8x32xbf16>, vector<8x8xf32> -> vector<8x8xf32>
    %cst_91 = arith.constant 0.176776692 : f32
    %270 = vector.broadcast %cst_91 : f32 to vector<8x8xf32>
    %271 = arith.mulf %269, %270 : vector<8x8xf32>
    %cst_92 = arith.constant dense<0xFF800000> : vector<8xf32>
    %272 = vector.multi_reduction <maximumf>, %271, %cst_92 [1] : vector<8x8xf32> to vector<8xf32>
    %273 = vector.shape_cast %272 : vector<8xf32> to vector<8x1xf32>
    %274 = vector.broadcast %273 : vector<8x1xf32> to vector<8x8xf32>
    %275 = arith.subf %271, %274 : vector<8x8xf32>
    %276 = math.exp %275 : vector<8x8xf32>
    %cst_93 = arith.constant dense<0.000000e+00> : vector<8xf32>
    %277 = vector.multi_reduction <add>, %276, %cst_93 [1] : vector<8x8xf32> to vector<8xf32>
    %278 = vector.shape_cast %277 : vector<8xf32> to vector<8x1xf32>
    %279 = tpu.reciprocal %278 {approx = true} : vector<8x1xf32> -> vector<8x1xf32>
    %280 = vector.broadcast %279 : vector<8x1xf32> to vector<8x8xf32>
    %281 = arith.mulf %276, %280 : vector<8x8xf32>
    %282 = arith.truncf %281 : vector<8x8xf32> to vector<8x8xbf16>
    %283 = arith.truncf %245 : vector<8x32xf32> to vector<8x32xbf16>
    %cst_94 = arith.constant dense<0.000000e+00> : vector<8x32xf32>
    %284 = tpu.matmul %282, %283, %cst_94 {dimension_numbers = #tpu.dot_dimension_numbers<[1], [0], [0], [1], [0, 0, 1, 1], [], []>} : vector<8x8xbf16>, vector<8x32xbf16>, vector<8x32xf32> -> vector<8x32xf32>
    %cst_95 = arith.constant dense<0.000000e+00> : vector<32xf32>
    %285 = vector.multi_reduction <add>, %246, %cst_95 [0] : vector<8x32xf32> to vector<32xf32>
    %286 = vector.shape_cast %285 : vector<32xf32> to vector<1x32xf32>
    %cst_96 = arith.constant 8.000000e+00 : f32
    %287 = vector.broadcast %cst_96 : f32 to vector<1x32xf32>
    %288 = arith.divf %286, %287 : vector<1x32xf32>
    %c320_97 = arith.constant 320 : index
    %c0_98 = arith.constant 0 : index
    %289 = vector.load %arg2[%c320_97, %c0_98] : memref<816x128xbf16, #tpu.memory_space<vmem>>, vector<32x64xbf16>
    %290 = arith.truncf %288 : vector<1x32xf32> to vector<1x32xbf16>
    %cst_99 = arith.constant dense<0.000000e+00> : vector<1x64xf32>
    %291 = tpu.matmul %290, %289, %cst_99 {dimension_numbers = #tpu.dot_dimension_numbers<[1], [0], [0], [1], [0, 0, 1, 1], [], []>} : vector<1x32xbf16>, vector<32x64xbf16>, vector<1x64xf32> -> vector<1x64xf32>
    %c352_100 = arith.constant 352 : index
    %c0_101 = arith.constant 0 : index
    %292 = vector.load %arg2[%c352_100, %c0_101] : memref<816x128xbf16, #tpu.memory_space<vmem>>, vector<1x64xbf16>
    %293 = arith.extf %292 : vector<1x64xbf16> to vector<1x64xf32>
    %294 = arith.addf %291, %293 : vector<1x64xf32>
    %295 = vector.extract_strided_slice %294 {offsets = [0, 0], sizes = [1, 32], strides = [1, 1]} : vector<1x64xf32> to vector<1x32xf32>
    %296 = vector.extract_strided_slice %294 {offsets = [0, 32], sizes = [1, 32], strides = [1, 1]} : vector<1x64xf32> to vector<1x32xf32>
    %cst_102 = arith.constant 0.000000e+00 : f32
    %297 = vector.broadcast %cst_102 : f32 to vector<1x32xf32>
    %298 = arith.subf %297, %296 : vector<1x32xf32>
    %299 = math.exp %298 : vector<1x32xf32>
    %cst_103 = arith.constant 1.000000e+00 : f32
    %300 = vector.broadcast %cst_103 : f32 to vector<1x32xf32>
    %301 = arith.addf %300, %299 : vector<1x32xf32>
    %cst_104 = arith.constant 0.899999976 : f32
    %302 = vector.broadcast %cst_104 : f32 to vector<1x32xf32>
    %303 = arith.divf %302, %301 : vector<1x32xf32>
    %cst_105 = arith.constant 1.000000e-01 : f32
    %304 = vector.broadcast %cst_105 : f32 to vector<1x32xf32>
    %305 = arith.addf %304, %303 : vector<1x32xf32>
    %306 = arith.mulf %305, %191 : vector<1x32xf32>
    %307 = arith.addf %295, %306 : vector<1x32xf32>
    %c368_106 = arith.constant 368 : index
    %c0_107 = arith.constant 0 : index
    %308 = vector.load %arg2[%c368_106, %c0_107] : memref<816x128xbf16, #tpu.memory_space<vmem>>, vector<32x96xbf16>
    %309 = arith.truncf %284 : vector<8x32xf32> to vector<8x32xbf16>
    %cst_108 = arith.constant dense<0.000000e+00> : vector<8x96xf32>
    %310 = tpu.matmul %309, %308, %cst_108 {dimension_numbers = #tpu.dot_dimension_numbers<[1], [0], [0], [1], [0, 0, 1, 1], [], []>} : vector<8x32xbf16>, vector<32x96xbf16>, vector<8x96xf32> -> vector<8x96xf32>
    %c400_109 = arith.constant 400 : index
    %c0_110 = arith.constant 0 : index
    %311 = vector.load %arg2[%c400_109, %c0_110] : memref<816x128xbf16, #tpu.memory_space<vmem>>, vector<32x96xbf16>
    %312 = arith.truncf %307 : vector<1x32xf32> to vector<1x32xbf16>
    %cst_111 = arith.constant dense<0.000000e+00> : vector<1x96xf32>
    %313 = tpu.matmul %312, %311, %cst_111 {dimension_numbers = #tpu.dot_dimension_numbers<[1], [0], [0], [1], [0, 0, 1, 1], [], []>} : vector<1x32xbf16>, vector<32x96xbf16>, vector<1x96xf32> -> vector<1x96xf32>
    %314 = vector.broadcast %313 : vector<1x96xf32> to vector<8x96xf32>
    %315 = arith.addf %310, %314 : vector<8x96xf32>
    %c432_112 = arith.constant 432 : index
    %c0_113 = arith.constant 0 : index
    %316 = vector.load %arg2[%c432_112, %c0_113] : memref<816x128xbf16, #tpu.memory_space<vmem>>, vector<32x96xbf16>
    %317 = arith.truncf %266 : vector<8x32xf32> to vector<8x32xbf16>
    %cst_114 = arith.constant dense<0.000000e+00> : vector<8x96xf32>
    %318 = tpu.matmul %317, %316, %cst_114 {dimension_numbers = #tpu.dot_dimension_numbers<[1], [0], [0], [1], [0, 0, 1, 1], [], []>} : vector<8x32xbf16>, vector<32x96xbf16>, vector<8x96xf32> -> vector<8x96xf32>
    %319 = arith.addf %315, %318 : vector<8x96xf32>
    %c464_115 = arith.constant 464 : index
    %c0_116 = arith.constant 0 : index
    %320 = vector.load %arg2[%c464_115, %c0_116] : memref<816x128xbf16, #tpu.memory_space<vmem>>, vector<1x96xbf16>
    %321 = arith.extf %320 : vector<1x96xbf16> to vector<1x96xf32>
    %322 = vector.broadcast %321 : vector<1x96xf32> to vector<8x96xf32>
    %323 = arith.addf %319, %322 : vector<8x96xf32>
    %cst_117 = arith.constant 0.000000e+00 : f32
    %324 = vector.broadcast %cst_117 : f32 to vector<8x96xf32>
    %325 = arith.maximumf %323, %324 : vector<8x96xf32>
    %c480_118 = arith.constant 480 : index
    %c0_119 = arith.constant 0 : index
    %326 = vector.load %arg2[%c480_118, %c0_119] : memref<816x128xbf16, #tpu.memory_space<vmem>>, vector<96x96xbf16>
    %327 = arith.truncf %325 : vector<8x96xf32> to vector<8x96xbf16>
    %cst_120 = arith.constant dense<0.000000e+00> : vector<8x96xf32>
    %328 = tpu.matmul %327, %326, %cst_120 {dimension_numbers = #tpu.dot_dimension_numbers<[1], [0], [0], [1], [0, 0, 1, 1], [], []>} : vector<8x96xbf16>, vector<96x96xbf16>, vector<8x96xf32> -> vector<8x96xf32>
    %c576_121 = arith.constant 576 : index
    %c0_122 = arith.constant 0 : index
    %329 = vector.load %arg2[%c576_121, %c0_122] : memref<816x128xbf16, #tpu.memory_space<vmem>>, vector<1x96xbf16>
    %330 = arith.extf %329 : vector<1x96xbf16> to vector<1x96xf32>
    %331 = vector.broadcast %330 : vector<1x96xf32> to vector<8x96xf32>
    %332 = arith.addf %328, %331 : vector<8x96xf32>
    %cst_123 = arith.constant 0.000000e+00 : f32
    %333 = vector.broadcast %cst_123 : f32 to vector<8x96xf32>
    %334 = arith.maximumf %332, %333 : vector<8x96xf32>
    %c592_124 = arith.constant 592 : index
    %c0_125 = arith.constant 0 : index
    %335 = vector.load %arg2[%c592_124, %c0_125] : memref<816x128xbf16, #tpu.memory_space<vmem>>, vector<96x96xbf16>
    %336 = arith.truncf %334 : vector<8x96xf32> to vector<8x96xbf16>
    %cst_126 = arith.constant dense<0.000000e+00> : vector<8x96xf32>
    %337 = tpu.matmul %336, %335, %cst_126 {dimension_numbers = #tpu.dot_dimension_numbers<[1], [0], [0], [1], [0, 0, 1, 1], [], []>} : vector<8x96xbf16>, vector<96x96xbf16>, vector<8x96xf32> -> vector<8x96xf32>
    %c688_127 = arith.constant 688 : index
    %c0_128 = arith.constant 0 : index
    %338 = vector.load %arg2[%c688_127, %c0_128] : memref<816x128xbf16, #tpu.memory_space<vmem>>, vector<1x96xbf16>
    %339 = arith.extf %338 : vector<1x96xbf16> to vector<1x96xf32>
    %340 = vector.broadcast %339 : vector<1x96xf32> to vector<8x96xf32>
    %341 = arith.addf %337, %340 : vector<8x96xf32>
    %cst_129 = arith.constant 0.000000e+00 : f32
    %342 = vector.broadcast %cst_129 : f32 to vector<8x96xf32>
    %343 = arith.maximumf %341, %342 : vector<8x96xf32>
    %c704_130 = arith.constant 704 : index
    %c0_131 = arith.constant 0 : index
    %344 = vector.load %arg2[%c704_130, %c0_131] : memref<816x128xbf16, #tpu.memory_space<vmem>>, vector<96x2xbf16>
    %345 = arith.truncf %343 : vector<8x96xf32> to vector<8x96xbf16>
    %cst_132 = arith.constant dense<0.000000e+00> : vector<8x2xf32>
    %346 = tpu.matmul %345, %344, %cst_132 {dimension_numbers = #tpu.dot_dimension_numbers<[1], [0], [0], [1], [0, 0, 1, 1], [], []>} : vector<8x96xbf16>, vector<96x2xbf16>, vector<8x2xf32> -> vector<8x2xf32>
    %c800_133 = arith.constant 800 : index
    %c0_134 = arith.constant 0 : index
    %347 = vector.load %arg2[%c800_133, %c0_134] : memref<816x128xbf16, #tpu.memory_space<vmem>>, vector<1x2xbf16>
    %348 = arith.extf %347 : vector<1x2xbf16> to vector<1x2xf32>
    %349 = vector.broadcast %348 : vector<1x2xf32> to vector<8x2xf32>
    %350 = arith.addf %346, %349 : vector<8x2xf32>
    %351 = tpu.iota {dimensions = array<i32: 1>} : vector<8x2xi32>
    %c0_i32_135 = arith.constant 0 : i32
    %352 = vector.broadcast %c0_i32_135 : i32 to vector<8x2xi32>
    %353 = arith.cmpi eq, %351, %352 : vector<8x2xi32>
    %cst_136 = arith.constant 0.000000e+00 : f32
    %354 = vector.broadcast %cst_136 : f32 to vector<8x2xf32>
    %355 = arith.maximumf %350, %354 : vector<8x2xf32>
    %356 = math.absf %350 : vector<8x2xf32>
    %cst_137 = arith.constant 0.000000e+00 : f32
    %357 = vector.broadcast %cst_137 : f32 to vector<8x2xf32>
    %358 = arith.subf %357, %356 : vector<8x2xf32>
    %359 = math.exp %358 : vector<8x2xf32>
    %cst_138 = arith.constant 1.000000e+00 : f32
    %360 = vector.broadcast %cst_138 : f32 to vector<8x2xf32>
    %361 = arith.addf %360, %359 : vector<8x2xf32>
    %362 = math.log %361 : vector<8x2xf32>
    %363 = arith.addf %355, %362 : vector<8x2xf32>
    %cst_139 = arith.constant 0.899999976 : f32
    %364 = vector.broadcast %cst_139 : f32 to vector<8x2xf32>
    %365 = arith.mulf %364, %363 : vector<8x2xf32>
    %cst_140 = arith.constant 1.000000e-01 : f32
    %366 = vector.broadcast %cst_140 : f32 to vector<8x2xf32>
    %367 = arith.addf %366, %365 : vector<8x2xf32>
    %368 = arith.select %353, %350, %367 : vector<8x2xi1>, vector<8x2xf32>
    %c1_141 = arith.constant 1 : index
    %c0_142 = arith.constant 0 : index
    %c0_143 = arith.constant 0 : index
    %369 = vector.load %arg3[%c1_141, %c0_142, %c0_143] : memref<2x8x2xf32, #tpu.memory_space<vmem>>, vector<1x8x2xf32>
    %370 = vector.shape_cast %369 : vector<1x8x2xf32> to vector<8x2xf32>
    %371 = vector.shape_cast %368 : vector<8x2xf32> to vector<1x8x2xf32>
    tpu.vector_store %arg3[%c1_141, %c0_142, %c0_143], %371 {strides = array<i32>} : memref<2x8x2xf32, #tpu.memory_space<vmem>>, vector<1x8x2xf32>,
    return
  }
  func.func @transform_0(%arg0: i32) -> (i32, i32, i32) {
    %c0_i32 = arith.constant 0 : i32
    %c0_i32_0 = arith.constant 0 : i32
    %c0_i32_1 = arith.constant 0 : i32
    return %arg0, %c0_i32, %c0_i32_0 : i32, i32, i32
  }
  func.func @transform_1(%arg0: i32) -> (i32, i32) {
    %c0_i32 = arith.constant 0 : i32
    %c0_i32_0 = arith.constant 0 : i32
    %c0_i32_1 = arith.constant 0 : i32
    return %c0_i32, %c0_i32_0 : i32, i32
  }
  func.func @transform_2(%arg0: i32) -> (i32, i32, i32) {
    %c0_i32 = arith.constant 0 : i32
    %c0_i32_0 = arith.constant 0 : i32
    %c0_i32_1 = arith.constant 0 : i32
    return %arg0, %c0_i32, %c0_i32_0 : i32, i32, i32
  }
}

</mosaic_0001>

<bundles_post_ra>
// kernel: forward.1
= control target key start
LH: loop header
LB: loop body
LE: loop exit
PB: predicated region body
PF: predicated region fallthrough
CT: control target
= control target key end

     0   :  { %7 = vsyncpa [#allocation3], 0  ;;  %s1871_s12 = smov [#allocation2]   ;;  %s1872_s14 = smov 64   ;;  %s2000_s0 = inlined_call_operand.vmem [shape: f32[2,24,128], index: 0, kind: input, shape index: {}]   ;;  %s2001_s1 = inlined_call_operand.hbm [shape: bf16[816,128], index: 1, kind: input, shape index: {}]   ;;  %s2002_s2 = inlined_call_operand.vmem [shape: f32[2,8,2], index: 2, kind: output, shape index: {}]  }
   0x1   :  { %s14_s11 = sshll.u32 %s2001_s1, 4  ;;  %s16_s13 = sshll.u32 %s1871_s12, 4  ;;  %s15_s11 = int_to_ptr.hbm [resolvable:$true] %s14_s11  ;;  %s17_s13 = int_to_ptr.vmem [resolvable:$true] %s16_s13 }
   0x2   :  { %s1873_s15 = smov 4  }
   0x3   :  { %22 = dma.hbm_to_vmem [thread:$0]  %s15_s11, 6528, %s17_s13, [#allocation3], %s1872_s14, %s1872_s14, %s1873_s15  }
   0x4   :  { %1869 = dma.done.wait [#allocation3], 6528  }
   0x5   :  { %1870 = vsyncadd [#allocation3], 4294960768  ;;  %v1874_v0 = vmov 0   ;;  %v1875_v1 = vmov 2   ;;  %v1876_v2 = vmov 1   ;;  %v28_v3 = vld [vmem:[%s2000_s0] sm:$0xff] }
   0x6   :  { %1811 = vset.pattern.permute.xlu0 %v1874_v0  ;;  %1813 = vset.pattern.permute.xlu1 %v1875_v1  ;;  %v29_v4 = vld [vmem:[%s2000_s0 + $0x8] sm:$0xff]  ;;  %v1729_v5 = vld [vmem:[#allocation2 + $0x30] sm:$0xff]  ;;  %v1727_v7 = vld [vmem:[#allocation2 + $0x20] sm:$0xff]  ;;  %vm96_vm0 = vcmask 523264   ;;  %vm245_vm1 = vcmask 261120   ;;  %vm266_vm2 = vcmask 64512  }
   0x7   :  { %1815 = vset.pattern.permute.xlu2 %v1876_v2  ;;  %35 = vperm.xlu0 %1811, %v28_v3   ;;  %v1728_v6 = vld [vmem:[#allocation2 + $0x28] sm:$0xff]  ;;  %v1726_v8 = vld [vmem:[#allocation2 + $0x18] sm:$0xff]  ;;  %v31_v9 = vld [vmem:[#allocation2] sm:$0x1]  ;;  %vm300_vm3 = vcmask 523520   ;;  %vm283_vm4 = vcmask 1043456  }
   0x8   :  { %54 = vperm.xlu1 %1813, %v28_v3   ;;  %230 = vperm.xlu2 %1815, %v29_v4   ;;  %v51_v11 = vld [vmem:[#allocation2 + $0x8] sm:$0x1]  ;;  %v32_v12 = vunpack.c.l.bf16 %v31_v9  ;;  %v47_v13 = vld [vmem:[#allocation2 + $0x10] sm:$0x1]  ;;  %v1733_v30 = vld [vmem:[#allocation2 + $0x58] sm:$0xff]  ;;  %s1878_s21 = smov 96  }
   0x9   :  { %104 = vmatpush.bf16.msra.mxu0 %v1729_v5  ;;  %v52_v14 = vunpack.c.l.bf16 %v51_v11  ;;  %v48_v17 = vunpack.c.l.bf16 %v47_v13  ;;  %157 = vmatpush.bf16.msra.mxu1 %v1733_v30  ;;  %v1732_v31 = vld [vmem:[#allocation2 + $0x50] sm:$0xff]  ;;  %v236_v38 = vld [vmem:[#allocation2 + $0x98] sm:$0x1]  ;;  %v1731_v47 = vld [vmem:[#allocation2 + $0x48] sm:$0xff]  ;;  %s1879_s24 = smov 32   ;;  %vm544_vm10 = vcmask 785408  }
   0xa   :  { %v38_v15 = vperm.slane %v32_v12, 0  ;;  %v44_v16 = vperm.slane %v32_v12, 1  ;;  %v220_v32 = vld [vmem:[#allocation2 + $0x90] sm:$0x1]  ;;  %v237_v41 = vunpack.c.l.bf16 %v236_v38  ;;  %v1730_v49 = vld [vmem:[#allocation2 + $0x40] sm:$0xff]  ;;  %v1736_v59 = vld [vmem:[#allocation2 + $0x78] sm:$0xff] }
   0xb   :  { %v57_v18 = vperm.slane %v52_v14, 0  ;;  %v49_v23 = vperm.slane %v48_v17, 0  ;;  %v221_v33 = vunpack.c.l.bf16 %v220_v32  ;;  %v69_v50 = vld [vmem:[#allocation2 + $0x38] sm:$0x1]  ;;  %v1737_v58 = vld [vmem:[#allocation2 + $0x80] sm:$0xff]  ;;  %v1735_v60 = vld [vmem:[#allocation2 + $0x70] sm:$0xff] }
   0xc   :  { %v238_v43 = vperm.slane %v237_v41, 0  ;;  %v70_v51 = vunpack.c.l.bf16 %v69_v50  ;;  %210 = vmatpush.bf16.msra.mxu2 %v1737_v58  ;;  %v1734_v61 = vld [vmem:[#allocation2 + $0x68] sm:$0xff]  ;;  %v1921_v11 = vld [vmem:[%s2000_s0 + $0x18] sm:$0xff]  ;;  %v1741_v50 = vld [vmem:[#allocation2 + $0xc0] sm:$0xff]  ;;  %vm714_vm12 = vcmask 15360  }
   0xd   :  { %105 = vmatpush.bf16.msra.mxu0 %v1728_v6  ;;  %158 = vmatpush.bf16.msra.mxu1 %v1732_v31  ;;  %v233_v34 = vperm.slane %v221_v33, 1  ;;  %v227_v35 = vperm.slane %v221_v33, 0  ;;  %v176_v17 = vld [vmem:[#allocation2 + $0x88] sm:$0x1] }
   0xe   :  { %v71_v52 = vperm.slane %v70_v51, 0 }
   0xf   :  { %1812 = vset.pattern.permute.xlu0 %v1876_v2 }
  0x10   :  { %1814 = vset.pattern.permute.xlu1 %v1874_v0  ;;  %41 = vperm.xlu0 %1812, %v28_v3   ;;  %v123_v3 = vld [vmem:[#allocation2 + $0x60] sm:$0x1] }
  0x11   :  { %224 = vperm.xlu1 %1814, %v29_v4   ;;  %106 = vmatpush.bf16.msra.mxu0 %v1727_v7  ;;  %v124_v4 = vunpack.c.l.bf16 %v123_v3 }
  0x12   :  { %159 = vmatpush.bf16.msra.mxu1 %v1731_v47  ;;  %211 = vmatpush.bf16.msra.mxu2 %v1736_v59 }
  0x13   :  { %v125_v5 = vperm.slane %v124_v4, 0 }
  0x15   :  { %107 = vmatpush.bf16.msra.mxu0 %v1726_v8 }
  0x16   :  { %160 = vmatpush.bf16.msra.mxu1 %v1730_v49  ;;  %212 = vmatpush.bf16.msra.mxu2 %v1735_v60  ;;  %v30_v49 = vld [vmem:[%s2000_s0 + $0x10] sm:$0xff] }
  0x18   :  { %1816 = vset.pattern.permute.xlu0 %v1874_v0 }
  0x19   :  { %1817 = vset.pattern.permute.xlu1 %v1875_v1 }
  0x1a   :  { %213 = vmatpush.bf16.msra.mxu2 %v1734_v61 }
  0x1e   :  { %444 = vmatpush.bf16.msrb.mxu2 %v1741_v50 }
  0x62   :  { %v231_v36 = vpop.permute.xlu2 %230 }
  0x63   :  { %v234_v39 = vmul.f32 %v233_v34, %v231_v36 }
  0x79   :  { %v36_v10 = vpop.permute.xlu0 %35 }
  0x7a   :  { %v55_v20 = vpop.permute.xlu1 %54  ;;  %v39_v21 = vmul.f32 %v38_v15, %v36_v10 }
  0x7b   :  { %v58_v25 = vmul.f32 %v57_v18, %v55_v20  ;;  %v1877_v18 = vmov 8.0  }
  0x82   :  { %v42_v19 = vpop.permute.xlu0 %41 }
  0x83   :  { %v45_v22 = vmul.f32 %v44_v16, %v42_v19  ;;  %v225_v37 = vpop.permute.xlu1 %224  ;;  %v177_v19 = vunpack.c.l.bf16 %v176_v17  ;;  %v1745_v17 = vld [vmem:[#allocation2 + $0xe0] sm:$0xff] }
  0x84   :  { %v228_v40 = vmul.f32 %v227_v35, %v225_v37 }
  0x85   :  { %v46_v24 = vadd.f32 %v45_v22, %v39_v21  ;;  %v178_v21 = vperm.slane %v177_v19, 0 }
  0x86   :  { %v235_v42 = vadd.f32 %v234_v39, %v228_v40 }
  0x87   :  { %v50_v26 = vadd.f32 %v49_v23, %v46_v24 }
  0x88   :  { %v239_v46 = vadd.f32 %v238_v43, %v235_v42  ;;  %v1739_v42 = vld [vmem:[#allocation2 + $0xa8] sm:$0xff]  ;;  %v1738_v43 = vld [vmem:[#allocation2 + $0xa0] sm:$0xff] }
  0x89   :  { %v59_v27 = vadd.f32 %v58_v25, %v50_v26  ;;  %v241_v28 = vpack.c.bf16 %v50_v26, %v50_v26 }
  0x8a   :  { %v1911_v48 = vpack.c.bf16 %v239_v46, %v239_v46 }
  0x8b   :  { %v68_v29 = vpack.c.bf16 %v59_v27, %v59_v27  ;;  %243 = vrot.lane.b32.xlu2 %v241_v28, %s1872_s14 }
  0x8d   :  { %1410 = vmatmul.msk.bf16.vlgmr.msra.gmra.mxu0 %vm96_vm0, %v68_v29 }
  0xe5   :  { %v244_v44 = vpop.permute.xlu2 %243 }
  0xe6   :  { %v250_v45 = vsel %vm245_vm1, %v244_v44, 0 }
  0xe7   :  { %259 = vmatpush.bf16.xpose.msra.mxu3 %v250_v45 }
  0xee   :  { %1445 = vmatmul.msk.bf16.vlgmr.msra.gmra.mxu3 %vm245_vm1, %v1911_v48 }
 0x10a   :  { %v109_v53 = vpop.f32.mrf.mxu0 }
 0x10b   :  { %v110_v54 = vadd.f32 %v109_v53, %v71_v52  ;;  %v1740_v52 = vld [vmem:[#allocation2 + $0xb8] sm:$0xff] }
 0x10c   :  { %445 = vmatpush.bf16.msrb.mxu2 %v1740_v52 }
 0x10d   :  { %v113_v55 = vmax.f32 %v110_v54, 0.0 }
 0x10f   :  { %v122_v56 = vpack.c.bf16 %v113_v55, %v113_v55 }
 0x111   :  { %1427 = vmatmul.msk.bf16.vlgmr.msra.gmra.mxu1 %vm96_vm0, %v122_v56  ;;  %v321_v56 = vld [vmem:[#allocation2 + $0xb0] sm:$0x1] }
 0x112   :  { %v111_v57 = vpop.f32.mrf.mxu0 }
 0x113   :  { %v322_v57 = vunpack.c.l.bf16 %v321_v56 }
 0x171   :  { %v261_v62 = vpop.f32.mrf.mxu3 }
 0x172   :  { %v265_v63 = vmul.f32 0.17677669, %v261_v62 }
 0x174   :  { %v267_v0 = vsel %vm266_vm2, %v265_v63, -inf }
 0x175   :  { %268 = vmax.xlane.f32.xlu1 %v267_v0 }
 0x179   :  { %v263_v1 = vpop.f32.mrf.mxu3 }
 0x18e   :  { %v162_v6 = vpop.f32.mrf.mxu1  ;;  %743 = vperm.xlu1 %1817, %v1921_v11  }
 0x18f   :  { %v163_v7 = vadd.f32 %v162_v6, %v125_v5 }
 0x191   :  { %v166_v8 = vmax.f32 %v163_v7, 0.0 }
 0x193   :  { %v175_v9 = vpack.c.bf16 %v166_v8, %v166_v8 }
 0x195   :  { %1444 = vmatmul.msk.bf16.vlgmr.msra.gmra.mxu2 %vm96_vm0, %v175_v9 }
 0x196   :  { %v164_v10 = vpop.f32.mrf.mxu1 }
 0x1e8   :  { %v269_v12 = vpop.xlane.xlu1 %268 }
 0x1e9   :  { %v270_v13 = vsub.f32 %v265_v63, %v269_v12 }
 0x1eb   :  { %v271_v14 = vmul.f32 1.442695, %v270_v13 }
 0x1ed   :  { %1819 = vpow2.f32 %v271_v14 }
 0x1ee   :  { %1821 = vrcp.f32 %v1877_v18  ;;  %v1743_v18 = vld [vmem:[#allocation2 + $0xd0] sm:$0xff] }
 0x1ef   :  { %415 = vmatpush.bf16.msrb.mxu1 %v1743_v18  ;;  %v1755_v18 = vld [vmem:[#allocation2 + $0x140] sm:$0xff] }
 0x1f3   :  { %v1820_v15 = vpop.eup %1819 }
 0x1f4   :  { %v273_v16 = vsel %vm266_vm2, %v1820_v15, 0.0  ;;  %v1822_v20 = vpop.eup %1821 }
 0x1f5   :  { %274 = vadd.xlane.f32.xlu2 %v273_v16  ;;  %v309_v22 = vmul.f32 8.0, %v1822_v20  ;;  %vm313_vm5 = vweird.f32 %v1822_v20 }
 0x1f7   :  { %v310_v26 = vsub.f32 1.0, %v309_v22  ;;  %v1559_v22 = vld [vmem:[%s2000_s0 + $0x20] sm:$0xff] }
 0x1f9   :  { %v311_v31 = vmul.f32 %v1822_v20, %v310_v26  ;;  %v1763_v26 = vld [vmem:[#allocation2 + $0x188] sm:$0xff] }
 0x1fa   :  { %688 = vmatpush.bf16.msra.mxu2 %v1763_v26 }
 0x1fb   :  { %v312_v35 = vadd.f32 %v1822_v20, %v311_v31 }
 0x1fd   :  { %v1928_v38 = vsel %vm313_vm5, %v1822_v20, %v312_v35 }
 0x20d   :  { %730 = vperm.xlu2 %1815, %v1921_v11  }
 0x218   :  { %v215_v23 = vpop.f32.mrf.mxu2 }
 0x219   :  { %v216_v24 = vadd.f32 %v215_v23, %v178_v21  ;;  %v1742_v21 = vld [vmem:[#allocation2 + $0xc8] sm:$0xff]  ;;  %v1744_v23 = vld [vmem:[#allocation2 + $0xd8] sm:$0xff] }
 0x21a   :  { %416 = vmatpush.bf16.msrb.mxu1 %v1742_v21 }
 0x21b   :  { %v219_v25 = vmax.f32 %v216_v24, 0.0  ;;  %v1767_v24 = vld [vmem:[#allocation2 + $0x30] sm:$0xff] }
 0x21d   :  { %v301_v27 = vsel %vm300_vm3, %v219_v25, 0.0  ;;  %v279_v28 = vpack.c.bf16 %v219_v25, %v219_v25  ;;  %v1764_v25 = vld [vmem:[#allocation2 + $0x18] sm:$0xff] }
 0x21e   :  { %v302_v29 = vrot.slane %v301_v27, 4 }
 0x21f   :  { %v285_v30 = vsel %vm283_vm4, %v279_v28, 0 }
 0x220   :  { %v303_v32 = vadd.f32 %v302_v29, %v301_v27  ;;  %v217_v33 = vpop.f32.mrf.mxu2  ;;  %294 = vmatpush.bf16.msrb.mxu3 %v285_v30  ;;  %v1762_v27 = vld [vmem:[#allocation2 + $0x180] sm:$0xff]  ;;  %v1761_v30 = vld [vmem:[#allocation2 + $0x178] sm:$0xff] }
 0x221   :  { %689 = vmatpush.bf16.msra.mxu2 %v1762_v27 }
 0x222   :  { %v304_v34 = vrot.slane %v303_v32, 2 }
 0x224   :  { %v305_v36 = vadd.f32 %v304_v34, %v303_v32  ;;  %347 = vmatpush.bf16.msra.mxu3 %v1739_v42  ;;  %v720_v32 = vld [vmem:[#allocation2] sm:$0x1]  ;;  %v740_v34 = vld [vmem:[#allocation2 + $0x8] sm:$0x1] }
 0x225   :  { %690 = vmatpush.bf16.msra.mxu2 %v1761_v30  ;;  %v721_v35 = vunpack.c.l.bf16 %v720_v32  ;;  %v1775_v32 = vld [vmem:[#allocation2 + $0x80] sm:$0xff] }
 0x226   :  { %v306_v37 = vrot.slane %v305_v36, 1 }
 0x228   :  { %v307_v39 = vadd.f32 %v306_v37, %v305_v36  ;;  %348 = vmatpush.bf16.msra.mxu3 %v1738_v43  ;;  %v1759_v36 = vld [vmem:[#allocation2 + $0x168] sm:$0xff]  ;;  %v736_v37 = vld [vmem:[#allocation2 + $0x10] sm:$0x1] }
 0x229   :  { %v737_v42 = vunpack.c.l.bf16 %v736_v37 }
 0x22a   :  { %v315_v40 = vmul.f32 %v1928_v38, %v307_v39  ;;  %v741_v39 = vunpack.c.l.bf16 %v740_v34  ;;  %v1773_v34 = vld [vmem:[#allocation2 + $0x70] sm:$0xff] }
 0x22b   :  { %v738_v50 = vperm.slane %v737_v42, 0 }
 0x22c   :  { %v320_v41 = vpack.c.bf16 %v315_v40, %v315_v40  ;;  %v733_v40 = vperm.slane %v721_v35, 1 }
 0x22e   :  { %324 = vrot.lane.b32.xlu0 %v320_v41, %s1878_s21  ;;  %v727_v41 = vperm.slane %v721_v35, 0  ;;  %v1772_v35 = vld [vmem:[#allocation2 + $0x68] sm:$0xff] }
 0x236   :  { %375 = vrot.lane.b32.xlu0 %v30_v49, %s1879_s24 }
 0x268   :  { %v275_v44 = vpop.xlane.xlu2 %274 }
 0x269   :  { %1823 = vrcp.f32 %v275_v44  ;;  %v746_v44 = vperm.slane %v741_v39, 0 }
 0x26f   :  { %v1824_v45 = vpop.eup %1823 }
 0x270   :  { %v277_v46 = vmul.f32 %v1824_v45, %v1820_v15  ;;  %v731_v43 = vpop.permute.xlu2 %730 }
 0x272   :  { %v278_v47 = vpack.c.bf16 %v277_v46, %v277_v46  ;;  %v744_v46 = vpop.permute.xlu1 %743 }
 0x273   :  { %v747_v52 = vmul.f32 %v746_v44, %v744_v46  ;;  %v811_v44 = vld [vmem:[#allocation2 + $0x60] sm:$0x1] }
 0x274   :  { %1446 = vmatmul.msk.bf16.vlgmr.msrb.gmra.mxu3 %vm266_vm2, %v278_v47  ;;  %v734_v47 = vmul.f32 %v733_v40, %v731_v43  ;;  %v812_v46 = vunpack.c.l.bf16 %v811_v44 }
 0x275   :  { %479 = vmatpush.bf16.msrb.mxu3 %v1745_v17 }
 0x279   :  { %480 = vmatpush.bf16.msrb.mxu3 %v1744_v23 }
 0x2a0   :  { %v325_v51 = vpop.permute.xlu0 %324 }
 0x2a1   :  { %1455 = vmatmul.msk.bf16.vlgmr.msra.gmra.mxu3 %vm245_vm1, %v325_v51 }
 0x2a2   :  { %792 = vmatpush.bf16.msra.mxu3 %v1767_v24 }
 0x2a8   :  { %v376_v14 = vpop.permute.xlu0 %375 }
 0x2f7   :  { %v296_v53 = vpop.f32.mrf.mxu3 }
 0x2f8   :  { %v388_v54 = vpack.c.bf16 %v296_v53, %v296_v53 }
 0x2fa   :  { %1473 = vmatmul.msk.bf16.vlgmr.msrb.gmra.mxu2 %vm245_vm1, %v388_v54 }
 0x2ff   :  { %v298_v55 = vpop.f32.mrf.mxu3 }
 0x324   :  { %v350_v58 = vpop.f32.mrf.mxu3 }
 0x325   :  { %v351_v59 = vadd.f32 %v350_v58, %v322_v57  ;;  %v1758_v57 = vld [vmem:[#allocation2 + $0x160] sm:$0xff]  ;;  %v1751_v58 = vld [vmem:[#allocation2 + $0x118] sm:$0xff] }
 0x326   :  { %550 = vmatpush.bf16.msrb.mxu0 %v1751_v58  ;;  %v908_v58 = vld [vmem:[#allocation2 + $0x90] sm:$0x1] }
 0x327   :  { %v354_v60 = vsub.f32 0.0, %v351_v59 }
 0x329   :  { %v355_v61 = vmul.f32 1.442695, %v354_v60  ;;  %v1749_v60 = vld [vmem:[#allocation2 + $0x108] sm:$0xff] }
 0x32b   :  { %1825 = vpow2.f32 %v355_v61  ;;  %v1748_v61 = vld [vmem:[#allocation2 + $0x100] sm:$0xff] }
 0x32c   :  { %v352_v62 = vpop.f32.mrf.mxu3 }
 0x32d   :  { %v1747_v62 = vld [vmem:[#allocation2 + $0xf8] sm:$0xff] }
 0x331   :  { %v1826_v63 = vpop.eup %1825 }
 0x332   :  { %v357_v0 = vadd.f32 1.0, %v1826_v63  ;;  %v1746_v63 = vld [vmem:[#allocation2 + $0xf0] sm:$0xff] }
 0x334   :  { %1827 = vrcp.f32 %v357_v0  ;;  %v369_v5 = vand.u32 2147483648, %v357_v0  ;;  %v367_v7 = vand.u32 2147483647, %v357_v0  ;;  %vm363_vm7 = vweird.f32 %v357_v0 }
 0x336   :  { %v370_v9 = vor.u32 1.1754944e-38, %v369_v5  ;;  %vm368_vm9 = vcmp.eq.f32.partialorder %v367_v7, 8.507059e+37  ;;  %v1769_v5 = vld [vmem:[#allocation2 + $0x48] sm:$0xff] }
 0x33a   :  { %v1828_v1 = vpop.eup %1827 }
 0x33b   :  { %v359_v3 = vmul.f32 %v1828_v1, %v357_v0  ;;  %vm364_vm6 = vweird.f32 %v1828_v1 }
 0x33c   :  { %vm365_vm8 = vmor %vm363_vm7, %vm364_vm6 }
 0x33d   :  { %v360_v4 = vsub.f32 1.0, %v359_v3  ;;  %v1771_v3 = vld [vmem:[#allocation2 + $0x58] sm:$0xff] }
 0x33f   :  { %v361_v6 = vmul.f32 %v1828_v1, %v360_v4  ;;  %v1770_v4 = vld [vmem:[#allocation2 + $0x50] sm:$0xff] }
 0x341   :  { %v362_v8 = vadd.f32 %v1828_v1, %v361_v6  ;;  %v1768_v6 = vld [vmem:[#allocation2 + $0x40] sm:$0xff] }
 0x343   :  { %v366_v10 = vsel %vm365_vm8, %v1828_v1, %v362_v8  ;;  %v487_v8 = vld [vmem:[#allocation2 + $0xe8] sm:$0x1] }
 0x344   :  { %v371_v12 = vsel %vm368_vm9, %v370_v9, %v366_v10  ;;  %v1757_v9 = vld [vmem:[#allocation2 + $0x150] sm:$0xff] }
 0x345   :  { %v372_v13 = vmul.f32 0.9, %v371_v12  ;;  %v488_v12 = vunpack.c.l.bf16 %v487_v8  ;;  %619 = vmatpush.bf16.msra.mxu1 %v1757_v9 }
 0x347   :  { %v373_v15 = vadd.f32 0.1, %v372_v13  ;;  %v1756_v13 = vld [vmem:[#allocation2 + $0x148] sm:$0xff] }
 0x349   :  { %v378_v16 = vmul.f32 %v376_v14, %v373_v15  ;;  %620 = vmatpush.bf16.msra.mxu1 %v1756_v13 }
 0x34b   :  { %380 = vrot.lane.b32.xlu0 %v378_v16, %s1878_s21  ;;  %v489_v16 = vperm.slane %v488_v12, 0 }
 0x34d   :  { %621 = vmatpush.bf16.msra.mxu1 %v1755_v18 }
 0x353   :  { %456 = vrot.lane.b32.xlu0 %v1911_v48, %s1878_s21  ;;  %v1766_v48 = vld [vmem:[#allocation2 + $0x28] sm:$0xff] }
 0x354   :  { %793 = vmatpush.bf16.msra.mxu3 %v1766_v48 }
 0x35b   :  { %724 = vperm.xlu0 %1816, %v1921_v11   ;;  %v1765_v11 = vld [vmem:[#allocation2 + $0x20] sm:$0xff] }
 0x35c   :  { %794 = vmatpush.bf16.msra.mxu3 %v1765_v11  ;;  %v758_v11 = vld [vmem:[#allocation2 + $0x38] sm:$0x1] }
 0x360   :  { %795 = vmatpush.bf16.msra.mxu3 %v1764_v25  ;;  %v759_v25 = vunpack.c.l.bf16 %v758_v11 }
 0x362   :  { %v760_v26 = vperm.slane %v759_v25, 0 }
 0x363   :  { %912 = vperm.xlu0 %1816, %v1559_v22  }
 0x36b   :  { %1818 = vset.pattern.permute.xlu0 %v1876_v2  ;;  %v1760_v2 = vld [vmem:[#allocation2 + $0x170] sm:$0xff] }
 0x36c   :  { %918 = vperm.xlu0 %1818, %v1559_v22   ;;  %691 = vmatpush.bf16.msra.mxu2 %v1760_v2  ;;  %v1754_v22 = vld [vmem:[#allocation2 + $0x138] sm:$0xff]  ;;  %v1752_v2 = vld [vmem:[#allocation2 + $0x128] sm:$0xff] }
 0x36d   :  { %622 = vmatpush.bf16.msra.mxu1 %v1754_v22 }
 0x370   :  { %692 = vmatpush.bf16.msra.mxu2 %v1759_v36  ;;  %v505_v36 = vld [vmem:[#allocation2 + $0x120] sm:$0x1] }
 0x371   :  { %v506_v37 = vunpack.c.l.bf16 %v505_v36  ;;  %v1560_v36 = vld [vmem:[%s2000_s0 + $0x28] sm:$0xff] }
 0x373   :  { %v507_v39 = vperm.slane %v506_v37, 0 }
 0x374   :  { %693 = vmatpush.bf16.msra.mxu2 %v1758_v57  ;;  %1052 = vrot.lane.b32.xlu0 %v1560_v36, %s1879_s24 }
 0x37d   :  { %v1943_v19 = vpop.f32.mrf.mxu2 }
 0x385   :  { %v449_v20 = vpop.f32.mrf.mxu2 }
 0x3bd   :  { %v381_v28 = vpop.permute.xlu0 %380 }
 0x3be   :  { %v383_v29 = vadd.f32 %v381_v28, %v351_v59  ;;  %v1750_v59 = vld [vmem:[#allocation2 + $0x110] sm:$0xff] }
 0x3bf   :  { %551 = vmatpush.bf16.msrb.mxu0 %v1750_v59 }
 0x3c0   :  { %v393_v31 = vpack.c.bf16 %v383_v29, %v383_v29 }
 0x3c2   :  { %1464 = vmatmul.msk.bf16.vlgmr.msrb.gmra.mxu1 %vm245_vm1, %v393_v31  ;;  %v1753_v31 = vld [vmem:[#allocation2 + $0x130] sm:$0xff] }
 0x3c3   :  { %552 = vmatpush.bf16.msrb.mxu0 %v1749_v60  ;;  %623 = vmatpush.bf16.msra.mxu1 %v1753_v31  ;;  %v909_v60 = vunpack.c.l.bf16 %v908_v58  ;;  %v1776_v31 = vld [vmem:[#allocation2 + $0xa0] sm:$0xff]  ;;  %v998_v58 = vld [vmem:[#allocation2 + $0xb0] sm:$0x1] }
 0x3c5   :  { %v457_v33 = vpop.permute.xlu0 %456 }
 0x3c6   :  { %1482 = vmatmul.msk.bf16.vlgmr.msrb.gmra.mxu3 %vm245_vm1, %v457_v33  ;;  %v1774_v33 = vld [vmem:[#allocation2 + $0x78] sm:$0xff] }
 0x3c7   :  { %553 = vmatpush.bf16.msrb.mxu0 %v1748_v61  ;;  %624 = vmatpush.bf16.msra.mxu1 %v1752_v2  ;;  %v644_v2 = vld [vmem:[#allocation2 + $0x190] sm:$0x1] }
 0x3cb   :  { %554 = vmatpush.bf16.msrb.mxu0 %v1747_v62  ;;  %898 = vmatpush.bf16.msrb.mxu1 %v1775_v32  ;;  %v645_v32 = vunpack.c.l.bf16 %v644_v2 }
 0x3cd   :  { %v725_v45 = vpop.permute.xlu0 %724 }
 0x3ce   :  { %v728_v49 = vmul.f32 %v727_v41, %v725_v45 }
 0x3cf   :  { %555 = vmatpush.bf16.msrb.mxu0 %v1746_v63  ;;  %899 = vmatpush.bf16.msrb.mxu1 %v1774_v33  ;;  %v915_v63 = vperm.slane %v909_v60, 0  ;;  %v646_v33 = vperm.slane %v645_v32, 0 }
 0x3d0   :  { %v735_v51 = vadd.f32 %v734_v47, %v728_v49  ;;  %v813_v47 = vperm.slane %v812_v46, 0 }
 0x3d2   :  { %v739_v53 = vadd.f32 %v738_v50, %v735_v51 }
 0x3d3   :  { %845 = vmatpush.bf16.msra.mxu0 %v1771_v3  ;;  %900 = vmatpush.bf16.msrb.mxu1 %v1773_v34  ;;  %v924_v3 = vld [vmem:[#allocation2 + $0x98] sm:$0x1] }
 0x3d4   :  { %v748_v54 = vadd.f32 %v747_v52, %v739_v53  ;;  %v929_v55 = vpack.c.bf16 %v739_v53, %v739_v53  ;;  %v925_v8 = vunpack.c.l.bf16 %v924_v3 }
 0x3d6   :  { %v757_v56 = vpack.c.bf16 %v748_v54, %v748_v54  ;;  %931 = vrot.lane.b32.xlu2 %v929_v55, %s1872_s14  ;;  %v575_v54 = vld [vmem:[#allocation2 + $0x158] sm:$0x1]  ;;  %v926_v12 = vperm.slane %v925_v8, 0 }
 0x3d7   :  { %846 = vmatpush.bf16.msra.mxu0 %v1770_v4  ;;  %901 = vmatpush.bf16.msrb.mxu1 %v1772_v35  ;;  %v576_v55 = vunpack.c.l.bf16 %v575_v54 }
 0x3d8   :  { %1577 = vmatmul.msk.bf16.vlgmr.msra.gmra.mxu3 %vm96_vm0, %v757_v56  ;;  %v913_v56 = vpop.permute.xlu0 %912 }
 0x3d9   :  { %v577_v57 = vperm.slane %v576_v55, 0 }
 0x3db   :  { %847 = vmatpush.bf16.msra.mxu0 %v1769_v5  ;;  %v864_v5 = vld [vmem:[#allocation2 + $0x88] sm:$0x1] }
 0x3df   :  { %848 = vmatpush.bf16.msra.mxu0 %v1768_v6 }
 0x3e0   :  { %v919_v4 = vpop.permute.xlu0 %918 }
 0x430   :  { %v932_v0 = vpop.permute.xlu2 %931 }
 0x431   :  { %v937_v1 = vsel %vm245_vm1, %v932_v0, 0  ;;  %v921_v0 = vperm.slane %v909_v60, 1 }
 0x432   :  { %946 = vmatpush.bf16.xpose.msrb.mxu2 %v937_v1 }
 0x433   :  { %v922_v9 = vmul.f32 %v921_v0, %v919_v4 }
 0x43f   :  { %v418_v7 = vpop.f32.mrf.mxu1 }
 0x440   :  { %v422_v10 = vperm.slane %v418_v7, 0  ;;  %v916_v7 = vmul.f32 %v915_v63, %v913_v56 }
 0x442   :  { %v448_v15 = vadd.f32 %v1943_v19, %v422_v10  ;;  %v865_v10 = vunpack.c.l.bf16 %v864_v5  ;;  %v923_v13 = vadd.f32 %v922_v9, %v916_v7 }
 0x447   :  { %v420_v14 = vpop.f32.mrf.mxu1 }
 0x448   :  { %v866_v14 = vperm.slane %v865_v10, 0 }
 0x449   :  { %v482_v17 = vpop.f32.mrf.mxu3 }
 0x44a   :  { %v486_v20 = vadd.f32 %v482_v17, %v448_v15 }
 0x44c   :  { %v490_v21 = vadd.f32 %v489_v16, %v486_v20  ;;  %v927_v16 = vadd.f32 %v926_v12, %v923_v13 }
 0x44e   :  { %v491_v23 = vmax.f32 %v490_v21, 0.0  ;;  %v1960_v20 = vpack.c.bf16 %v927_v16, %v927_v16 }
 0x450   :  { %v504_v24 = vpack.c.bf16 %v491_v23, %v491_v23 }
 0x451   :  { %v484_v48 = vpop.f32.mrf.mxu3 }
 0x452   :  { %1507 = vmatmul.msk.bf16.vlgmr.msrb.gmra.mxu0 %vm544_vm10, %v504_v24 }
 0x45b   :  { %v797_v27 = vpop.f32.mrf.mxu3 }
 0x45c   :  { %v798_v19 = vadd.f32 %v797_v27, %v760_v26 }
 0x45e   :  { %v801_v28 = vmax.f32 %v798_v19, 0.0 }
 0x460   :  { %v810_v29 = vpack.c.bf16 %v801_v28, %v801_v28 }
 0x462   :  { %1594 = vmatmul.msk.bf16.vlgmr.msra.gmra.mxu0 %vm96_vm0, %v810_v29 }
 0x463   :  { %v799_v30 = vpop.f32.mrf.mxu3 }
 0x464   :  { %v1777_v30 = vld [vmem:[#allocation2 + $0xa8] sm:$0xff] }
 0x465   :  { %1024 = vmatpush.bf16.msrb.mxu0 %v1777_v30 }
 0x469   :  { %1025 = vmatpush.bf16.msrb.mxu0 %v1776_v31  ;;  %v1778_v31 = vld [vmem:[#allocation2 + $0xb8] sm:$0xff] }
 0x4cf   :  { %v557_v40 = vpop.f32.mrf.mxu0 }
 0x4d0   :  { %v558_v41 = vadd.f32 %v557_v40, %v507_v39 }
 0x4d2   :  { %v561_v42 = vmax.f32 %v558_v41, 0.0 }
 0x4d4   :  { %v574_v43 = vpack.c.bf16 %v561_v42, %v561_v42 }
 0x4d6   :  { %1532 = vmatmul.msk.bf16.vlgmr.msra.gmra.mxu1 %vm544_vm10, %v574_v43 }
 0x4d7   :  { %v559_v45 = vpop.f32.mrf.mxu0 }
 0x4df   :  { %v850_v49 = vpop.f32.mrf.mxu0 }
 0x4e0   :  { %v851_v50 = vadd.f32 %v850_v49, %v813_v47  ;;  %v699_v47 = vlaneseq }
 0x4e2   :  { %v854_v51 = vmax.f32 %v851_v50, 0.0 }
 0x4e4   :  { %v863_v52 = vpack.c.bf16 %v854_v51, %v854_v51 }
 0x4e6   :  { %1611 = vmatmul.msk.bf16.vlgmr.msrb.gmra.mxu1 %vm96_vm0, %v863_v52 }
 0x4e7   :  { %v852_v53 = vpop.f32.mrf.mxu0 }
 0x4e8   :  { %v1974_v53 = vand.u32 127, %v699_v47  ;;  %v1784_v47 = vld [vmem:[#allocation2 + $0xf0] sm:$0xff] }
 0x4ea   :  { %vm701_vm11 = vcmp.eq.s32.totalorder %v1974_v53, 0 }
 0x553   :  { %v626_v59 = vpop.f32.mrf.mxu1 }
 0x554   :  { %v627_v61 = vadd.f32 %v626_v59, %v577_v57 }
 0x556   :  { %v630_v62 = vmax.f32 %v627_v61, 0.0  ;;  %v999_v61 = vunpack.c.l.bf16 %v998_v58 }
 0x558   :  { %v643_v1 = vpack.c.bf16 %v630_v62, %v630_v62 }
 0x55a   :  { %1557 = vmatmul.msk.bf16.vlgmr.msra.gmra.mxu2 %vm544_vm10, %v643_v1 }
 0x55b   :  { %v628_v6 = vpop.f32.mrf.mxu1 }
 0x563   :  { %v903_v15 = vpop.f32.mrf.mxu1 }
 0x564   :  { %v904_v17 = vadd.f32 %v903_v15, %v866_v14 }
 0x566   :  { %v907_v18 = vmax.f32 %v904_v17, 0.0 }
 0x568   :  { %v965_v21 = vpack.c.bf16 %v907_v18, %v907_v18  ;;  %v985_v22 = vsel %vm300_vm3, %v907_v18, 0.0 }
 0x569   :  { %v986_v23 = vrot.slane %v985_v22, 4 }
 0x56a   :  { %1612 = vmatmul.msk.bf16.vlgmr.msrb.gmra.mxu2 %vm245_vm1, %v1960_v20  ;;  %v970_v24 = vsel %vm283_vm4, %v965_v21, 0 }
 0x56b   :  { %v987_v48 = vadd.f32 %v986_v23, %v985_v22  ;;  %v905_v11 = vpop.f32.mrf.mxu1  ;;  %979 = vmatpush.bf16.msrb.mxu3 %v970_v24  ;;  %v1053_v23 = vpop.permute.xlu0 %1052 }
 0x56c   :  { %v1781_v11 = vld [vmem:[#allocation2 + $0xd0] sm:$0xff] }
 0x56d   :  { %v988_v25 = vrot.slane %v987_v48, 2  ;;  %1092 = vmatpush.bf16.msra.mxu1 %v1781_v11 }
 0x56f   :  { %v989_v26 = vadd.f32 %v988_v25, %v987_v48  ;;  %v1780_v25 = vld [vmem:[#allocation2 + $0xc8] sm:$0xff] }
 0x571   :  { %v990_v27 = vrot.slane %v989_v26, 1  ;;  %1093 = vmatpush.bf16.msra.mxu1 %v1780_v25 }
 0x573   :  { %v991_v19 = vadd.f32 %v990_v27, %v989_v26  ;;  %v1783_v26 = vld [vmem:[#allocation2 + $0xe0] sm:$0xff] }
 0x574   :  { %1156 = vmatpush.bf16.msra.mxu3 %v1783_v26 }
 0x575   :  { %v992_v28 = vmul.f32 %v991_v19, %v1928_v38  ;;  %v1782_v19 = vld [vmem:[#allocation2 + $0xd8] sm:$0xff] }
 0x577   :  { %v997_v29 = vpack.c.bf16 %v992_v28, %v992_v28 }
 0x578   :  { %1157 = vmatpush.bf16.msra.mxu3 %v1782_v19 }
 0x579   :  { %1001 = vrot.lane.b32.xlu1 %v997_v29, %s1878_s21  ;;  %v1779_v29 = vld [vmem:[#allocation2 + $0xc0] sm:$0xff] }
 0x57a   :  { %1121 = vmatpush.bf16.msra.mxu2 %v1779_v29 }
 0x57e   :  { %1122 = vmatpush.bf16.msra.mxu2 %v1778_v31 }
 0x5dd   :  { %v695_v34 = vpop.f32.mrf.mxu2 }
 0x5de   :  { %v696_v35 = vadd.f32 %v695_v34, %v646_v33 }
 0x5e0   :  { %v703_v37 = vand.u32 2147483647, %v696_v35  ;;  %v702_v51 = vmax.f32 %v696_v35, 0.0 }
 0x5e2   :  { %v704_v38 = vsub.f32 0.0, %v703_v37  ;;  %v1789_v37 = vld [vmem:[#allocation2 + $0x118] sm:$0xff] }
 0x5e3   :  { %1226 = vmatpush.bf16.msra.mxu0 %v1789_v37 }
 0x5e4   :  { %v705_v39 = vmul.f32 1.442695, %v704_v38  ;;  %v1788_v38 = vld [vmem:[#allocation2 + $0x110] sm:$0xff] }
 0x5e5   :  { %v697_v40 = vpop.f32.mrf.mxu2 }
 0x5e6   :  { %1829 = vpow2.f32 %v705_v39  ;;  %v1787_v40 = vld [vmem:[#allocation2 + $0x108] sm:$0xff] }
 0x5e7   :  { %1227 = vmatpush.bf16.msra.mxu0 %v1788_v38 }
 0x5eb   :  { %v1002_v41 = vpop.permute.xlu1 %1001  ;;  %1228 = vmatpush.bf16.msra.mxu0 %v1787_v40 }
 0x5ec   :  { %v1830_v42 = vpop.eup %1829  ;;  %1622 = vmatmul.msk.bf16.vlgmr.msrb.gmra.mxu0 %vm245_vm1, %v1002_v41 }
 0x5ed   :  { %v707_v43 = vadd.f32 1.0, %v1830_v42  ;;  %v948_v44 = vpop.f32.mrf.mxu2 }
 0x5ee   :  { %v952_v45 = vmul.f32 0.17677669, %v948_v44 }
 0x5ef   :  { %1831 = vlog2.f32 %v707_v43 }
 0x5f0   :  { %v953_v46 = vsel %vm266_vm2, %v952_v45, -inf }
 0x5f1   :  { %954 = vmax.xlane.f32.xlu2 %v953_v46  ;;  %v1785_v46 = vld [vmem:[#allocation2 + $0xf8] sm:$0xff] }
 0x5f5   :  { %v1832_v49 = vpop.eup %1831  ;;  %v950_v50 = vpop.f32.mrf.mxu2 }
 0x5f6   :  { %v709_v52 = vmul.f32 0.6931472, %v1832_v49  ;;  %v1795_v49 = vld [vmem:[#allocation2 + $0x150] sm:$0xff]  ;;  %v1794_v50 = vld [vmem:[#allocation2 + $0x148] sm:$0xff] }
 0x5f7   :  { %1295 = vmatpush.bf16.msrb.mxu1 %v1795_v49 }
 0x5f8   :  { %v710_v54 = vadd.f32 %v709_v52, %v702_v51  ;;  %v1793_v51 = vld [vmem:[#allocation2 + $0x140] sm:$0xff]  ;;  %v1792_v52 = vld [vmem:[#allocation2 + $0x138] sm:$0xff] }
 0x5fa   :  { %v711_v55 = vmul.f32 0.9, %v710_v54  ;;  %v1164_v54 = vld [vmem:[#allocation2 + $0xe8] sm:$0x1] }
 0x5fb   :  { %1296 = vmatpush.bf16.msrb.mxu1 %v1794_v50 }
 0x5fc   :  { %v712_v56 = vadd.f32 0.1, %v711_v55  ;;  %v1165_v55 = vunpack.c.l.bf16 %v1164_v54 }
 0x5fe   :  { %v713_v57 = vsel %vm701_vm11, %v696_v35, %v712_v56 }
 0x5ff   :  { %715 = vst.msk [vmem:[%s2002_s2] sm:$0xff] %vm714_vm12, %v713_v57  ;;  %1297 = vmatpush.bf16.msrb.mxu1 %v1793_v51 }
 0x603   :  { %1298 = vmatpush.bf16.msrb.mxu1 %v1792_v52 }
 0x664   :  { %v955_v59 = vpop.xlane.xlu2 %954 }
 0x665   :  { %v956_v60 = vsub.f32 %v952_v45, %v955_v59  ;;  %v1786_v45 = vld [vmem:[#allocation2 + $0x100] sm:$0xff]  ;;  %v1166_v59 = vperm.slane %v1165_v55, 0 }
 0x666   :  { %1229 = vmatpush.bf16.msra.mxu0 %v1786_v45 }
 0x667   :  { %v957_v62 = vmul.f32 1.442695, %v956_v60 }
 0x669   :  { %1833 = vpow2.f32 %v957_v62  ;;  %v1027_v63 = vpop.f32.mrf.mxu0 }
 0x66a   :  { %v1028_v0 = vadd.f32 %v1027_v63, %v999_v61  ;;  %1230 = vmatpush.bf16.msra.mxu0 %v1785_v46 }
 0x66c   :  { %v1031_v1 = vsub.f32 0.0, %v1028_v0 }
 0x66e   :  { %v1032_v3 = vmul.f32 1.442695, %v1031_v1  ;;  %1231 = vmatpush.bf16.msra.mxu0 %v1784_v47  ;;  %v1791_v1 = vld [vmem:[#allocation2 + $0x130] sm:$0xff] }
 0x66f   :  { %v1834_v4 = vpop.eup %1833  ;;  %1299 = vmatpush.bf16.msrb.mxu1 %v1791_v1 }
 0x670   :  { %1835 = vpow2.f32 %v1032_v3  ;;  %v959_v5 = vsel %vm266_vm2, %v1834_v4, 0.0  ;;  %v1790_v3 = vld [vmem:[#allocation2 + $0x128] sm:$0xff] }
 0x671   :  { %v1029_v6 = vpop.f32.mrf.mxu0  ;;  %960 = vadd.xlane.f32.xlu1 %v959_v5  ;;  %v1800_v5 = vld [vmem:[#allocation2 + $0x180] sm:$0xff] }
 0x672   :  { %v1799_v6 = vld [vmem:[#allocation2 + $0x178] sm:$0xff] }
 0x673   :  { %1300 = vmatpush.bf16.msrb.mxu1 %v1790_v3 }
 0x676   :  { %v1836_v7 = vpop.eup %1835 }
 0x677   :  { %v1034_v8 = vadd.f32 1.0, %v1836_v7  ;;  %v1798_v7 = vld [vmem:[#allocation2 + $0x170] sm:$0xff] }
 0x679   :  { %1837 = vrcp.f32 %v1034_v8  ;;  %v1046_v13 = vand.u32 2147483648, %v1034_v8  ;;  %v1044_v15 = vand.u32 2147483647, %v1034_v8  ;;  %vm1040_vm14 = vweird.f32 %v1034_v8 }
 0x67b   :  { %v1047_v17 = vor.u32 1.1754944e-38, %v1046_v13  ;;  %vm1045_vm0 = vcmp.eq.f32.partialorder %v1044_v15, 8.507059e+37 }
 0x67f   :  { %v1838_v9 = vpop.eup %1837 }
 0x680   :  { %v1036_v10 = vmul.f32 %v1838_v9, %v1034_v8  ;;  %vm1041_vm13 = vweird.f32 %v1838_v9  ;;  %v1182_v8 = vld [vmem:[#allocation2 + $0x120] sm:$0x1] }
 0x681   :  { %vm1042_vm15 = vmor %vm1040_vm14, %vm1041_vm13 }
 0x682   :  { %v1037_v12 = vsub.f32 1.0, %v1036_v10 }
 0x684   :  { %v1038_v14 = vmul.f32 %v1838_v9, %v1037_v12 }
 0x686   :  { %v1039_v16 = vadd.f32 %v1838_v9, %v1038_v14 }
 0x688   :  { %v1043_v18 = vsel %vm1042_vm15, %v1838_v9, %v1039_v16  ;;  %v1183_v9 = vunpack.c.l.bf16 %v1182_v8 }
 0x689   :  { %v1048_v21 = vsel %vm1045_vm0, %v1047_v17, %v1043_v18  ;;  %v1797_v17 = vld [vmem:[#allocation2 + $0x168] sm:$0xff]  ;;  %v1796_v18 = vld [vmem:[#allocation2 + $0x160] sm:$0xff] }
 0x68a   :  { %v1049_v22 = vmul.f32 0.9, %v1048_v21  ;;  %v1184_v10 = vperm.slane %v1183_v9, 0  ;;  %v1251_v21 = vld [vmem:[#allocation2 + $0x158] sm:$0x1] }
 0x68c   :  { %v1050_v24 = vadd.f32 0.1, %v1049_v22  ;;  %v1252_v22 = vunpack.c.l.bf16 %v1251_v21 }
 0x68e   :  { %v1055_v48 = vmul.f32 %v1053_v23, %v1050_v24  ;;  %v1253_v23 = vperm.slane %v1252_v22, 0 }
 0x690   :  { %1057 = vrot.lane.b32.xlu0 %v1055_v48, %s1878_s21 }
 0x698   :  { %1133 = vrot.lane.b32.xlu0 %v1960_v20, %s1878_s21 }
 0x6e4   :  { %v961_v27 = vpop.xlane.xlu1 %960 }
 0x6e5   :  { %1839 = vrcp.f32 %v961_v27  ;;  %v1320_v27 = vld [vmem:[#allocation2 + $0x190] sm:$0x1] }
 0x6e6   :  { %v1321_v19 = vunpack.c.l.bf16 %v1320_v27 }
 0x6eb   :  { %v1840_v28 = vpop.eup %1839 }
 0x6ec   :  { %v963_v30 = vmul.f32 %v1840_v28, %v1834_v4  ;;  %v1801_v4 = vld [vmem:[#allocation2 + $0x188] sm:$0xff]  ;;  %v1322_v28 = vperm.slane %v1321_v19, 0 }
 0x6ed   :  { %1364 = vmatpush.bf16.msrb.mxu2 %v1801_v4 }
 0x6ee   :  { %v964_v2 = vpack.c.bf16 %v963_v30, %v963_v30 }
 0x6f0   :  { %1613 = vmatmul.msk.bf16.vlgmr.msrb.gmra.mxu3 %vm266_vm2, %v964_v2 }
 0x6f1   :  { %1365 = vmatpush.bf16.msrb.mxu2 %v1800_v5 }
 0x6f5   :  { %1366 = vmatpush.bf16.msrb.mxu2 %v1799_v6 }
 0x6f9   :  { %1367 = vmatpush.bf16.msrb.mxu2 %v1798_v7 }
 0x6fd   :  { %1368 = vmatpush.bf16.msrb.mxu2 %v1797_v17 }
 0x701   :  { %1369 = vmatpush.bf16.msrb.mxu2 %v1796_v18 }
 0x702   :  { %v1058_v20 = vpop.permute.xlu0 %1057 }
 0x703   :  { %v1060_v32 = vadd.f32 %v1058_v20, %v1028_v0 }
 0x705   :  { %v1070_v33 = vpack.c.bf16 %v1060_v32, %v1060_v32 }
 0x707   :  { %1631 = vmatmul.msk.bf16.vlgmr.msra.gmra.mxu1 %vm245_vm1, %v1070_v33 }
 0x70a   :  { %v1134_v34 = vpop.permute.xlu0 %1133 }
 0x70b   :  { %1649 = vmatmul.msk.bf16.vlgmr.msra.gmra.mxu3 %vm245_vm1, %v1134_v34 }
 0x773   :  { %v981_v35 = vpop.f32.mrf.mxu3 }
 0x774   :  { %v1065_v36 = vpack.c.bf16 %v981_v35, %v981_v35 }
 0x776   :  { %1640 = vmatmul.msk.bf16.vlgmr.msra.gmra.mxu2 %vm245_vm1, %v1065_v36 }
 0x77b   :  { %v983_v39 = vpop.f32.mrf.mxu3 }
 0x784   :  { %v1095_v41 = vpop.f32.mrf.mxu1 }
 0x785   :  { %v1099_v56 = vperm.slane %v1095_v41, 0 }
 0x78c   :  { %v1097_v42 = vpop.f32.mrf.mxu1 }
 0x78e   :  { %v1159_v43 = vpop.f32.mrf.mxu3 }
 0x796   :  { %v1161_v44 = vpop.f32.mrf.mxu3 }
 0x7f9   :  { %v1124_v57 = vpop.f32.mrf.mxu2 }
 0x7fa   :  { %v1125_v58 = vadd.f32 %v1124_v57, %v1099_v56 }
 0x7fc   :  { %v1163_v60 = vadd.f32 %v1159_v43, %v1125_v58 }
 0x7fe   :  { %v1167_v61 = vadd.f32 %v1166_v59, %v1163_v60 }
 0x800   :  { %v1168_v62 = vmax.f32 %v1167_v61, 0.0 }
 0x801   :  { %v1126_v63 = vpop.f32.mrf.mxu2 }
 0x802   :  { %v1181_v0 = vpack.c.bf16 %v1168_v62, %v1168_v62 }
 0x804   :  { %1674 = vmatmul.msk.bf16.vlgmr.msra.gmra.mxu0 %vm544_vm10, %v1181_v0 }
 0x881   :  { %v1233_v12 = vpop.f32.mrf.mxu0 }
 0x882   :  { %v1234_v13 = vadd.f32 %v1233_v12, %v1184_v10 }
 0x884   :  { %v1237_v14 = vmax.f32 %v1234_v13, 0.0 }
 0x886   :  { %v1250_v15 = vpack.c.bf16 %v1237_v14, %v1237_v14 }
 0x888   :  { %1699 = vmatmul.msk.bf16.vlgmr.msrb.gmra.mxu1 %vm544_vm10, %v1250_v15 }
 0x889   :  { %v1235_v16 = vpop.f32.mrf.mxu0 }
 0x905   :  { %v1302_v24 = vpop.f32.mrf.mxu1 }
 0x906   :  { %v1303_v48 = vadd.f32 %v1302_v24, %v1253_v23 }
 0x908   :  { %v1306_v11 = vmax.f32 %v1303_v48, 0.0 }
 0x90a   :  { %v1319_v25 = vpack.c.bf16 %v1306_v11, %v1306_v11 }
 0x90c   :  { %1724 = vmatmul.msk.bf16.vlgmr.msrb.gmra.mxu2 %vm544_vm10, %v1319_v25 }
 0x90d   :  { %v1304_v26 = vpop.f32.mrf.mxu1 }
 0x98f   :  { %v1371_v29 = vpop.f32.mrf.mxu2 }
 0x990   :  { %v1372_v30 = vadd.f32 %v1371_v29, %v1322_v28 }
 0x992   :  { %v1376_v31 = vand.u32 2147483647, %v1372_v30  ;;  %v1375_v36 = vmax.f32 %v1372_v30, 0.0 }
 0x994   :  { %v1377_v2 = vsub.f32 0.0, %v1376_v31 }
 0x996   :  { %v1378_v20 = vmul.f32 1.442695, %v1377_v2 }
 0x997   :  { %v1373_v32 = vpop.f32.mrf.mxu2 }
 0x998   :  { %1841 = vpow2.f32 %v1378_v20 }
 0x99e   :  { %v1842_v33 = vpop.eup %1841 }
 0x99f   :  { %v1380_v34 = vadd.f32 1.0, %v1842_v33 }
 0x9a1   :  { %1843 = vlog2.f32 %v1380_v34 }
 0x9a7   :  { %v1844_v35 = vpop.eup %1843 }
 0x9a8   :  { %v1382_v37 = vmul.f32 0.6931472, %v1844_v35 }
 0x9aa   :  { %v1383_v38 = vadd.f32 %v1382_v37, %v1375_v36 }
 0x9ac   :  { %v1384_v39 = vmul.f32 0.9, %v1383_v38 }
 0x9ae   :  { %v1385_v40 = vadd.f32 0.1, %v1384_v39 }
 0x9b0   :  { %v1386_v41 = vsel %vm701_vm11, %v1372_v30, %v1385_v40 }
 0x9b1   :  { %1725 = vst.msk [vmem:[%s2002_s2 + $0x8] sm:$0xff] %vm714_vm12, %v1386_v41 }
 0x9b2   :  { %1393 = vsyncpa [#allocation3], 1 }

// kernel: forward.1
= control target key start
LH: loop header
LB: loop body
LE: loop exit
PB: predicated region body
PF: predicated region fallthrough
CT: control target
= control target key end

     0   :  { %7 = vsyncpa [#allocation3], 0  ;;  %s1871_s12 = smov [#allocation2]   ;;  %s1872_s14 = smov 64   ;;  %s2000_s0 = inlined_call_operand.vmem [shape: f32[2,24,128], index: 0, kind: input, shape index: {}]   ;;  %s2001_s1 = inlined_call_operand.hbm [shape: bf16[816,128], index: 1, kind: input, shape index: {}]   ;;  %s2002_s2 = inlined_call_operand.vmem [shape: f32[2,8,2], index: 2, kind: output, shape index: {}]  }
   0x1   :  { %s14_s11 = sshll.u32 %s2001_s1, 4  ;;  %s16_s13 = sshll.u32 %s1871_s12, 4  ;;  %s15_s11 = int_to_ptr.hbm [resolvable:$true] %s14_s11  ;;  %s17_s13 = int_to_ptr.vmem [resolvable:$true] %s16_s13 }
   0x2   :  { %s1873_s15 = smov 4  }
   0x3   :  { %22 = dma.hbm_to_vmem [thread:$0]  %s15_s11, 6528, %s17_s13, [#allocation3], %s1872_s14, %s1872_s14, %s1873_s15  }
   0x4   :  { %1869 = dma.done.wait [#allocation3], 6528  }
   0x5   :  { %1870 = vsyncadd [#allocation3], 4294960768  ;;  %v1874_v0 = vmov 0   ;;  %v1875_v1 = vmov 2   ;;  %v1876_v2 = vmov 1   ;;  %v28_v3 = vld [vmem:[%s2000_s0] sm:$0xff] }
   0x6   :  { %1811 = vset.pattern.permute.xlu0 %v1874_v0  ;;  %1813 = vset.pattern.permute.xlu1 %v1875_v1  ;;  %v29_v4 = vld [vmem:[%s2000_s0 + $0x8] sm:$0xff]  ;;  %v1729_v5 = vld [vmem:[#allocation2 + $0x30] sm:$0xff]  ;;  %v1727_v7 = vld [vmem:[#allocation2 + $0x20] sm:$0xff]  ;;  %vm96_vm0 = vcmask 523264   ;;  %vm245_vm1 = vcmask 261120   ;;  %vm266_vm2 = vcmask 64512  }
   0x7   :  { %1815 = vset.pattern.permute.xlu2 %v1876_v2  ;;  %35 = vperm.xlu0 %1811, %v28_v3   ;;  %v1728_v6 = vld [vmem:[#allocation2 + $0x28] sm:$0xff]  ;;  %v1726_v8 = vld [vmem:[#allocation2 + $0x18] sm:$0xff]  ;;  %v31_v9 = vld [vmem:[#allocation2] sm:$0x1]  ;;  %vm300_vm3 = vcmask 523520   ;;  %vm283_vm4 = vcmask 1043456  }
   0x8   :  { %54 = vperm.xlu1 %1813, %v28_v3   ;;  %230 = vperm.xlu2 %1815, %v29_v4   ;;  %v51_v11 = vld [vmem:[#allocation2 + $0x8] sm:$0x1]  ;;  %v32_v12 = vunpack.c.l.bf16 %v31_v9  ;;  %v47_v13 = vld [vmem:[#allocation2 + $0x10] sm:$0x1]  ;;  %v1733_v30 = vld [vmem:[#allocation2 + $0x58] sm:$0xff]  ;;  %s1878_s21 = smov 96  }
   0x9   :  { %104 = vmatpush.bf16.msra.mxu0 %v1729_v5  ;;  %v52_v14 = vunpack.c.l.bf16 %v51_v11  ;;  %v48_v17 = vunpack.c.l.bf16 %v47_v13  ;;  %157 = vmatpush.bf16.msra.mxu1 %v1733_v30  ;;  %v1732_v31 = vld [vmem:[#allocation2 + $0x50] sm:$0xff]  ;;  %v236_v38 = vld [vmem:[#allocation2 + $0x98] sm:$0x1]  ;;  %v1731_v47 = vld [vmem:[#allocation2 + $0x48] sm:$0xff]  ;;  %s1879_s24 = smov 32   ;;  %vm544_vm10 = vcmask 785408  }
   0xa   :  { %v38_v15 = vperm.slane %v32_v12, 0  ;;  %v44_v16 = vperm.slane %v32_v12, 1  ;;  %v220_v32 = vld [vmem:[#allocation2 + $0x90] sm:$0x1]  ;;  %v237_v41 = vunpack.c.l.bf16 %v236_v38  ;;  %v1730_v49 = vld [vmem:[#allocation2 + $0x40] sm:$0xff]  ;;  %v1736_v59 = vld [vmem:[#allocation2 + $0x78] sm:$0xff] }
   0xb   :  { %v57_v18 = vperm.slane %v52_v14, 0  ;;  %v49_v23 = vperm.slane %v48_v17, 0  ;;  %v221_v33 = vunpack.c.l.bf16 %v220_v32  ;;  %v69_v50 = vld [vmem:[#allocation2 + $0x38] sm:$0x1]  ;;  %v1737_v58 = vld [vmem:[#allocation2 + $0x80] sm:$0xff]  ;;  %v1735_v60 = vld [vmem:[#allocation2 + $0x70] sm:$0xff] }
   0xc   :  { %v238_v43 = vperm.slane %v237_v41, 0  ;;  %v70_v51 = vunpack.c.l.bf16 %v69_v50  ;;  %210 = vmatpush.bf16.msra.mxu2 %v1737_v58  ;;  %v1734_v61 = vld [vmem:[#allocation2 + $0x68] sm:$0xff]  ;;  %v1921_v11 = vld [vmem:[%s2000_s0 + $0x18] sm:$0xff]  ;;  %v1741_v50 = vld [vmem:[#allocation2 + $0xc0] sm:$0xff]  ;;  %vm714_vm12 = vcmask 15360  }
   0xd   :  { %105 = vmatpush.bf16.msra.mxu0 %v1728_v6  ;;  %158 = vmatpush.bf16.msra.mxu1 %v1732_v31  ;;  %v233_v34 = vperm.slane %v221_v33, 1  ;;  %v227_v35 = vperm.slane %v221_v33, 0  ;;  %v176_v17 = vld [vmem:[#allocation2 + $0x88] sm:$0x1] }
   0xe   :  { %v71_v52 = vperm.slane %v70_v51, 0 }
   0xf   :  { %1812 = vset.pattern.permute.xlu0 %v1876_v2 }
  0x10   :  { %1814 = vset.pattern.permute.xlu1 %v1874_v0  ;;  %41 = vperm.xlu0 %1812, %v28_v3   ;;  %v123_v3 = vld [vmem:[#allocation2 + $0x60] sm:$0x1] }
  0x11   :  { %224 = vperm.xlu1 %1814, %v29_v4   ;;  %106 = vmatpush.bf16.msra.mxu0 %v1727_v7  ;;  %v124_v4 = vunpack.c.l.bf16 %v123_v3 }
  0x12   :  { %159 = vmatpush.bf16.msra.mxu1 %v1731_v47  ;;  %211 = vmatpush.bf16.msra.mxu2 %v1736_v59 }
  0x13   :  { %v125_v5 = vperm.slane %v124_v4, 0 }
  0x15   :  { %107 = vmatpush.bf16.msra.mxu0 %v1726_v8 }
  0x16   :  { %160 = vmatpush.bf16.msra.mxu1 %v1730_v49  ;;  %212 = vmatpush.bf16.msra.mxu2 %v1735_v60  ;;  %v30_v49 = vld [vmem:[%s2000_s0 + $0x10] sm:$0xff] }
  0x18   :  { %1816 = vset.pattern.permute.xlu0 %v1874_v0 }
  0x19   :  { %1817 = vset.pattern.permute.xlu1 %v1875_v1 }
  0x1a   :  { %213 = vmatpush.bf16.msra.mxu2 %v1734_v61 }
  0x1e   :  { %444 = vmatpush.bf16.msrb.mxu2 %v1741_v50 }
  0x62   :  { %v231_v36 = vpop.permute.xlu2 %230 }
  0x63   :  { %v234_v39 = vmul.f32 %v233_v34, %v231_v36 }
  0x79   :  { %v36_v10 = vpop.permute.xlu0 %35 }
  0x7a   :  { %v55_v20 = vpop.permute.xlu1 %54  ;;  %v39_v21 = vmul.f32 %v38_v15, %v36_v10 }
  0x7b   :  { %v58_v25 = vmul.f32 %v57_v18, %v55_v20  ;;  %v1877_v18 = vmov 8.0  }
  0x82   :  { %v42_v19 = vpop.permute.xlu0 %41 }
  0x83   :  { %v45_v22 = vmul.f32 %v44_v16, %v42_v19  ;;  %v225_v37 = vpop.permute.xlu1 %224  ;;  %v177_v19 = vunpack.c.l.bf16 %v176_v17  ;;  %v1745_v17 = vld [vmem:[#allocation2 + $0xe0] sm:$0xff] }
  0x84   :  { %v228_v40 = vmul.f32 %v227_v35, %v225_v37 }
  0x85   :  { %v46_v24 = vadd.f32 %v45_v22, %v39_v21  ;;  %v178_v21 = vperm.slane %v177_v19, 0 }
  0x86   :  { %v235_v42 = vadd.f32 %v234_v39, %v228_v40 }
  0x87   :  { %v50_v26 = vadd.f32 %v49_v23, %v46_v24 }
  0x88   :  { %v239_v46 = vadd.f32 %v238_v43, %v235_v42  ;;  %v1739_v42 = vld [vmem:[#allocation2 + $0xa8] sm:$0xff]  ;;  %v1738_v43 = vld [vmem:[#allocation2 + $0xa0] sm:$0xff] }
  0x89   :  { %v59_v27 = vadd.f32 %v58_v25, %v50_v26  ;;  %v241_v28 = vpack.c.bf16 %v50_v26, %v50_v26 }
  0x8a   :  { %v1911_v48 = vpack.c.bf16 %v239_v46, %v239_v46 }
  0x8b   :  { %v68_v29 = vpack.c.bf16 %v59_v27, %v59_v27  ;;  %243 = vrot.lane.b32.xlu2 %v241_v28, %s1872_s14 }
  0x8d   :  { %1410 = vmatmul.msk.bf16.vlgmr.msra.gmra.mxu0 %vm96_vm0, %v68_v29 }
  0xe5   :  { %v244_v44 = vpop.permute.xlu2 %243 }
  0xe6   :  { %v250_v45 = vsel %vm245_vm1, %v244_v44, 0 }
  0xe7   :  { %259 = vmatpush.bf16.xpose.msra.mxu3 %v250_v45 }
  0xee   :  { %1445 = vmatmul.msk.bf16.vlgmr.msra.gmra.mxu3 %vm245_vm1, %v1911_v48 }
 0x10a   :  { %v109_v53 = vpop.f32.mrf.mxu0 }
 0x10b   :  { %v110_v54 = vadd.f32 %v109_v53, %v71_v52  ;;  %v1740_v52 = vld [vmem:[#allocation2 + $0xb8] sm:$0xff] }
 0x10c   :  { %445 = vmatpush.bf16.msrb.mxu2 %v1740_v52 }
 0x10d   :  { %v113_v55 = vmax.f32 %v110_v54, 0.0 }
 0x10f   :  { %v122_v56 = vpack.c.bf16 %v113_v55, %v113_v55 }
 0x111   :  { %1427 = vmatmul.msk.bf16.vlgmr.msra.gmra.mxu1 %vm96_vm0, %v122_v56  ;;  %v321_v56 = vld [vmem:[#allocation2 + $0xb0] sm:$0x1] }
 0x112   :  { %v111_v57 = vpop.f32.mrf.mxu0 }
 0x113   :  { %v322_v57 = vunpack.c.l.bf16 %v321_v56 }
 0x171   :  { %v261_v62 = vpop.f32.mrf.mxu3 }
 0x172   :  { %v265_v63 = vmul.f32 0.17677669, %v261_v62 }
 0x174   :  { %v267_v0 = vsel %vm266_vm2, %v265_v63, -inf }
 0x175   :  { %268 = vmax.xlane.f32.xlu1 %v267_v0 }
 0x179   :  { %v263_v1 = vpop.f32.mrf.mxu3 }
 0x18e   :  { %v162_v6 = vpop.f32.mrf.mxu1  ;;  %743 = vperm.xlu1 %1817, %v1921_v11  }
 0x18f   :  { %v163_v7 = vadd.f32 %v162_v6, %v125_v5 }
 0x191   :  { %v166_v8 = vmax.f32 %v163_v7, 0.0 }
 0x193   :  { %v175_v9 = vpack.c.bf16 %v166_v8, %v166_v8 }
 0x195   :  { %1444 = vmatmul.msk.bf16.vlgmr.msra.gmra.mxu2 %vm96_vm0, %v175_v9 }
 0x196   :  { %v164_v10 = vpop.f32.mrf.mxu1 }
 0x1e8   :  { %v269_v12 = vpop.xlane.xlu1 %268 }
 0x1e9   :  { %v270_v13 = vsub.f32 %v265_v63, %v269_v12 }
 0x1eb   :  { %v271_v14 = vmul.f32 1.442695, %v270_v13 }
 0x1ed   :  { %1819 = vpow2.f32 %v271_v14 }
 0x1ee   :  { %1821 = vrcp.f32 %v1877_v18  ;;  %v1743_v18 = vld [vmem:[#allocation2 + $0xd0] sm:$0xff] }
 0x1ef   :  { %415 = vmatpush.bf16.msrb.mxu1 %v1743_v18  ;;  %v1755_v18 = vld [vmem:[#allocation2 + $0x140] sm:$0xff] }
 0x1f3   :  { %v1820_v15 = vpop.eup %1819 }
 0x1f4   :  { %v273_v16 = vsel %vm266_vm2, %v1820_v15, 0.0  ;;  %v1822_v20 = vpop.eup %1821 }
 0x1f5   :  { %274 = vadd.xlane.f32.xlu2 %v273_v16  ;;  %v309_v22 = vmul.f32 8.0, %v1822_v20  ;;  %vm313_vm5 = vweird.f32 %v1822_v20 }
 0x1f7   :  { %v310_v26 = vsub.f32 1.0, %v309_v22  ;;  %v1559_v22 = vld [vmem:[%s2000_s0 + $0x20] sm:$0xff] }
 0x1f9   :  { %v311_v31 = vmul.f32 %v1822_v20, %v310_v26  ;;  %v1763_v26 = vld [vmem:[#allocation2 + $0x188] sm:$0xff] }
 0x1fa   :  { %688 = vmatpush.bf16.msra.mxu2 %v1763_v26 }
 0x1fb   :  { %v312_v35 = vadd.f32 %v1822_v20, %v311_v31 }
 0x1fd   :  { %v1928_v38 = vsel %vm313_vm5, %v1822_v20, %v312_v35 }
 0x20d   :  { %730 = vperm.xlu2 %1815, %v1921_v11  }
 0x218   :  { %v215_v23 = vpop.f32.mrf.mxu2 }
 0x219   :  { %v216_v24 = vadd.f32 %v215_v23, %v178_v21  ;;  %v1742_v21 = vld [vmem:[#allocation2 + $0xc8] sm:$0xff]  ;;  %v1744_v23 = vld [vmem:[#allocation2 + $0xd8] sm:$0xff] }
 0x21a   :  { %416 = vmatpush.bf16.msrb.mxu1 %v1742_v21 }
 0x21b   :  { %v219_v25 = vmax.f32 %v216_v24, 0.0  ;;  %v1767_v24 = vld [vmem:[#allocation2 + $0x30] sm:$0xff] }
 0x21d   :  { %v301_v27 = vsel %vm300_vm3, %v219_v25, 0.0  ;;  %v279_v28 = vpack.c.bf16 %v219_v25, %v219_v25  ;;  %v1764_v25 = vld [vmem:[#allocation2 + $0x18] sm:$0xff] }
 0x21e   :  { %v302_v29 = vrot.slane %v301_v27, 4 }
 0x21f   :  { %v285_v30 = vsel %vm283_vm4, %v279_v28, 0 }
 0x220   :  { %v303_v32 = vadd.f32 %v302_v29, %v301_v27  ;;  %v217_v33 = vpop.f32.mrf.mxu2  ;;  %294 = vmatpush.bf16.msrb.mxu3 %v285_v30  ;;  %v1762_v27 = vld [vmem:[#allocation2 + $0x180] sm:$0xff]  ;;  %v1761_v30 = vld [vmem:[#allocation2 + $0x178] sm:$0xff] }
 0x221   :  { %689 = vmatpush.bf16.msra.mxu2 %v1762_v27 }
 0x222   :  { %v304_v34 = vrot.slane %v303_v32, 2 }
 0x224   :  { %v305_v36 = vadd.f32 %v304_v34, %v303_v32  ;;  %347 = vmatpush.bf16.msra.mxu3 %v1739_v42  ;;  %v720_v32 = vld [vmem:[#allocation2] sm:$0x1]  ;;  %v740_v34 = vld [vmem:[#allocation2 + $0x8] sm:$0x1] }
 0x225   :  { %690 = vmatpush.bf16.msra.mxu2 %v1761_v30  ;;  %v721_v35 = vunpack.c.l.bf16 %v720_v32  ;;  %v1775_v32 = vld [vmem:[#allocation2 + $0x80] sm:$0xff] }
 0x226   :  { %v306_v37 = vrot.slane %v305_v36, 1 }
 0x228   :  { %v307_v39 = vadd.f32 %v306_v37, %v305_v36  ;;  %348 = vmatpush.bf16.msra.mxu3 %v1738_v43  ;;  %v1759_v36 = vld [vmem:[#allocation2 + $0x168] sm:$0xff]  ;;  %v736_v37 = vld [vmem:[#allocation2 + $0x10] sm:$0x1] }
 0x229   :  { %v737_v42 = vunpack.c.l.bf16 %v736_v37 }
 0x22a   :  { %v315_v40 = vmul.f32 %v1928_v38, %v307_v39  ;;  %v741_v39 = vunpack.c.l.bf16 %v740_v34  ;;  %v1773_v34 = vld [vmem:[#allocation2 + $0x70] sm:$0xff] }
 0x22b   :  { %v738_v50 = vperm.slane %v737_v42, 0 }
 0x22c   :  { %v320_v41 = vpack.c.bf16 %v315_v40, %v315_v40  ;;  %v733_v40 = vperm.slane %v721_v35, 1 }
 0x22e   :  { %324 = vrot.lane.b32.xlu0 %v320_v41, %s1878_s21  ;;  %v727_v41 = vperm.slane %v721_v35, 0  ;;  %v1772_v35 = vld [vmem:[#allocation2 + $0x68] sm:$0xff] }
 0x236   :  { %375 = vrot.lane.b32.xlu0 %v30_v49, %s1879_s24 }
 0x268   :  { %v275_v44 = vpop.xlane.xlu2 %274 }
 0x269   :  { %1823 = vrcp.f32 %v275_v44  ;;  %v746_v44 = vperm.slane %v741_v39, 0 }
 0x26f   :  { %v1824_v45 = vpop.eup %1823 }
 0x270   :  { %v277_v46 = vmul.f32 %v1824_v45, %v1820_v15  ;;  %v731_v43 = vpop.permute.xlu2 %730 }
 0x272   :  { %v278_v47 = vpack.c.bf16 %v277_v46, %v277_v46  ;;  %v744_v46 = vpop.permute.xlu1 %743 }
 0x273   :  { %v747_v52 = vmul.f32 %v746_v44, %v744_v46  ;;  %v811_v44 = vld [vmem:[#allocation2 + $0x60] sm:$0x1] }
 0x274   :  { %1446 = vmatmul.msk.bf16.vlgmr.msrb.gmra.mxu3 %vm266_vm2, %v278_v47  ;;  %v734_v47 = vmul.f32 %v733_v40, %v731_v43  ;;  %v812_v46 = vunpack.c.l.bf16 %v811_v44 }
 0x275   :  { %479 = vmatpush.bf16.msrb.mxu3 %v1745_v17 }
 0x279   :  { %480 = vmatpush.bf16.msrb.mxu3 %v1744_v23 }
 0x2a0   :  { %v325_v51 = vpop.permute.xlu0 %324 }
 0x2a1   :  { %1455 = vmatmul.msk.bf16.vlgmr.msra.gmra.mxu3 %vm245_vm1, %v325_v51 }
 0x2a2   :  { %792 = vmatpush.bf16.msra.mxu3 %v1767_v24 }
 0x2a8   :  { %v376_v14 = vpop.permute.xlu0 %375 }
 0x2f7   :  { %v296_v53 = vpop.f32.mrf.mxu3 }
 0x2f8   :  { %v388_v54 = vpack.c.bf16 %v296_v53, %v296_v53 }
 0x2fa   :  { %1473 = vmatmul.msk.bf16.vlgmr.msrb.gmra.mxu2 %vm245_vm1, %v388_v54 }
 0x2ff   :  { %v298_v55 = vpop.f32.mrf.mxu3 }
 0x324   :  { %v350_v58 = vpop.f32.mrf.mxu3 }
 0x325   :  { %v351_v59 = vadd.f32 %v350_v58, %v322_v57  ;;  %v1758_v57 = vld [vmem:[#allocation2 + $0x160] sm:$0xff]  ;;  %v1751_v58 = vld [vmem:[#allocation2 + $0x118] sm:$0xff] }
 0x326   :  { %550 = vmatpush.bf16.msrb.mxu0 %v1751_v58  ;;  %v908_v58 = vld [vmem:[#allocation2 + $0x90] sm:$0x1] }
 0x327   :  { %v354_v60 = vsub.f32 0.0, %v351_v59 }
 0x329   :  { %v355_v61 = vmul.f32 1.442695, %v354_v60  ;;  %v1749_v60 = vld [vmem:[#allocation2 + $0x108] sm:$0xff] }
 0x32b   :  { %1825 = vpow2.f32 %v355_v61  ;;  %v1748_v61 = vld [vmem:[#allocation2 + $0x100] sm:$0xff] }
 0x32c   :  { %v352_v62 = vpop.f32.mrf.mxu3 }
 0x32d   :  { %v1747_v62 = vld [vmem:[#allocation2 + $0xf8] sm:$0xff] }
 0x331   :  { %v1826_v63 = vpop.eup %1825 }
 0x332   :  { %v357_v0 = vadd.f32 1.0, %v1826_v63  ;;  %v1746_v63 = vld [vmem:[#allocation2 + $0xf0] sm:$0xff] }
 0x334   :  { %1827 = vrcp.f32 %v357_v0  ;;  %v369_v5 = vand.u32 2147483648, %v357_v0  ;;  %v367_v7 = vand.u32 2147483647, %v357_v0  ;;  %vm363_vm7 = vweird.f32 %v357_v0 }
 0x336   :  { %v370_v9 = vor.u32 1.1754944e-38, %v369_v5  ;;  %vm368_vm9 = vcmp.eq.f32.partialorder %v367_v7, 8.507059e+37  ;;  %v1769_v5 = vld [vmem:[#allocation2 + $0x48] sm:$0xff] }
 0x33a   :  { %v1828_v1 = vpop.eup %1827 }
 0x33b   :  { %v359_v3 = vmul.f32 %v1828_v1, %v357_v0  ;;  %vm364_vm6 = vweird.f32 %v1828_v1 }
 0x33c   :  { %vm365_vm8 = vmor %vm363_vm7, %vm364_vm6 }
 0x33d   :  { %v360_v4 = vsub.f32 1.0, %v359_v3  ;;  %v1771_v3 = vld [vmem:[#allocation2 + $0x58] sm:$0xff] }
 0x33f   :  { %v361_v6 = vmul.f32 %v1828_v1, %v360_v4  ;;  %v1770_v4 = vld [vmem:[#allocation2 + $0x50] sm:$0xff] }
 0x341   :  { %v362_v8 = vadd.f32 %v1828_v1, %v361_v6  ;;  %v1768_v6 = vld [vmem:[#allocation2 + $0x40] sm:$0xff] }
 0x343   :  { %v366_v10 = vsel %vm365_vm8, %v1828_v1, %v362_v8  ;;  %v487_v8 = vld [vmem:[#allocation2 + $0xe8] sm:$0x1] }
 0x344   :  { %v371_v12 = vsel %vm368_vm9, %v370_v9, %v366_v10  ;;  %v1757_v9 = vld [vmem:[#allocation2 + $0x150] sm:$0xff] }
 0x345   :  { %v372_v13 = vmul.f32 0.9, %v371_v12  ;;  %v488_v12 = vunpack.c.l.bf16 %v487_v8  ;;  %619 = vmatpush.bf16.msra.mxu1 %v1757_v9 }
 0x347   :  { %v373_v15 = vadd.f32 0.1, %v372_v13  ;;  %v1756_v13 = vld [vmem:[#allocation2 + $0x148] sm:$0xff] }
 0x349   :  { %v378_v16 = vmul.f32 %v376_v14, %v373_v15  ;;  %620 = vmatpush.bf16.msra.mxu1 %v1756_v13 }
 0x34b   :  { %380 = vrot.lane.b32.xlu0 %v378_v16, %s1878_s21  ;;  %v489_v16 = vperm.slane %v488_v12, 0 }
 0x34d   :  { %621 = vmatpush.bf16.msra.mxu1 %v1755_v18 }
 0x353   :  { %456 = vrot.lane.b32.xlu0 %v1911_v48, %s1878_s21  ;;  %v1766_v48 = vld [vmem:[#allocation2 + $0x28] sm:$0xff] }
 0x354   :  { %793 = vmatpush.bf16.msra.mxu3 %v1766_v48 }
 0x35b   :  { %724 = vperm.xlu0 %1816, %v1921_v11   ;;  %v1765_v11 = vld [vmem:[#allocation2 + $0x20] sm:$0xff] }
 0x35c   :  { %794 = vmatpush.bf16.msra.mxu3 %v1765_v11  ;;  %v758_v11 = vld [vmem:[#allocation2 + $0x38] sm:$0x1] }
 0x360   :  { %795 = vmatpush.bf16.msra.mxu3 %v1764_v25  ;;  %v759_v25 = vunpack.c.l.bf16 %v758_v11 }
 0x362   :  { %v760_v26 = vperm.slane %v759_v25, 0 }
 0x363   :  { %912 = vperm.xlu0 %1816, %v1559_v22  }
 0x36b   :  { %1818 = vset.pattern.permute.xlu0 %v1876_v2  ;;  %v1760_v2 = vld [vmem:[#allocation2 + $0x170] sm:$0xff] }
 0x36c   :  { %918 = vperm.xlu0 %1818, %v1559_v22   ;;  %691 = vmatpush.bf16.msra.mxu2 %v1760_v2  ;;  %v1754_v22 = vld [vmem:[#allocation2 + $0x138] sm:$0xff]  ;;  %v1752_v2 = vld [vmem:[#allocation2 + $0x128] sm:$0xff] }
 0x36d   :  { %622 = vmatpush.bf16.msra.mxu1 %v1754_v22 }
 0x370   :  { %692 = vmatpush.bf16.msra.mxu2 %v1759_v36  ;;  %v505_v36 = vld [vmem:[#allocation2 + $0x120] sm:$0x1] }
 0x371   :  { %v506_v37 = vunpack.c.l.bf16 %v505_v36  ;;  %v1560_v36 = vld [vmem:[%s2000_s0 + $0x28] sm:$0xff] }
 0x373   :  { %v507_v39 = vperm.slane %v506_v37, 0 }
 0x374   :  { %693 = vmatpush.bf16.msra.mxu2 %v1758_v57  ;;  %1052 = vrot.lane.b32.xlu0 %v1560_v36, %s1879_s24 }
 0x37d   :  { %v1943_v19 = vpop.f32.mrf.mxu2 }
 0x385   :  { %v449_v20 = vpop.f32.mrf.mxu2 }
 0x3bd   :  { %v381_v28 = vpop.permute.xlu0 %380 }
 0x3be   :  { %v383_v29 = vadd.f32 %v381_v28, %v351_v59  ;;  %v1750_v59 = vld [vmem:[#allocation2 + $0x110] sm:$0xff] }
 0x3bf   :  { %551 = vmatpush.bf16.msrb.mxu0 %v1750_v59 }
 0x3c0   :  { %v393_v31 = vpack.c.bf16 %v383_v29, %v383_v29 }
 0x3c2   :  { %1464 = vmatmul.msk.bf16.vlgmr.msrb.gmra.mxu1 %vm245_vm1, %v393_v31  ;;  %v1753_v31 = vld [vmem:[#allocation2 + $0x130] sm:$0xff] }
 0x3c3   :  { %552 = vmatpush.bf16.msrb.mxu0 %v1749_v60  ;;  %623 = vmatpush.bf16.msra.mxu1 %v1753_v31  ;;  %v909_v60 = vunpack.c.l.bf16 %v908_v58  ;;  %v1776_v31 = vld [vmem:[#allocation2 + $0xa0] sm:$0xff]  ;;  %v998_v58 = vld [vmem:[#allocation2 + $0xb0] sm:$0x1] }
 0x3c5   :  { %v457_v33 = vpop.permute.xlu0 %456 }
 0x3c6   :  { %1482 = vmatmul.msk.bf16.vlgmr.msrb.gmra.mxu3 %vm245_vm1, %v457_v33  ;;  %v1774_v33 = vld [vmem:[#allocation2 + $0x78] sm:$0xff] }
 0x3c7   :  { %553 = vmatpush.bf16.msrb.mxu0 %v1748_v61  ;;  %624 = vmatpush.bf16.msra.mxu1 %v1752_v2  ;;  %v644_v2 = vld [vmem:[#allocation2 + $0x190] sm:$0x1] }
 0x3cb   :  { %554 = vmatpush.bf16.msrb.mxu0 %v1747_v62  ;;  %898 = vmatpush.bf16.msrb.mxu1 %v1775_v32  ;;  %v645_v32 = vunpack.c.l.bf16 %v644_v2 }
 0x3cd   :  { %v725_v45 = vpop.permute.xlu0 %724 }
 0x3ce   :  { %v728_v49 = vmul.f32 %v727_v41, %v725_v45 }
 0x3cf   :  { %555 = vmatpush.bf16.msrb.mxu0 %v1746_v63  ;;  %899 = vmatpush.bf16.msrb.mxu1 %v1774_v33  ;;  %v915_v63 = vperm.slane %v909_v60, 0  ;;  %v646_v33 = vperm.slane %v645_v32, 0 }
 0x3d0   :  { %v735_v51 = vadd.f32 %v734_v47, %v728_v49  ;;  %v813_v47 = vperm.slane %v812_v46, 0 }
 0x3d2   :  { %v739_v53 = vadd.f32 %v738_v50, %v735_v51 }
 0x3d3   :  { %845 = vmatpush.bf16.msra.mxu0 %v1771_v3  ;;  %900 = vmatpush.bf16.msrb.mxu1 %v1773_v34  ;;  %v924_v3 = vld [vmem:[#allocation2 + $0x98] sm:$0x1] }
 0x3d4   :  { %v748_v54 = vadd.f32 %v747_v52, %v739_v53  ;;  %v929_v55 = vpack.c.bf16 %v739_v53, %v739_v53  ;;  %v925_v8 = vunpack.c.l.bf16 %v924_v3 }
 0x3d6   :  { %v757_v56 = vpack.c.bf16 %v748_v54, %v748_v54  ;;  %931 = vrot.lane.b32.xlu2 %v929_v55, %s1872_s14  ;;  %v575_v54 = vld [vmem:[#allocation2 + $0x158] sm:$0x1]  ;;  %v926_v12 = vperm.slane %v925_v8, 0 }
 0x3d7   :  { %846 = vmatpush.bf16.msra.mxu0 %v1770_v4  ;;  %901 = vmatpush.bf16.msrb.mxu1 %v1772_v35  ;;  %v576_v55 = vunpack.c.l.bf16 %v575_v54 }
 0x3d8   :  { %1577 = vmatmul.msk.bf16.vlgmr.msra.gmra.mxu3 %vm96_vm0, %v757_v56  ;;  %v913_v56 = vpop.permute.xlu0 %912 }
 0x3d9   :  { %v577_v57 = vperm.slane %v576_v55, 0 }
 0x3db   :  { %847 = vmatpush.bf16.msra.mxu0 %v1769_v5  ;;  %v864_v5 = vld [vmem:[#allocation2 + $0x88] sm:$0x1] }
 0x3df   :  { %848 = vmatpush.bf16.msra.mxu0 %v1768_v6 }
 0x3e0   :  { %v919_v4 = vpop.permute.xlu0 %918 }
 0x430   :  { %v932_v0 = vpop.permute.xlu2 %931 }
 0x431   :  { %v937_v1 = vsel %vm245_vm1, %v932_v0, 0  ;;  %v921_v0 = vperm.slane %v909_v60, 1 }
 0x432   :  { %946 = vmatpush.bf16.xpose.msrb.mxu2 %v937_v1 }
 0x433   :  { %v922_v9 = vmul.f32 %v921_v0, %v919_v4 }
 0x43f   :  { %v418_v7 = vpop.f32.mrf.mxu1 }
 0x440   :  { %v422_v10 = vperm.slane %v418_v7, 0  ;;  %v916_v7 = vmul.f32 %v915_v63, %v913_v56 }
 0x442   :  { %v448_v15 = vadd.f32 %v1943_v19, %v422_v10  ;;  %v865_v10 = vunpack.c.l.bf16 %v864_v5  ;;  %v923_v13 = vadd.f32 %v922_v9, %v916_v7 }
 0x447   :  { %v420_v14 = vpop.f32.mrf.mxu1 }
 0x448   :  { %v866_v14 = vperm.slane %v865_v10, 0 }
 0x449   :  { %v482_v17 = vpop.f32.mrf.mxu3 }
 0x44a   :  { %v486_v20 = vadd.f32 %v482_v17, %v448_v15 }
 0x44c   :  { %v490_v21 = vadd.f32 %v489_v16, %v486_v20  ;;  %v927_v16 = vadd.f32 %v926_v12, %v923_v13 }
 0x44e   :  { %v491_v23 = vmax.f32 %v490_v21, 0.0  ;;  %v1960_v20 = vpack.c.bf16 %v927_v16, %v927_v16 }
 0x450   :  { %v504_v24 = vpack.c.bf16 %v491_v23, %v491_v23 }
 0x451   :  { %v484_v48 = vpop.f32.mrf.mxu3 }
 0x452   :  { %1507 = vmatmul.msk.bf16.vlgmr.msrb.gmra.mxu0 %vm544_vm10, %v504_v24 }
 0x45b   :  { %v797_v27 = vpop.f32.mrf.mxu3 }
 0x45c   :  { %v798_v19 = vadd.f32 %v797_v27, %v760_v26 }
 0x45e   :  { %v801_v28 = vmax.f32 %v798_v19, 0.0 }
 0x460   :  { %v810_v29 = vpack.c.bf16 %v801_v28, %v801_v28 }
 0x462   :  { %1594 = vmatmul.msk.bf16.vlgmr.msra.gmra.mxu0 %vm96_vm0, %v810_v29 }
 0x463   :  { %v799_v30 = vpop.f32.mrf.mxu3 }
 0x464   :  { %v1777_v30 = vld [vmem:[#allocation2 + $0xa8] sm:$0xff] }
 0x465   :  { %1024 = vmatpush.bf16.msrb.mxu0 %v1777_v30 }
 0x469   :  { %1025 = vmatpush.bf16.msrb.mxu0 %v1776_v31  ;;  %v1778_v31 = vld [vmem:[#allocation2 + $0xb8] sm:$0xff] }
 0x4cf   :  { %v557_v40 = vpop.f32.mrf.mxu0 }
 0x4d0   :  { %v558_v41 = vadd.f32 %v557_v40, %v507_v39 }
 0x4d2   :  { %v561_v42 = vmax.f32 %v558_v41, 0.0 }
 0x4d4   :  { %v574_v43 = vpack.c.bf16 %v561_v42, %v561_v42 }
 0x4d6   :  { %1532 = vmatmul.msk.bf16.vlgmr.msra.gmra.mxu1 %vm544_vm10, %v574_v43 }
 0x4d7   :  { %v559_v45 = vpop.f32.mrf.mxu0 }
 0x4df   :  { %v850_v49 = vpop.f32.mrf.mxu0 }
 0x4e0   :  { %v851_v50 = vadd.f32 %v850_v49, %v813_v47  ;;  %v699_v47 = vlaneseq }
 0x4e2   :  { %v854_v51 = vmax.f32 %v851_v50, 0.0 }
 0x4e4   :  { %v863_v52 = vpack.c.bf16 %v854_v51, %v854_v51 }
 0x4e6   :  { %1611 = vmatmul.msk.bf16.vlgmr.msrb.gmra.mxu1 %vm96_vm0, %v863_v52 }
 0x4e7   :  { %v852_v53 = vpop.f32.mrf.mxu0 }
 0x4e8   :  { %v1974_v53 = vand.u32 127, %v699_v47  ;;  %v1784_v47 = vld [vmem:[#allocation2 + $0xf0] sm:$0xff] }
 0x4ea   :  { %vm701_vm11 = vcmp.eq.s32.totalorder %v1974_v53, 0 }
 0x553   :  { %v626_v59 = vpop.f32.mrf.mxu1 }
 0x554   :  { %v627_v61 = vadd.f32 %v626_v59, %v577_v57 }
 0x556   :  { %v630_v62 = vmax.f32 %v627_v61, 0.0  ;;  %v999_v61 = vunpack.c.l.bf16 %v998_v58 }
 0x558   :  { %v643_v1 = vpack.c.bf16 %v630_v62, %v630_v62 }
 0x55a   :  { %1557 = vmatmul.msk.bf16.vlgmr.msra.gmra.mxu2 %vm544_vm10, %v643_v1 }
 0x55b   :  { %v628_v6 = vpop.f32.mrf.mxu1 }
 0x563   :  { %v903_v15 = vpop.f32.mrf.mxu1 }
 0x564   :  { %v904_v17 = vadd.f32 %v903_v15, %v866_v14 }
 0x566   :  { %v907_v18 = vmax.f32 %v904_v17, 0.0 }
 0x568   :  { %v965_v21 = vpack.c.bf16 %v907_v18, %v907_v18  ;;  %v985_v22 = vsel %vm300_vm3, %v907_v18, 0.0 }
 0x569   :  { %v986_v23 = vrot.slane %v985_v22, 4 }
 0x56a   :  { %1612 = vmatmul.msk.bf16.vlgmr.msrb.gmra.mxu2 %vm245_vm1, %v1960_v20  ;;  %v970_v24 = vsel %vm283_vm4, %v965_v21, 0 }
 0x56b   :  { %v987_v48 = vadd.f32 %v986_v23, %v985_v22  ;;  %v905_v11 = vpop.f32.mrf.mxu1  ;;  %979 = vmatpush.bf16.msrb.mxu3 %v970_v24  ;;  %v1053_v23 = vpop.permute.xlu0 %1052 }
 0x56c   :  { %v1781_v11 = vld [vmem:[#allocation2 + $0xd0] sm:$0xff] }
 0x56d   :  { %v988_v25 = vrot.slane %v987_v48, 2  ;;  %1092 = vmatpush.bf16.msra.mxu1 %v1781_v11 }
 0x56f   :  { %v989_v26 = vadd.f32 %v988_v25, %v987_v48  ;;  %v1780_v25 = vld [vmem:[#allocation2 + $0xc8] sm:$0xff] }
 0x571   :  { %v990_v27 = vrot.slane %v989_v26, 1  ;;  %1093 = vmatpush.bf16.msra.mxu1 %v1780_v25 }
 0x573   :  { %v991_v19 = vadd.f32 %v990_v27, %v989_v26  ;;  %v1783_v26 = vld [vmem:[#allocation2 + $0xe0] sm:$0xff] }
 0x574   :  { %1156 = vmatpush.bf16.msra.mxu3 %v1783_v26 }
 0x575   :  { %v992_v28 = vmul.f32 %v991_v19, %v1928_v38  ;;  %v1782_v19 = vld [vmem:[#allocation2 + $0xd8] sm:$0xff] }
 0x577   :  { %v997_v29 = vpack.c.bf16 %v992_v28, %v992_v28 }
 0x578   :  { %1157 = vmatpush.bf16.msra.mxu3 %v1782_v19 }
 0x579   :  { %1001 = vrot.lane.b32.xlu1 %v997_v29, %s1878_s21  ;;  %v1779_v29 = vld [vmem:[#allocation2 + $0xc0] sm:$0xff] }
 0x57a   :  { %1121 = vmatpush.bf16.msra.mxu2 %v1779_v29 }
 0x57e   :  { %1122 = vmatpush.bf16.msra.mxu2 %v1778_v31 }
 0x5dd   :  { %v695_v34 = vpop.f32.mrf.mxu2 }
 0x5de   :  { %v696_v35 = vadd.f32 %v695_v34, %v646_v33 }
 0x5e0   :  { %v703_v37 = vand.u32 2147483647, %v696_v35  ;;  %v702_v51 = vmax.f32 %v696_v35, 0.0 }
 0x5e2   :  { %v704_v38 = vsub.f32 0.0, %v703_v37  ;;  %v1789_v37 = vld [vmem:[#allocation2 + $0x118] sm:$0xff] }
 0x5e3   :  { %1226 = vmatpush.bf16.msra.mxu0 %v1789_v37 }
 0x5e4   :  { %v705_v39 = vmul.f32 1.442695, %v704_v38  ;;  %v1788_v38 = vld [vmem:[#allocation2 + $0x110] sm:$0xff] }
 0x5e5   :  { %v697_v40 = vpop.f32.mrf.mxu2 }
 0x5e6   :  { %1829 = vpow2.f32 %v705_v39  ;;  %v1787_v40 = vld [vmem:[#allocation2 + $0x108] sm:$0xff] }
 0x5e7   :  { %1227 = vmatpush.bf16.msra.mxu0 %v1788_v38 }
 0x5eb   :  { %v1002_v41 = vpop.permute.xlu1 %1001  ;;  %1228 = vmatpush.bf16.msra.mxu0 %v1787_v40 }
 0x5ec   :  { %v1830_v42 = vpop.eup %1829  ;;  %1622 = vmatmul.msk.bf16.vlgmr.msrb.gmra.mxu0 %vm245_vm1, %v1002_v41 }
 0x5ed   :  { %v707_v43 = vadd.f32 1.0, %v1830_v42  ;;  %v948_v44 = vpop.f32.mrf.mxu2 }
 0x5ee   :  { %v952_v45 = vmul.f32 0.17677669, %v948_v44 }
 0x5ef   :  { %1831 = vlog2.f32 %v707_v43 }
 0x5f0   :  { %v953_v46 = vsel %vm266_vm2, %v952_v45, -inf }
 0x5f1   :  { %954 = vmax.xlane.f32.xlu2 %v953_v46  ;;  %v1785_v46 = vld [vmem:[#allocation2 + $0xf8] sm:$0xff] }
 0x5f5   :  { %v1832_v49 = vpop.eup %1831  ;;  %v950_v50 = vpop.f32.mrf.mxu2 }
 0x5f6   :  { %v709_v52 = vmul.f32 0.6931472, %v1832_v49  ;;  %v1795_v49 = vld [vmem:[#allocation2 + $0x150] sm:$0xff]  ;;  %v1794_v50 = vld [vmem:[#allocation2 + $0x148] sm:$0xff] }
 0x5f7   :  { %1295 = vmatpush.bf16.msrb.mxu1 %v1795_v49 }
 0x5f8   :  { %v710_v54 = vadd.f32 %v709_v52, %v702_v51  ;;  %v1793_v51 = vld [vmem:[#allocation2 + $0x140] sm:$0xff]  ;;  %v1792_v52 = vld [vmem:[#allocation2 + $0x138] sm:$0xff] }
 0x5fa   :  { %v711_v55 = vmul.f32 0.9, %v710_v54  ;;  %v1164_v54 = vld [vmem:[#allocation2 + $0xe8] sm:$0x1] }
 0x5fb   :  { %1296 = vmatpush.bf16.msrb.mxu1 %v1794_v50 }
 0x5fc   :  { %v712_v56 = vadd.f32 0.1, %v711_v55  ;;  %v1165_v55 = vunpack.c.l.bf16 %v1164_v54 }
 0x5fe   :  { %v713_v57 = vsel %vm701_vm11, %v696_v35, %v712_v56 }
 0x5ff   :  { %715 = vst.msk [vmem:[%s2002_s2] sm:$0xff] %vm714_vm12, %v713_v57  ;;  %1297 = vmatpush.bf16.msrb.mxu1 %v1793_v51 }
 0x603   :  { %1298 = vmatpush.bf16.msrb.mxu1 %v1792_v52 }
 0x664   :  { %v955_v59 = vpop.xlane.xlu2 %954 }
 0x665   :  { %v956_v60 = vsub.f32 %v952_v45, %v955_v59  ;;  %v1786_v45 = vld [vmem:[#allocation2 + $0x100] sm:$0xff]  ;;  %v1166_v59 = vperm.slane %v1165_v55, 0 }
 0x666   :  { %1229 = vmatpush.bf16.msra.mxu0 %v1786_v45 }
 0x667   :  { %v957_v62 = vmul.f32 1.442695, %v956_v60 }
 0x669   :  { %1833 = vpow2.f32 %v957_v62  ;;  %v1027_v63 = vpop.f32.mrf.mxu0 }
 0x66a   :  { %v1028_v0 = vadd.f32 %v1027_v63, %v999_v61  ;;  %1230 = vmatpush.bf16.msra.mxu0 %v1785_v46 }
 0x66c   :  { %v1031_v1 = vsub.f32 0.0, %v1028_v0 }
 0x66e   :  { %v1032_v3 = vmul.f32 1.442695, %v1031_v1  ;;  %1231 = vmatpush.bf16.msra.mxu0 %v1784_v47  ;;  %v1791_v1 = vld [vmem:[#allocation2 + $0x130] sm:$0xff] }
 0x66f   :  { %v1834_v4 = vpop.eup %1833  ;;  %1299 = vmatpush.bf16.msrb.mxu1 %v1791_v1 }
 0x670   :  { %1835 = vpow2.f32 %v1032_v3  ;;  %v959_v5 = vsel %vm266_vm2, %v1834_v4, 0.0  ;;  %v1790_v3 = vld [vmem:[#allocation2 + $0x128] sm:$0xff] }
 0x671   :  { %v1029_v6 = vpop.f32.mrf.mxu0  ;;  %960 = vadd.xlane.f32.xlu1 %v959_v5  ;;  %v1800_v5 = vld [vmem:[#allocation2 + $0x180] sm:$0xff] }
 0x672   :  { %v1799_v6 = vld [vmem:[#allocation2 + $0x178] sm:$0xff] }
 0x673   :  { %1300 = vmatpush.bf16.msrb.mxu1 %v1790_v3 }
 0x676   :  { %v1836_v7 = vpop.eup %1835 }
 0x677   :  { %v1034_v8 = vadd.f32 1.0, %v1836_v7  ;;  %v1798_v7 = vld [vmem:[#allocation2 + $0x170] sm:$0xff] }
 0x679   :  { %1837 = vrcp.f32 %v1034_v8  ;;  %v1046_v13 = vand.u32 2147483648, %v1034_v8  ;;  %v1044_v15 = vand.u32 2147483647, %v1034_v8  ;;  %vm1040_vm14 = vweird.f32 %v1034_v8 }
 0x67b   :  { %v1047_v17 = vor.u32 1.1754944e-38, %v1046_v13  ;;  %vm1045_vm0 = vcmp.eq.f32.partialorder %v1044_v15, 8.507059e+37 }
 0x67f   :  { %v1838_v9 = vpop.eup %1837 }
 0x680   :  { %v1036_v10 = vmul.f32 %v1838_v9, %v1034_v8  ;;  %vm1041_vm13 = vweird.f32 %v1838_v9  ;;  %v1182_v8 = vld [vmem:[#allocation2 + $0x120] sm:$0x1] }
 0x681   :  { %vm1042_vm15 = vmor %vm1040_vm14, %vm1041_vm13 }
 0x682   :  { %v1037_v12 = vsub.f32 1.0, %v1036_v10 }
 0x684   :  { %v1038_v14 = vmul.f32 %v1838_v9, %v1037_v12 }
 0x686   :  { %v1039_v16 = vadd.f32 %v1838_v9, %v1038_v14 }
 0x688   :  { %v1043_v18 = vsel %vm1042_vm15, %v1838_v9, %v1039_v16  ;;  %v1183_v9 = vunpack.c.l.bf16 %v1182_v8 }
 0x689   :  { %v1048_v21 = vsel %vm1045_vm0, %v1047_v17, %v1043_v18  ;;  %v1797_v17 = vld [vmem:[#allocation2 + $0x168] sm:$0xff]  ;;  %v1796_v18 = vld [vmem:[#allocation2 + $0x160] sm:$0xff] }
 0x68a   :  { %v1049_v22 = vmul.f32 0.9, %v1048_v21  ;;  %v1184_v10 = vperm.slane %v1183_v9, 0  ;;  %v1251_v21 = vld [vmem:[#allocation2 + $0x158] sm:$0x1] }
 0x68c   :  { %v1050_v24 = vadd.f32 0.1, %v1049_v22  ;;  %v1252_v22 = vunpack.c.l.bf16 %v1251_v21 }
 0x68e   :  { %v1055_v48 = vmul.f32 %v1053_v23, %v1050_v24  ;;  %v1253_v23 = vperm.slane %v1252_v22, 0 }
 0x690   :  { %1057 = vrot.lane.b32.xlu0 %v1055_v48, %s1878_s21 }
 0x698   :  { %1133 = vrot.lane.b32.xlu0 %v1960_v20, %s1878_s21 }
 0x6e4   :  { %v961_v27 = vpop.xlane.xlu1 %960 }
 0x6e5   :  { %1839 = vrcp.f32 %v961_v27  ;;  %v1320_v27 = vld [vmem:[#allocation2 + $0x190] sm:$0x1] }
 0x6e6   :  { %v1321_v19 = vunpack.c.l.bf16 %v1320_v27 }
 0x6eb   :  { %v1840_v28 = vpop.eup %1839 }
 0x6ec   :  { %v963_v30 = vmul.f32 %v1840_v28, %v1834_v4  ;;  %v1801_v4 = vld [vmem:[#allocation2 + $0x188] sm:$0xff]  ;;  %v1322_v28 = vperm.slane %v1321_v19, 0 }
 0x6ed   :  { %1364 = vmatpush.bf16.msrb.mxu2 %v1801_v4 }
 0x6ee   :  { %v964_v2 = vpack.c.bf16 %v963_v30, %v963_v30 }
 0x6f0   :  { %1613 = vmatmul.msk.bf16.vlgmr.msrb.gmra.mxu3 %vm266_vm2, %v964_v2 }
 0x6f1   :  { %1365 = vmatpush.bf16.msrb.mxu2 %v1800_v5 }
 0x6f5   :  { %1366 = vmatpush.bf16.msrb.mxu2 %v1799_v6 }
 0x6f9   :  { %1367 = vmatpush.bf16.msrb.mxu2 %v1798_v7 }
 0x6fd   :  { %1368 = vmatpush.bf16.msrb.mxu2 %v1797_v17 }
 0x701   :  { %1369 = vmatpush.bf16.msrb.mxu2 %v1796_v18 }
 0x702   :  { %v1058_v20 = vpop.permute.xlu0 %1057 }
 0x703   :  { %v1060_v32 = vadd.f32 %v1058_v20, %v1028_v0 }
 0x705   :  { %v1070_v33 = vpack.c.bf16 %v1060_v32, %v1060_v32 }
 0x707   :  { %1631 = vmatmul.msk.bf16.vlgmr.msra.gmra.mxu1 %vm245_vm1, %v1070_v33 }
 0x70a   :  { %v1134_v34 = vpop.permute.xlu0 %1133 }
 0x70b   :  { %1649 = vmatmul.msk.bf16.vlgmr.msra.gmra.mxu3 %vm245_vm1, %v1134_v34 }
 0x773   :  { %v981_v35 = vpop.f32.mrf.mxu3 }
 0x774   :  { %v1065_v36 = vpack.c.bf16 %v981_v35, %v981_v35 }
 0x776   :  { %1640 = vmatmul.msk.bf16.vlgmr.msra.gmra.mxu2 %vm245_vm1, %v1065_v36 }
 0x77b   :  { %v983_v39 = vpop.f32.mrf.mxu3 }
 0x784   :  { %v1095_v41 = vpop.f32.mrf.mxu1 }
 0x785   :  { %v1099_v56 = vperm.slane %v1095_v41, 0 }
 0x78c   :  { %v1097_v42 = vpop.f32.mrf.mxu1 }
 0x78e   :  { %v1159_v43 = vpop.f32.mrf.mxu3 }
 0x796   :  { %v1161_v44 = vpop.f32.mrf.mxu3 }
 0x7f9   :  { %v1124_v57 = vpop.f32.mrf.mxu2 }
 0x7fa   :  { %v1125_v58 = vadd.f32 %v1124_v57, %v1099_v56 }
 0x7fc   :  { %v1163_v60 = vadd.f32 %v1159_v43, %v1125_v58 }
 0x7fe   :  { %v1167_v61 = vadd.f32 %v1166_v59, %v1163_v60 }
 0x800   :  { %v1168_v62 = vmax.f32 %v1167_v61, 0.0 }
 0x801   :  { %v1126_v63 = vpop.f32.mrf.mxu2 }
 0x802   :  { %v1181_v0 = vpack.c.bf16 %v1168_v62, %v1168_v62 }
 0x804   :  { %1674 = vmatmul.msk.bf16.vlgmr.msra.gmra.mxu0 %vm544_vm10, %v1181_v0 }
 0x881   :  { %v1233_v12 = vpop.f32.mrf.mxu0 }
 0x882   :  { %v1234_v13 = vadd.f32 %v1233_v12, %v1184_v10 }
 0x884   :  { %v1237_v14 = vmax.f32 %v1234_v13, 0.0 }
 0x886   :  { %v1250_v15 = vpack.c.bf16 %v1237_v14, %v1237_v14 }
 0x888   :  { %1699 = vmatmul.msk.bf16.vlgmr.msrb.gmra.mxu1 %vm544_vm10, %v1250_v15 }
 0x889   :  { %v1235_v16 = vpop.f32.mrf.mxu0 }
 0x905   :  { %v1302_v24 = vpop.f32.mrf.mxu1 }
 0x906   :  { %v1303_v48 = vadd.f32 %v1302_v24, %v1253_v23 }
 0x908   :  { %v1306_v11 = vmax.f32 %v1303_v48, 0.0 }
 0x90a   :  { %v1319_v25 = vpack.c.bf16 %v1306_v11, %v1306_v11 }
 0x90c   :  { %1724 = vmatmul.msk.bf16.vlgmr.msrb.gmra.mxu2 %vm544_vm10, %v1319_v25 }
 0x90d   :  { %v1304_v26 = vpop.f32.mrf.mxu1 }
 0x98f   :  { %v1371_v29 = vpop.f32.mrf.mxu2 }
 0x990   :  { %v1372_v30 = vadd.f32 %v1371_v29, %v1322_v28 }
 0x992   :  { %v1376_v31 = vand.u32 2147483647, %v1372_v30  ;;  %v1375_v36 = vmax.f32 %v1372_v30, 0.0 }
 0x994   :  { %v1377_v2 = vsub.f32 0.0, %v1376_v31 }
 0x996   :  { %v1378_v20 = vmul.f32 1.442695, %v1377_v2 }
 0x997   :  { %v1373_v32 = vpop.f32.mrf.mxu2 }
 0x998   :  { %1841 = vpow2.f32 %v1378_v20 }
 0x99e   :  { %v1842_v33 = vpop.eup %1841 }
 0x99f   :  { %v1380_v34 = vadd.f32 1.0, %v1842_v33 }
 0x9a1   :  { %1843 = vlog2.f32 %v1380_v34 }
 0x9a7   :  { %v1844_v35 = vpop.eup %1843 }
 0x9a8   :  { %v1382_v37 = vmul.f32 0.6931472, %v1844_v35 }
 0x9aa   :  { %v1383_v38 = vadd.f32 %v1382_v37, %v1375_v36 }
 0x9ac   :  { %v1384_v39 = vmul.f32 0.9, %v1383_v38 }
 0x9ae   :  { %v1385_v40 = vadd.f32 0.1, %v1384_v39 }
 0x9b0   :  { %v1386_v41 = vsel %vm701_vm11, %v1372_v30, %v1385_v40 }
 0x9b1   :  { %1725 = vst.msk [vmem:[%s2002_s2 + $0x8] sm:$0xff] %vm714_vm12, %v1386_v41 }
 0x9b2   :  { %1393 = vsyncpa [#allocation3], 1 }

</bundles_post_ra>
